<compile_context>
chip_gen: v7x
topology: tpu7x:2x2x1
jax: 0.10.0
libtpu: 0.0.40
codegen_flags: <defaults>
</compile_context>

<pallas_src>
import functools
import math

import jax
import jax.numpy as jnp
from jax import lax
from jax.experimental import pallas as pl
from jax.experimental.pallas import tpu as pltpu

LOG2PI = float(math.log(2.0 * math.pi))
POOL = 7          # F.avg_pool2d(., 7, 1, 3), count_include_pad -> divide by 49
PAD = 3
SUB, LANE = 8, 128

# Fixed buffers of the original module (deterministic constants).
A_RGB2YUV = (
    (0.299, -0.14714119, 0.61497538),
    (0.587, -0.28886916, -0.51496512),
    (0.114, 0.43601035, -0.10001026),
)
A_YUV2RGB = (
    (1.0, 1.0, 1.0),
    (0.0, -0.39465, 2.03211),
    (1.13983, -0.58060, 0.0),
)


# ---------------------------------------------------------------------------
# Fused kernel: rgb2yuv + noise -> z ; color-map 7x7 avg-pool ; NLL partial
# ---------------------------------------------------------------------------
def _fused_kernel(*refs, bblk, H, W, to_yuv, add_noise, use_tpu_roll):
    if add_noise:
        gt_ref, noise_ref, z_ref, sse_ref = refs
    else:
        gt_ref, z_ref, sse_ref = refs
        noise_ref = None

    # Edge masks for the zero-padded 7-tap sums (hoisted; reused for all planes).
    col = lax.broadcasted_iota(jnp.int32, (H, W), 1)
    row = lax.broadcasted_iota(jnp.int32, (H, W), 0)
    taps = (-PAD, -2, -1, 1, 2, PAD)
    hmask = {d: (col + d >= 0) & (col + d < W) for d in taps}
    vmask = {d: (row + d >= 0) & (row + d < H) for d in taps}

    def shifted(x, d, axis, mask, size):
        # out[i] = x[i + d] with zero padding outside [0, size)
        if use_tpu_roll:
            r = pltpu.roll(x, (-d) % size, axis)      # XLU rotate (TPU only)
        else:
            r = jnp.roll(x, -d, axis=axis)            # portable (interpret/CPU)
        return jnp.where(mask, r, 0.0)

    for j in range(bblk):
        rch = gt_ref[j, 0].astype(jnp.float32)
        gch = gt_ref[j, 1].astype(jnp.float32)
        bch = gt_ref[j, 2].astype(jnp.float32)
        if to_yuv:
            planes = [A_RGB2YUV[0][c] * rch + A_RGB2YUV[1][c] * gch
                      + A_RGB2YUV[2][c] * bch for c in range(3)]
        else:
            planes = [rch, gch, bch]

        # z = yuv + noise, written per channel so noise is not kept live.
        for c in range(3):
            zc = planes[c]
            if add_noise:
                zc = zc + noise_ref[j, c].astype(jnp.float32)
            z_ref[j, c] = zc.astype(z_ref.dtype)

        # color map (on the YUV-converted gt, as in the reference code).
        inv_s = 1.0 / (planes[0] + planes[1] + planes[2] + 1e-4)

        sq = None
        for c in range(3):
            cm = planes[c] * inv_s
            # separable 7x7 zero-padded avg pool: 6+6 masked rolls + adds
            h = cm
            for d in taps:
                h = h + shifted(cm, d, 1, hmask[d], W)
            v = h
            for d in taps:
                v = v + shifted(h, d, 0, vmask[d], H)
            mean_c = v * (1.0 / float(POOL * POOL))
            # re-read z from the (already resident) output block
            dc = z_ref[j, c].astype(jnp.float32) - mean_c
            sq = dc * dc if sq is None else sq + dc * dc

        # single cross-lane reduction per image; full-width (8,128) store
        sse_ref[j] = jnp.full((SUB, LANE), jnp.sum(sq), jnp.float32)


# ---------------------------------------------------------------------------
# Plain-JAX glue (same math as the module's own helpers)
# ---------------------------------------------------------------------------
def squeeze2d(x, factor):
    B, C, H, W = x.shape
    assert H % factor == 0 and W % factor == 0
    x = x.reshape(B, C, H // factor, factor, W // factor, factor)
    x = jnp.transpose(x, (0, 1, 3, 5, 2, 4))
    return x.reshape(B, C * factor * factor, H // factor, W // factor)


class VQLLFLOWDeformablePallas:
    """Pallas/JAX port of the self-contained parts of VQLLFLOWDeformable."""

    def __init__(self, quant=255.0, to_yuv=True):
        self.quant = float(quant)
        self.to_yuv = bool(to_yuv)
        self.A_rgb2yuv = jnp.array(A_RGB2YUV, jnp.float32)  # folded into kernel
        self.A_yuv2rgb = jnp.array(A_YUV2RGB, jnp.float32)  # (reverse path only)

    def _run_fused(self, gt, noise, add_noise):
        B, C, H, W = gt.shape
        assert C == 3, "rgb2yuv / color map require 3 channels"

        # Block over B so each grid step is a reasonably sized block (amortize
        # the ~0.35us per-step overhead on small crops).  bblk divides B.
        per_img_bytes = 3 * H * W * 4
        cap = max(1, (1 << 20) // max(per_img_bytes, 1))
        bblk = 1
        for d in range(min(B, cap), 0, -1):
            if B % d == 0:
                bblk = d
                break

        use_tpu_roll = jax.default_backend() == "tpu"
        kern = functools.partial(_fused_kernel, bblk=bblk, H=H, W=W,
                                 to_yuv=self.to_yuv, add_noise=add_noise,
                                 use_tpu_roll=use_tpu_roll)

        itemsize = jnp.dtype(gt.dtype).itemsize
        in_bytes = bblk * 3 * H * W * itemsize
        if add_noise:
            in_bytes += bblk * 3 * H * W * 4
        out_bytes = bblk * 3 * H * W * itemsize + bblk * SUB * LANE * 4
        vmem_cap = 64 << 20
        if use_tpu_roll:
            try:  # query real VMEM capacity (v7x has only 64MiB per core)
                vmem_cap = int(pltpu.get_tpu_info().vmem_capacity_bytes)
            except Exception:  # pragma: no cover - keep conservative default
                pass
        vmem_limit = int(min(max(2 * (in_bytes + out_bytes) + (8 << 20), 32 << 20),
                             (vmem_cap * 3) // 4))

        img_spec = pl.BlockSpec((bblk, 3, H, W), lambda i: (i, 0, 0, 0))
        in_specs = [img_spec] + ([img_spec] if add_noise else [])
        inputs = (gt, noise) if add_noise else (gt,)

        z, sse = pl.pallas_call(
            kern,
            out_shape=(jax.ShapeDtypeStruct((B, 3, H, W), gt.dtype),
                       jax.ShapeDtypeStruct((B, SUB, LANE), jnp.float32)),
            grid=(B // bblk,),
            in_specs=in_specs,
            out_specs=(pl.BlockSpec((bblk, 3, H, W), lambda i: (i, 0, 0, 0)),
                       pl.BlockSpec((bblk, SUB, LANE), lambda i: (i, 0, 0))),
            compiler_params=pltpu.CompilerParams(
                dimension_semantics=("parallel",),
                vmem_limit_bytes=vmem_limit),
        )(*inputs)
        return z, sse[:, 0, 0]

    def normal_flow(self, gt, noise_key, add_gt_noise=True):
        """gt: (B, 3, H, W) float, NCHW (PyTorch convention)."""
        B, C, H, W = gt.shape
        pixels = H * W                                   # thops.pixels(gt)

        if add_gt_noise:
            # matches: z = z + (torch.rand(z.shape) - 0.5) / quant
            noise = ((jax.random.uniform(noise_key, (B, 3, H, W),
                                         dtype=jnp.float32) - 0.5)
                     / jnp.float32(self.quant))
        else:
            noise = None
        z, sse = self._run_fused(gt, noise, add_gt_noise)

        logdet = jnp.zeros((B,), jnp.float32)
        if add_gt_noise:
            logdet = logdet + jnp.float32(-math.log(self.quant) * pixels)

        # TODO(synk): flowUpsamplerNet stand-in (squeeze2d identity, zero logdet)
        epses = squeeze2d(z, 4)                          # (B, 48, H/4, W/4)

        # GaussianDiag.logp(mean, 0, z): squeeze2d(., 4) is a permutation, so the
        # sum over the squeezed tensors equals the in-kernel unsqueezed sum.
        n_elems = float(3 * H * W)
        logp = -0.5 * (n_elems * LOG2PI + sse)           # (B,)
        objective = logdet + logp
        nll = -objective / jnp.float32(math.log(2.0) * pixels)
        return epses, nll, logdet

    def __call__(self, gt, noise_key):
        return self.normal_flow(gt, noise_key)


# ---------------------------------------------------------------------------
# Pure-JAX reference (same math, no Pallas) used for the self-check
# ---------------------------------------------------------------------------
def _reference_normal_flow(gt, noise_key, quant, to_yuv=True, add_gt_noise=True):
    B, C, H, W = gt.shape
    r, g, b = gt[:, 0], gt[:, 1], gt[:, 2]
    if to_yuv:
        x = jnp.stack([A_RGB2YUV[0][c] * r + A_RGB2YUV[1][c] * g
                       + A_RGB2YUV[2][c] * b for c in range(3)], axis=1)
    else:
        x = gt.astype(jnp.float32)
    z = x
    pixels = H * W
    logdet = jnp.zeros((B,), jnp.float32)
    if add_gt_noise:
        noise = ((jax.random.uniform(noise_key, (B, 3, H, W), dtype=jnp.float32)
                  - 0.5) / quant)
        z = z + noise
        logdet = logdet + jnp.float32(-math.log(quant) * pixels)
    cm = x / (jnp.sum(x, axis=1, keepdims=True) + 1e-4)
    p = jnp.pad(cm, ((0, 0), (0, 0), (PAD, PAD), (PAD, PAD)))
    mean = sum(p[:, :, dy:dy + H, dx:dx + W]
               for dy in range(POOL) for dx in range(POOL)) / float(POOL * POOL)
    sse = jnp.sum((z - mean) ** 2, axis=(1, 2, 3))
    logp = -0.5 * (3.0 * H * W * LOG2PI + sse)
    objective = logdet + logp
    nll = -objective / jnp.float32(math.log(2.0) * pixels)
    return squeeze2d(z, 4), nll, logdet


if __name__ == "__main__":
    key = jax.random.PRNGKey(0)
    k_gt, k_noise = jax.random.split(key)
    B, C, H, W = 2, 3, 16, 16
    gt = jax.random.uniform(k_gt, (B, C, H, W), dtype=jnp.float32)

    model = VQLLFLOWDeformablePallas(quant=255.0, to_yuv=True)
    epses, nll, logdet = model(gt, k_noise)
    jax.block_until_ready((epses, nll, logdet))

    assert epses.shape == (B, C * 16, H // 4, W // 4)
    assert nll.shape == (B,)
    assert logdet.shape == (B,)
    assert bool(jnp.all(jnp.isfinite(nll)))

    # Numerical self-check against the pure-JAX reference (same key -> same noise).
    epses_ref, nll_ref, logdet_ref = _reference_normal_flow(gt, k_noise, 255.0, True)
    assert bool(jnp.allclose(epses, epses_ref, rtol=1e-5, atol=1e-4))
    assert bool(jnp.allclose(logdet, logdet_ref, rtol=1e-6, atol=1e-4))
    assert bool(jnp.allclose(nll, nll_ref, rtol=2e-3, atol=1e-3))

    print("KERNEL_OK")
</pallas_src>

<mosaic_0001>
module attributes {stable_mosaic.version = 11 : i64} {
  func.func @_fused_kernel(%arg0: i32, %arg1: memref<2x3x16x16xf32, #tpu.memory_space<vmem>>, %arg2: memref<2x3x16x16xf32, #tpu.memory_space<vmem>>, %arg3: memref<2x3x16x16xf32, #tpu.memory_space<vmem>>, %arg4: memref<2x8x128xf32, #tpu.memory_space<vmem>>) attributes {dimension_semantics = [#tpu.dimension_semantics<parallel>], iteration_bounds = array<i64: 1>, scalar_prefetch = 0 : i64, scratch_operands = 0 : i64, tpu.core_type = #tpu.core_type<tc>, window_params = [{transform_indices = @transform_0, window_bounds = array<i64: 2, 3, 16, 16>}, {transform_indices = @transform_1, window_bounds = array<i64: 2, 3, 16, 16>}, {transform_indices = @transform_2, window_bounds = array<i64: 2, 3, 16, 16>}, {transform_indices = @transform_3, window_bounds = array<i64: 2, 8, 128>}]} {
    %0 = tpu.iota {dimensions = array<i32: 1>} : vector<16x16xi32>
    %1 = tpu.iota {dimensions = array<i32: 0>} : vector<16x16xi32>
    %c-3_i32 = arith.constant -3 : i32
    %2 = vector.broadcast %c-3_i32 : i32 to vector<16x16xi32>
    %3 = arith.addi %0, %2 : vector<16x16xi32>
    %c0_i32 = arith.constant 0 : i32
    %4 = vector.broadcast %c0_i32 : i32 to vector<16x16xi32>
    %5 = arith.cmpi sge, %3, %4 : vector<16x16xi32>
    %c-3_i32_0 = arith.constant -3 : i32
    %6 = vector.broadcast %c-3_i32_0 : i32 to vector<16x16xi32>
    %7 = arith.addi %0, %6 : vector<16x16xi32>
    %c16_i32 = arith.constant 16 : i32
    %8 = vector.broadcast %c16_i32 : i32 to vector<16x16xi32>
    %9 = arith.cmpi slt, %7, %8 : vector<16x16xi32>
    %10 = arith.andi %5, %9 : vector<16x16xi1>
    %c-2_i32 = arith.constant -2 : i32
    %11 = vector.broadcast %c-2_i32 : i32 to vector<16x16xi32>
    %12 = arith.addi %0, %11 : vector<16x16xi32>
    %c0_i32_1 = arith.constant 0 : i32
    %13 = vector.broadcast %c0_i32_1 : i32 to vector<16x16xi32>
    %14 = arith.cmpi sge, %12, %13 : vector<16x16xi32>
    %c-2_i32_2 = arith.constant -2 : i32
    %15 = vector.broadcast %c-2_i32_2 : i32 to vector<16x16xi32>
    %16 = arith.addi %0, %15 : vector<16x16xi32>
    %c16_i32_3 = arith.constant 16 : i32
    %17 = vector.broadcast %c16_i32_3 : i32 to vector<16x16xi32>
    %18 = arith.cmpi slt, %16, %17 : vector<16x16xi32>
    %19 = arith.andi %14, %18 : vector<16x16xi1>
    %c-1_i32 = arith.constant -1 : i32
    %20 = vector.broadcast %c-1_i32 : i32 to vector<16x16xi32>
    %21 = arith.addi %0, %20 : vector<16x16xi32>
    %c0_i32_4 = arith.constant 0 : i32
    %22 = vector.broadcast %c0_i32_4 : i32 to vector<16x16xi32>
    %23 = arith.cmpi sge, %21, %22 : vector<16x16xi32>
    %c-1_i32_5 = arith.constant -1 : i32
    %24 = vector.broadcast %c-1_i32_5 : i32 to vector<16x16xi32>
    %25 = arith.addi %0, %24 : vector<16x16xi32>
    %c16_i32_6 = arith.constant 16 : i32
    %26 = vector.broadcast %c16_i32_6 : i32 to vector<16x16xi32>
    %27 = arith.cmpi slt, %25, %26 : vector<16x16xi32>
    %28 = arith.andi %23, %27 : vector<16x16xi1>
    %c1_i32 = arith.constant 1 : i32
    %29 = vector.broadcast %c1_i32 : i32 to vector<16x16xi32>
    %30 = arith.addi %0, %29 : vector<16x16xi32>
    %c0_i32_7 = arith.constant 0 : i32
    %31 = vector.broadcast %c0_i32_7 : i32 to vector<16x16xi32>
    %32 = arith.cmpi sge, %30, %31 : vector<16x16xi32>
    %c1_i32_8 = arith.constant 1 : i32
    %33 = vector.broadcast %c1_i32_8 : i32 to vector<16x16xi32>
    %34 = arith.addi %0, %33 : vector<16x16xi32>
    %c16_i32_9 = arith.constant 16 : i32
    %35 = vector.broadcast %c16_i32_9 : i32 to vector<16x16xi32>
    %36 = arith.cmpi slt, %34, %35 : vector<16x16xi32>
    %37 = arith.andi %32, %36 : vector<16x16xi1>
    %c2_i32 = arith.constant 2 : i32
    %38 = vector.broadcast %c2_i32 : i32 to vector<16x16xi32>
    %39 = arith.addi %0, %38 : vector<16x16xi32>
    %c0_i32_10 = arith.constant 0 : i32
    %40 = vector.broadcast %c0_i32_10 : i32 to vector<16x16xi32>
    %41 = arith.cmpi sge, %39, %40 : vector<16x16xi32>
    %c2_i32_11 = arith.constant 2 : i32
    %42 = vector.broadcast %c2_i32_11 : i32 to vector<16x16xi32>
    %43 = arith.addi %0, %42 : vector<16x16xi32>
    %c16_i32_12 = arith.constant 16 : i32
    %44 = vector.broadcast %c16_i32_12 : i32 to vector<16x16xi32>
    %45 = arith.cmpi slt, %43, %44 : vector<16x16xi32>
    %46 = arith.andi %41, %45 : vector<16x16xi1>
    %c3_i32 = arith.constant 3 : i32
    %47 = vector.broadcast %c3_i32 : i32 to vector<16x16xi32>
    %48 = arith.addi %0, %47 : vector<16x16xi32>
    %c0_i32_13 = arith.constant 0 : i32
    %49 = vector.broadcast %c0_i32_13 : i32 to vector<16x16xi32>
    %50 = arith.cmpi sge, %48, %49 : vector<16x16xi32>
    %c3_i32_14 = arith.constant 3 : i32
    %51 = vector.broadcast %c3_i32_14 : i32 to vector<16x16xi32>
    %52 = arith.addi %0, %51 : vector<16x16xi32>
    %c16_i32_15 = arith.constant 16 : i32
    %53 = vector.broadcast %c16_i32_15 : i32 to vector<16x16xi32>
    %54 = arith.cmpi slt, %52, %53 : vector<16x16xi32>
    %55 = arith.andi %50, %54 : vector<16x16xi1>
    %c-3_i32_16 = arith.constant -3 : i32
    %56 = vector.broadcast %c-3_i32_16 : i32 to vector<16x16xi32>
    %57 = arith.addi %1, %56 : vector<16x16xi32>
    %c0_i32_17 = arith.constant 0 : i32
    %58 = vector.broadcast %c0_i32_17 : i32 to vector<16x16xi32>
    %59 = arith.cmpi sge, %57, %58 : vector<16x16xi32>
    %c-3_i32_18 = arith.constant -3 : i32
    %60 = vector.broadcast %c-3_i32_18 : i32 to vector<16x16xi32>
    %61 = arith.addi %1, %60 : vector<16x16xi32>
    %c16_i32_19 = arith.constant 16 : i32
    %62 = vector.broadcast %c16_i32_19 : i32 to vector<16x16xi32>
    %63 = arith.cmpi slt, %61, %62 : vector<16x16xi32>
    %64 = arith.andi %59, %63 : vector<16x16xi1>
    %c-2_i32_20 = arith.constant -2 : i32
    %65 = vector.broadcast %c-2_i32_20 : i32 to vector<16x16xi32>
    %66 = arith.addi %1, %65 : vector<16x16xi32>
    %c0_i32_21 = arith.constant 0 : i32
    %67 = vector.broadcast %c0_i32_21 : i32 to vector<16x16xi32>
    %68 = arith.cmpi sge, %66, %67 : vector<16x16xi32>
    %c-2_i32_22 = arith.constant -2 : i32
    %69 = vector.broadcast %c-2_i32_22 : i32 to vector<16x16xi32>
    %70 = arith.addi %1, %69 : vector<16x16xi32>
    %c16_i32_23 = arith.constant 16 : i32
    %71 = vector.broadcast %c16_i32_23 : i32 to vector<16x16xi32>
    %72 = arith.cmpi slt, %70, %71 : vector<16x16xi32>
    %73 = arith.andi %68, %72 : vector<16x16xi1>
    %c-1_i32_24 = arith.constant -1 : i32
    %74 = vector.broadcast %c-1_i32_24 : i32 to vector<16x16xi32>
    %75 = arith.addi %1, %74 : vector<16x16xi32>
    %c0_i32_25 = arith.constant 0 : i32
    %76 = vector.broadcast %c0_i32_25 : i32 to vector<16x16xi32>
    %77 = arith.cmpi sge, %75, %76 : vector<16x16xi32>
    %c-1_i32_26 = arith.constant -1 : i32
    %78 = vector.broadcast %c-1_i32_26 : i32 to vector<16x16xi32>
    %79 = arith.addi %1, %78 : vector<16x16xi32>
    %c16_i32_27 = arith.constant 16 : i32
    %80 = vector.broadcast %c16_i32_27 : i32 to vector<16x16xi32>
    %81 = arith.cmpi slt, %79, %80 : vector<16x16xi32>
    %82 = arith.andi %77, %81 : vector<16x16xi1>
    %c1_i32_28 = arith.constant 1 : i32
    %83 = vector.broadcast %c1_i32_28 : i32 to vector<16x16xi32>
    %84 = arith.addi %1, %83 : vector<16x16xi32>
    %c0_i32_29 = arith.constant 0 : i32
    %85 = vector.broadcast %c0_i32_29 : i32 to vector<16x16xi32>
    %86 = arith.cmpi sge, %84, %85 : vector<16x16xi32>
    %c1_i32_30 = arith.constant 1 : i32
    %87 = vector.broadcast %c1_i32_30 : i32 to vector<16x16xi32>
    %88 = arith.addi %1, %87 : vector<16x16xi32>
    %c16_i32_31 = arith.constant 16 : i32
    %89 = vector.broadcast %c16_i32_31 : i32 to vector<16x16xi32>
    %90 = arith.cmpi slt, %88, %89 : vector<16x16xi32>
    %91 = arith.andi %86, %90 : vector<16x16xi1>
    %c2_i32_32 = arith.constant 2 : i32
    %92 = vector.broadcast %c2_i32_32 : i32 to vector<16x16xi32>
    %93 = arith.addi %1, %92 : vector<16x16xi32>
    %c0_i32_33 = arith.constant 0 : i32
    %94 = vector.broadcast %c0_i32_33 : i32 to vector<16x16xi32>
    %95 = arith.cmpi sge, %93, %94 : vector<16x16xi32>
    %c2_i32_34 = arith.constant 2 : i32
    %96 = vector.broadcast %c2_i32_34 : i32 to vector<16x16xi32>
    %97 = arith.addi %1, %96 : vector<16x16xi32>
    %c16_i32_35 = arith.constant 16 : i32
    %98 = vector.broadcast %c16_i32_35 : i32 to vector<16x16xi32>
    %99 = arith.cmpi slt, %97, %98 : vector<16x16xi32>
    %100 = arith.andi %95, %99 : vector<16x16xi1>
    %c3_i32_36 = arith.constant 3 : i32
    %101 = vector.broadcast %c3_i32_36 : i32 to vector<16x16xi32>
    %102 = arith.addi %1, %101 : vector<16x16xi32>
    %c0_i32_37 = arith.constant 0 : i32
    %103 = vector.broadcast %c0_i32_37 : i32 to vector<16x16xi32>
    %104 = arith.cmpi sge, %102, %103 : vector<16x16xi32>
    %c3_i32_38 = arith.constant 3 : i32
    %105 = vector.broadcast %c3_i32_38 : i32 to vector<16x16xi32>
    %106 = arith.addi %1, %105 : vector<16x16xi32>
    %c16_i32_39 = arith.constant 16 : i32
    %107 = vector.broadcast %c16_i32_39 : i32 to vector<16x16xi32>
    %108 = arith.cmpi slt, %106, %107 : vector<16x16xi32>
    %109 = arith.andi %104, %108 : vector<16x16xi1>
    %c0 = arith.constant 0 : index
    %c0_40 = arith.constant 0 : index
    %c0_41 = arith.constant 0 : index
    %c0_42 = arith.constant 0 : index
    %110 = vector.load %arg1[%c0, %c0_40, %c0_41, %c0_42] : memref<2x3x16x16xf32, #tpu.memory_space<vmem>>, vector<1x1x16x16xf32>
    %111 = vector.shape_cast %110 : vector<1x1x16x16xf32> to vector<16x16xf32>
    %c0_43 = arith.constant 0 : index
    %c1 = arith.constant 1 : index
    %c0_44 = arith.constant 0 : index
    %c0_45 = arith.constant 0 : index
    %112 = vector.load %arg1[%c0_43, %c1, %c0_44, %c0_45] : memref<2x3x16x16xf32, #tpu.memory_space<vmem>>, vector<1x1x16x16xf32>
    %113 = vector.shape_cast %112 : vector<1x1x16x16xf32> to vector<16x16xf32>
    %c0_46 = arith.constant 0 : index
    %c2 = arith.constant 2 : index
    %c0_47 = arith.constant 0 : index
    %c0_48 = arith.constant 0 : index
    %114 = vector.load %arg1[%c0_46, %c2, %c0_47, %c0_48] : memref<2x3x16x16xf32, #tpu.memory_space<vmem>>, vector<1x1x16x16xf32>
    %115 = vector.shape_cast %114 : vector<1x1x16x16xf32> to vector<16x16xf32>
    %cst = arith.constant 2.990000e-01 : f32
    %116 = vector.broadcast %cst : f32 to vector<16x16xf32>
    %117 = arith.mulf %116, %111 : vector<16x16xf32>
    %cst_49 = arith.constant 5.870000e-01 : f32
    %118 = vector.broadcast %cst_49 : f32 to vector<16x16xf32>
    %119 = arith.mulf %118, %113 : vector<16x16xf32>
    %120 = arith.addf %117, %119 : vector<16x16xf32>
    %cst_50 = arith.constant 1.140000e-01 : f32
    %121 = vector.broadcast %cst_50 : f32 to vector<16x16xf32>
    %122 = arith.mulf %121, %115 : vector<16x16xf32>
    %123 = arith.addf %120, %122 : vector<16x16xf32>
    %cst_51 = arith.constant -0.147141188 : f32
    %124 = vector.broadcast %cst_51 : f32 to vector<16x16xf32>
    %125 = arith.mulf %124, %111 : vector<16x16xf32>
    %cst_52 = arith.constant -0.288869172 : f32
    %126 = vector.broadcast %cst_52 : f32 to vector<16x16xf32>
    %127 = arith.mulf %126, %113 : vector<16x16xf32>
    %128 = arith.addf %125, %127 : vector<16x16xf32>
    %cst_53 = arith.constant 0.436010361 : f32
    %129 = vector.broadcast %cst_53 : f32 to vector<16x16xf32>
    %130 = arith.mulf %129, %115 : vector<16x16xf32>
    %131 = arith.addf %128, %130 : vector<16x16xf32>
    %cst_54 = arith.constant 0.614975392 : f32
    %132 = vector.broadcast %cst_54 : f32 to vector<16x16xf32>
    %133 = arith.mulf %132, %111 : vector<16x16xf32>
    %cst_55 = arith.constant -0.514965117 : f32
    %134 = vector.broadcast %cst_55 : f32 to vector<16x16xf32>
    %135 = arith.mulf %134, %113 : vector<16x16xf32>
    %136 = arith.addf %133, %135 : vector<16x16xf32>
    %cst_56 = arith.constant -0.100010261 : f32
    %137 = vector.broadcast %cst_56 : f32 to vector<16x16xf32>
    %138 = arith.mulf %137, %115 : vector<16x16xf32>
    %139 = arith.addf %136, %138 : vector<16x16xf32>
    %c0_57 = arith.constant 0 : index
    %c0_58 = arith.constant 0 : index
    %c0_59 = arith.constant 0 : index
    %c0_60 = arith.constant 0 : index
    %140 = vector.load %arg2[%c0_57, %c0_58, %c0_59, %c0_60] : memref<2x3x16x16xf32, #tpu.memory_space<vmem>>, vector<1x1x16x16xf32>
    %141 = vector.shape_cast %140 : vector<1x1x16x16xf32> to vector<16x16xf32>
    %142 = arith.addf %123, %141 : vector<16x16xf32>
    %c0_61 = arith.constant 0 : index
    %c0_62 = arith.constant 0 : index
    %c0_63 = arith.constant 0 : index
    %c0_64 = arith.constant 0 : index
    %143 = vector.load %arg3[%c0_61, %c0_62, %c0_63, %c0_64] : memref<2x3x16x16xf32, #tpu.memory_space<vmem>>, vector<1x1x16x16xf32>
    %144 = vector.shape_cast %143 : vector<1x1x16x16xf32> to vector<16x16xf32>
    %145 = vector.shape_cast %142 : vector<16x16xf32> to vector<1x1x16x16xf32>
    tpu.vector_store %arg3[%c0_61, %c0_62, %c0_63, %c0_64], %145 {strides = array<i32>} : memref<2x3x16x16xf32, #tpu.memory_space<vmem>>, vector<1x1x16x16xf32>,
    %c0_65 = arith.constant 0 : index
    %c1_66 = arith.constant 1 : index
    %c0_67 = arith.constant 0 : index
    %c0_68 = arith.constant 0 : index
    %146 = vector.load %arg2[%c0_65, %c1_66, %c0_67, %c0_68] : memref<2x3x16x16xf32, #tpu.memory_space<vmem>>, vector<1x1x16x16xf32>
    %147 = vector.shape_cast %146 : vector<1x1x16x16xf32> to vector<16x16xf32>
    %148 = arith.addf %131, %147 : vector<16x16xf32>
    %c0_69 = arith.constant 0 : index
    %c1_70 = arith.constant 1 : index
    %c0_71 = arith.constant 0 : index
    %c0_72 = arith.constant 0 : index
    %149 = vector.load %arg3[%c0_69, %c1_70, %c0_71, %c0_72] : memref<2x3x16x16xf32, #tpu.memory_space<vmem>>, vector<1x1x16x16xf32>
    %150 = vector.shape_cast %149 : vector<1x1x16x16xf32> to vector<16x16xf32>
    %151 = vector.shape_cast %148 : vector<16x16xf32> to vector<1x1x16x16xf32>
    tpu.vector_store %arg3[%c0_69, %c1_70, %c0_71, %c0_72], %151 {strides = array<i32>} : memref<2x3x16x16xf32, #tpu.memory_space<vmem>>, vector<1x1x16x16xf32>,
    %c0_73 = arith.constant 0 : index
    %c2_74 = arith.constant 2 : index
    %c0_75 = arith.constant 0 : index
    %c0_76 = arith.constant 0 : index
    %152 = vector.load %arg2[%c0_73, %c2_74, %c0_75, %c0_76] : memref<2x3x16x16xf32, #tpu.memory_space<vmem>>, vector<1x1x16x16xf32>
    %153 = vector.shape_cast %152 : vector<1x1x16x16xf32> to vector<16x16xf32>
    %154 = arith.addf %139, %153 : vector<16x16xf32>
    %c0_77 = arith.constant 0 : index
    %c2_78 = arith.constant 2 : index
    %c0_79 = arith.constant 0 : index
    %c0_80 = arith.constant 0 : index
    %155 = vector.load %arg3[%c0_77, %c2_78, %c0_79, %c0_80] : memref<2x3x16x16xf32, #tpu.memory_space<vmem>>, vector<1x1x16x16xf32>
    %156 = vector.shape_cast %155 : vector<1x1x16x16xf32> to vector<16x16xf32>
    %157 = vector.shape_cast %154 : vector<16x16xf32> to vector<1x1x16x16xf32>
    tpu.vector_store %arg3[%c0_77, %c2_78, %c0_79, %c0_80], %157 {strides = array<i32>} : memref<2x3x16x16xf32, #tpu.memory_space<vmem>>, vector<1x1x16x16xf32>,
    %158 = arith.addf %123, %131 : vector<16x16xf32>
    %159 = arith.addf %158, %139 : vector<16x16xf32>
    %cst_81 = arith.constant 9.99999974E-5 : f32
    %160 = vector.broadcast %cst_81 : f32 to vector<16x16xf32>
    %161 = arith.addf %159, %160 : vector<16x16xf32>
    %cst_82 = arith.constant 1.000000e+00 : f32
    %162 = vector.broadcast %cst_82 : f32 to vector<16x16xf32>
    %163 = arith.divf %162, %161 : vector<16x16xf32>
    %164 = arith.mulf %123, %163 : vector<16x16xf32>
    %165 = vector.extract_strided_slice %164 {offsets = [0, 13], sizes = [16, 3], strides = [1, 1]} : vector<16x16xf32> to vector<16x3xf32>
    %166 = vector.extract_strided_slice %164 {offsets = [0, 0], sizes = [16, 13], strides = [1, 1]} : vector<16x16xf32> to vector<16x13xf32>
    %167 = tpu.concatenate %165, %166 in 1 : vector<16x3xf32>, vector<16x13xf32> -> vector<16x16xf32>
    %cst_83 = arith.constant 0.000000e+00 : f32
    %168 = vector.broadcast %cst_83 : f32 to vector<16x16xf32>
    %169 = arith.select %10, %167, %168 : vector<16x16xi1>, vector<16x16xf32>
    %170 = arith.addf %164, %169 : vector<16x16xf32>
    %171 = vector.extract_strided_slice %164 {offsets = [0, 14], sizes = [16, 2], strides = [1, 1]} : vector<16x16xf32> to vector<16x2xf32>
    %172 = vector.extract_strided_slice %164 {offsets = [0, 0], sizes = [16, 14], strides = [1, 1]} : vector<16x16xf32> to vector<16x14xf32>
    %173 = tpu.concatenate %171, %172 in 1 : vector<16x2xf32>, vector<16x14xf32> -> vector<16x16xf32>
    %cst_84 = arith.constant 0.000000e+00 : f32
    %174 = vector.broadcast %cst_84 : f32 to vector<16x16xf32>
    %175 = arith.select %19, %173, %174 : vector<16x16xi1>, vector<16x16xf32>
    %176 = arith.addf %170, %175 : vector<16x16xf32>
    %177 = vector.extract_strided_slice %164 {offsets = [0, 15], sizes = [16, 1], strides = [1, 1]} : vector<16x16xf32> to vector<16x1xf32>
    %178 = vector.extract_strided_slice %164 {offsets = [0, 0], sizes = [16, 15], strides = [1, 1]} : vector<16x16xf32> to vector<16x15xf32>
    %179 = tpu.concatenate %177, %178 in 1 : vector<16x1xf32>, vector<16x15xf32> -> vector<16x16xf32>
    %cst_85 = arith.constant 0.000000e+00 : f32
    %180 = vector.broadcast %cst_85 : f32 to vector<16x16xf32>
    %181 = arith.select %28, %179, %180 : vector<16x16xi1>, vector<16x16xf32>
    %182 = arith.addf %176, %181 : vector<16x16xf32>
    %183 = vector.extract_strided_slice %164 {offsets = [0, 1], sizes = [16, 15], strides = [1, 1]} : vector<16x16xf32> to vector<16x15xf32>
    %184 = vector.extract_strided_slice %164 {offsets = [0, 0], sizes = [16, 1], strides = [1, 1]} : vector<16x16xf32> to vector<16x1xf32>
    %185 = tpu.concatenate %183, %184 in 1 : vector<16x15xf32>, vector<16x1xf32> -> vector<16x16xf32>
    %cst_86 = arith.constant 0.000000e+00 : f32
    %186 = vector.broadcast %cst_86 : f32 to vector<16x16xf32>
    %187 = arith.select %37, %185, %186 : vector<16x16xi1>, vector<16x16xf32>
    %188 = arith.addf %182, %187 : vector<16x16xf32>
    %189 = vector.extract_strided_slice %164 {offsets = [0, 2], sizes = [16, 14], strides = [1, 1]} : vector<16x16xf32> to vector<16x14xf32>
    %190 = vector.extract_strided_slice %164 {offsets = [0, 0], sizes = [16, 2], strides = [1, 1]} : vector<16x16xf32> to vector<16x2xf32>
    %191 = tpu.concatenate %189, %190 in 1 : vector<16x14xf32>, vector<16x2xf32> -> vector<16x16xf32>
    %cst_87 = arith.constant 0.000000e+00 : f32
    %192 = vector.broadcast %cst_87 : f32 to vector<16x16xf32>
    %193 = arith.select %46, %191, %192 : vector<16x16xi1>, vector<16x16xf32>
    %194 = arith.addf %188, %193 : vector<16x16xf32>
    %195 = vector.extract_strided_slice %164 {offsets = [0, 3], sizes = [16, 13], strides = [1, 1]} : vector<16x16xf32> to vector<16x13xf32>
    %196 = vector.extract_strided_slice %164 {offsets = [0, 0], sizes = [16, 3], strides = [1, 1]} : vector<16x16xf32> to vector<16x3xf32>
    %197 = tpu.concatenate %195, %196 in 1 : vector<16x13xf32>, vector<16x3xf32> -> vector<16x16xf32>
    %cst_88 = arith.constant 0.000000e+00 : f32
    %198 = vector.broadcast %cst_88 : f32 to vector<16x16xf32>
    %199 = arith.select %55, %197, %198 : vector<16x16xi1>, vector<16x16xf32>
    %200 = arith.addf %194, %199 : vector<16x16xf32>
    %201 = vector.extract_strided_slice %200 {offsets = [13, 0], sizes = [3, 16], strides = [1, 1]} : vector<16x16xf32> to vector<3x16xf32>
    %202 = vector.extract_strided_slice %200 {offsets = [0, 0], sizes = [13, 16], strides = [1, 1]} : vector<16x16xf32> to vector<13x16xf32>
    %203 = tpu.concatenate %201, %202 in 0 : vector<3x16xf32>, vector<13x16xf32> -> vector<16x16xf32>
    %cst_89 = arith.constant 0.000000e+00 : f32
    %204 = vector.broadcast %cst_89 : f32 to vector<16x16xf32>
    %205 = arith.select %64, %203, %204 : vector<16x16xi1>, vector<16x16xf32>
    %206 = arith.addf %200, %205 : vector<16x16xf32>
    %207 = vector.extract_strided_slice %200 {offsets = [14, 0], sizes = [2, 16], strides = [1, 1]} : vector<16x16xf32> to vector<2x16xf32>
    %208 = vector.extract_strided_slice %200 {offsets = [0, 0], sizes = [14, 16], strides = [1, 1]} : vector<16x16xf32> to vector<14x16xf32>
    %209 = tpu.concatenate %207, %208 in 0 : vector<2x16xf32>, vector<14x16xf32> -> vector<16x16xf32>
    %cst_90 = arith.constant 0.000000e+00 : f32
    %210 = vector.broadcast %cst_90 : f32 to vector<16x16xf32>
    %211 = arith.select %73, %209, %210 : vector<16x16xi1>, vector<16x16xf32>
    %212 = arith.addf %206, %211 : vector<16x16xf32>
    %213 = vector.extract_strided_slice %200 {offsets = [15, 0], sizes = [1, 16], strides = [1, 1]} : vector<16x16xf32> to vector<1x16xf32>
    %214 = vector.extract_strided_slice %200 {offsets = [0, 0], sizes = [15, 16], strides = [1, 1]} : vector<16x16xf32> to vector<15x16xf32>
    %215 = tpu.concatenate %213, %214 in 0 : vector<1x16xf32>, vector<15x16xf32> -> vector<16x16xf32>
    %cst_91 = arith.constant 0.000000e+00 : f32
    %216 = vector.broadcast %cst_91 : f32 to vector<16x16xf32>
    %217 = arith.select %82, %215, %216 : vector<16x16xi1>, vector<16x16xf32>
    %218 = arith.addf %212, %217 : vector<16x16xf32>
    %219 = vector.extract_strided_slice %200 {offsets = [1, 0], sizes = [15, 16], strides = [1, 1]} : vector<16x16xf32> to vector<15x16xf32>
    %220 = vector.extract_strided_slice %200 {offsets = [0, 0], sizes = [1, 16], strides = [1, 1]} : vector<16x16xf32> to vector<1x16xf32>
    %221 = tpu.concatenate %219, %220 in 0 : vector<15x16xf32>, vector<1x16xf32> -> vector<16x16xf32>
    %cst_92 = arith.constant 0.000000e+00 : f32
    %222 = vector.broadcast %cst_92 : f32 to vector<16x16xf32>
    %223 = arith.select %91, %221, %222 : vector<16x16xi1>, vector<16x16xf32>
    %224 = arith.addf %218, %223 : vector<16x16xf32>
    %225 = vector.extract_strided_slice %200 {offsets = [2, 0], sizes = [14, 16], strides = [1, 1]} : vector<16x16xf32> to vector<14x16xf32>
    %226 = vector.extract_strided_slice %200 {offsets = [0, 0], sizes = [2, 16], strides = [1, 1]} : vector<16x16xf32> to vector<2x16xf32>
    %227 = tpu.concatenate %225, %226 in 0 : vector<14x16xf32>, vector<2x16xf32> -> vector<16x16xf32>
    %cst_93 = arith.constant 0.000000e+00 : f32
    %228 = vector.broadcast %cst_93 : f32 to vector<16x16xf32>
    %229 = arith.select %100, %227, %228 : vector<16x16xi1>, vector<16x16xf32>
    %230 = arith.addf %224, %229 : vector<16x16xf32>
    %231 = vector.extract_strided_slice %200 {offsets = [3, 0], sizes = [13, 16], strides = [1, 1]} : vector<16x16xf32> to vector<13x16xf32>
    %232 = vector.extract_strided_slice %200 {offsets = [0, 0], sizes = [3, 16], strides = [1, 1]} : vector<16x16xf32> to vector<3x16xf32>
    %233 = tpu.concatenate %231, %232 in 0 : vector<13x16xf32>, vector<3x16xf32> -> vector<16x16xf32>
    %cst_94 = arith.constant 0.000000e+00 : f32
    %234 = vector.broadcast %cst_94 : f32 to vector<16x16xf32>
    %235 = arith.select %109, %233, %234 : vector<16x16xi1>, vector<16x16xf32>
    %236 = arith.addf %230, %235 : vector<16x16xf32>
    %cst_95 = arith.constant 0.0204081628 : f32
    %237 = vector.broadcast %cst_95 : f32 to vector<16x16xf32>
    %238 = arith.mulf %236, %237 : vector<16x16xf32>
    %c0_96 = arith.constant 0 : index
    %c0_97 = arith.constant 0 : index
    %c0_98 = arith.constant 0 : index
    %c0_99 = arith.constant 0 : index
    %239 = vector.load %arg3[%c0_96, %c0_97, %c0_98, %c0_99] : memref<2x3x16x16xf32, #tpu.memory_space<vmem>>, vector<1x1x16x16xf32>
    %240 = vector.shape_cast %239 : vector<1x1x16x16xf32> to vector<16x16xf32>
    %241 = arith.subf %240, %238 : vector<16x16xf32>
    %242 = arith.mulf %241, %241 : vector<16x16xf32>
    %243 = arith.mulf %131, %163 : vector<16x16xf32>
    %244 = vector.extract_strided_slice %243 {offsets = [0, 13], sizes = [16, 3], strides = [1, 1]} : vector<16x16xf32> to vector<16x3xf32>
    %245 = vector.extract_strided_slice %243 {offsets = [0, 0], sizes = [16, 13], strides = [1, 1]} : vector<16x16xf32> to vector<16x13xf32>
    %246 = tpu.concatenate %244, %245 in 1 : vector<16x3xf32>, vector<16x13xf32> -> vector<16x16xf32>
    %cst_100 = arith.constant 0.000000e+00 : f32
    %247 = vector.broadcast %cst_100 : f32 to vector<16x16xf32>
    %248 = arith.select %10, %246, %247 : vector<16x16xi1>, vector<16x16xf32>
    %249 = arith.addf %243, %248 : vector<16x16xf32>
    %250 = vector.extract_strided_slice %243 {offsets = [0, 14], sizes = [16, 2], strides = [1, 1]} : vector<16x16xf32> to vector<16x2xf32>
    %251 = vector.extract_strided_slice %243 {offsets = [0, 0], sizes = [16, 14], strides = [1, 1]} : vector<16x16xf32> to vector<16x14xf32>
    %252 = tpu.concatenate %250, %251 in 1 : vector<16x2xf32>, vector<16x14xf32> -> vector<16x16xf32>
    %cst_101 = arith.constant 0.000000e+00 : f32
    %253 = vector.broadcast %cst_101 : f32 to vector<16x16xf32>
    %254 = arith.select %19, %252, %253 : vector<16x16xi1>, vector<16x16xf32>
    %255 = arith.addf %249, %254 : vector<16x16xf32>
    %256 = vector.extract_strided_slice %243 {offsets = [0, 15], sizes = [16, 1], strides = [1, 1]} : vector<16x16xf32> to vector<16x1xf32>
    %257 = vector.extract_strided_slice %243 {offsets = [0, 0], sizes = [16, 15], strides = [1, 1]} : vector<16x16xf32> to vector<16x15xf32>
    %258 = tpu.concatenate %256, %257 in 1 : vector<16x1xf32>, vector<16x15xf32> -> vector<16x16xf32>
    %cst_102 = arith.constant 0.000000e+00 : f32
    %259 = vector.broadcast %cst_102 : f32 to vector<16x16xf32>
    %260 = arith.select %28, %258, %259 : vector<16x16xi1>, vector<16x16xf32>
    %261 = arith.addf %255, %260 : vector<16x16xf32>
    %262 = vector.extract_strided_slice %243 {offsets = [0, 1], sizes = [16, 15], strides = [1, 1]} : vector<16x16xf32> to vector<16x15xf32>
    %263 = vector.extract_strided_slice %243 {offsets = [0, 0], sizes = [16, 1], strides = [1, 1]} : vector<16x16xf32> to vector<16x1xf32>
    %264 = tpu.concatenate %262, %263 in 1 : vector<16x15xf32>, vector<16x1xf32> -> vector<16x16xf32>
    %cst_103 = arith.constant 0.000000e+00 : f32
    %265 = vector.broadcast %cst_103 : f32 to vector<16x16xf32>
    %266 = arith.select %37, %264, %265 : vector<16x16xi1>, vector<16x16xf32>
    %267 = arith.addf %261, %266 : vector<16x16xf32>
    %268 = vector.extract_strided_slice %243 {offsets = [0, 2], sizes = [16, 14], strides = [1, 1]} : vector<16x16xf32> to vector<16x14xf32>
    %269 = vector.extract_strided_slice %243 {offsets = [0, 0], sizes = [16, 2], strides = [1, 1]} : vector<16x16xf32> to vector<16x2xf32>
    %270 = tpu.concatenate %268, %269 in 1 : vector<16x14xf32>, vector<16x2xf32> -> vector<16x16xf32>
    %cst_104 = arith.constant 0.000000e+00 : f32
    %271 = vector.broadcast %cst_104 : f32 to vector<16x16xf32>
    %272 = arith.select %46, %270, %271 : vector<16x16xi1>, vector<16x16xf32>
    %273 = arith.addf %267, %272 : vector<16x16xf32>
    %274 = vector.extract_strided_slice %243 {offsets = [0, 3], sizes = [16, 13], strides = [1, 1]} : vector<16x16xf32> to vector<16x13xf32>
    %275 = vector.extract_strided_slice %243 {offsets = [0, 0], sizes = [16, 3], strides = [1, 1]} : vector<16x16xf32> to vector<16x3xf32>
    %276 = tpu.concatenate %274, %275 in 1 : vector<16x13xf32>, vector<16x3xf32> -> vector<16x16xf32>
    %cst_105 = arith.constant 0.000000e+00 : f32
    %277 = vector.broadcast %cst_105 : f32 to vector<16x16xf32>
    %278 = arith.select %55, %276, %277 : vector<16x16xi1>, vector<16x16xf32>
    %279 = arith.addf %273, %278 : vector<16x16xf32>
    %280 = vector.extract_strided_slice %279 {offsets = [13, 0], sizes = [3, 16], strides = [1, 1]} : vector<16x16xf32> to vector<3x16xf32>
    %281 = vector.extract_strided_slice %279 {offsets = [0, 0], sizes = [13, 16], strides = [1, 1]} : vector<16x16xf32> to vector<13x16xf32>
    %282 = tpu.concatenate %280, %281 in 0 : vector<3x16xf32>, vector<13x16xf32> -> vector<16x16xf32>
    %cst_106 = arith.constant 0.000000e+00 : f32
    %283 = vector.broadcast %cst_106 : f32 to vector<16x16xf32>
    %284 = arith.select %64, %282, %283 : vector<16x16xi1>, vector<16x16xf32>
    %285 = arith.addf %279, %284 : vector<16x16xf32>
    %286 = vector.extract_strided_slice %279 {offsets = [14, 0], sizes = [2, 16], strides = [1, 1]} : vector<16x16xf32> to vector<2x16xf32>
    %287 = vector.extract_strided_slice %279 {offsets = [0, 0], sizes = [14, 16], strides = [1, 1]} : vector<16x16xf32> to vector<14x16xf32>
    %288 = tpu.concatenate %286, %287 in 0 : vector<2x16xf32>, vector<14x16xf32> -> vector<16x16xf32>
    %cst_107 = arith.constant 0.000000e+00 : f32
    %289 = vector.broadcast %cst_107 : f32 to vector<16x16xf32>
    %290 = arith.select %73, %288, %289 : vector<16x16xi1>, vector<16x16xf32>
    %291 = arith.addf %285, %290 : vector<16x16xf32>
    %292 = vector.extract_strided_slice %279 {offsets = [15, 0], sizes = [1, 16], strides = [1, 1]} : vector<16x16xf32> to vector<1x16xf32>
    %293 = vector.extract_strided_slice %279 {offsets = [0, 0], sizes = [15, 16], strides = [1, 1]} : vector<16x16xf32> to vector<15x16xf32>
    %294 = tpu.concatenate %292, %293 in 0 : vector<1x16xf32>, vector<15x16xf32> -> vector<16x16xf32>
    %cst_108 = arith.constant 0.000000e+00 : f32
    %295 = vector.broadcast %cst_108 : f32 to vector<16x16xf32>
    %296 = arith.select %82, %294, %295 : vector<16x16xi1>, vector<16x16xf32>
    %297 = arith.addf %291, %296 : vector<16x16xf32>
    %298 = vector.extract_strided_slice %279 {offsets = [1, 0], sizes = [15, 16], strides = [1, 1]} : vector<16x16xf32> to vector<15x16xf32>
    %299 = vector.extract_strided_slice %279 {offsets = [0, 0], sizes = [1, 16], strides = [1, 1]} : vector<16x16xf32> to vector<1x16xf32>
    %300 = tpu.concatenate %298, %299 in 0 : vector<15x16xf32>, vector<1x16xf32> -> vector<16x16xf32>
    %cst_109 = arith.constant 0.000000e+00 : f32
    %301 = vector.broadcast %cst_109 : f32 to vector<16x16xf32>
    %302 = arith.select %91, %300, %301 : vector<16x16xi1>, vector<16x16xf32>
    %303 = arith.addf %297, %302 : vector<16x16xf32>
    %304 = vector.extract_strided_slice %279 {offsets = [2, 0], sizes = [14, 16], strides = [1, 1]} : vector<16x16xf32> to vector<14x16xf32>
    %305 = vector.extract_strided_slice %279 {offsets = [0, 0], sizes = [2, 16], strides = [1, 1]} : vector<16x16xf32> to vector<2x16xf32>
    %306 = tpu.concatenate %304, %305 in 0 : vector<14x16xf32>, vector<2x16xf32> -> vector<16x16xf32>
    %cst_110 = arith.constant 0.000000e+00 : f32
    %307 = vector.broadcast %cst_110 : f32 to vector<16x16xf32>
    %308 = arith.select %100, %306, %307 : vector<16x16xi1>, vector<16x16xf32>
    %309 = arith.addf %303, %308 : vector<16x16xf32>
    %310 = vector.extract_strided_slice %279 {offsets = [3, 0], sizes = [13, 16], strides = [1, 1]} : vector<16x16xf32> to vector<13x16xf32>
    %311 = vector.extract_strided_slice %279 {offsets = [0, 0], sizes = [3, 16], strides = [1, 1]} : vector<16x16xf32> to vector<3x16xf32>
    %312 = tpu.concatenate %310, %311 in 0 : vector<13x16xf32>, vector<3x16xf32> -> vector<16x16xf32>
    %cst_111 = arith.constant 0.000000e+00 : f32
    %313 = vector.broadcast %cst_111 : f32 to vector<16x16xf32>
    %314 = arith.select %109, %312, %313 : vector<16x16xi1>, vector<16x16xf32>
    %315 = arith.addf %309, %314 : vector<16x16xf32>
    %cst_112 = arith.constant 0.0204081628 : f32
    %316 = vector.broadcast %cst_112 : f32 to vector<16x16xf32>
    %317 = arith.mulf %315, %316 : vector<16x16xf32>
    %c0_113 = arith.constant 0 : index
    %c1_114 = arith.constant 1 : index
    %c0_115 = arith.constant 0 : index
    %c0_116 = arith.constant 0 : index
    %318 = vector.load %arg3[%c0_113, %c1_114, %c0_115, %c0_116] : memref<2x3x16x16xf32, #tpu.memory_space<vmem>>, vector<1x1x16x16xf32>
    %319 = vector.shape_cast %318 : vector<1x1x16x16xf32> to vector<16x16xf32>
    %320 = arith.subf %319, %317 : vector<16x16xf32>
    %321 = arith.mulf %320, %320 : vector<16x16xf32>
    %322 = arith.addf %242, %321 : vector<16x16xf32>
    %323 = arith.mulf %139, %163 : vector<16x16xf32>
    %324 = vector.extract_strided_slice %323 {offsets = [0, 13], sizes = [16, 3], strides = [1, 1]} : vector<16x16xf32> to vector<16x3xf32>
    %325 = vector.extract_strided_slice %323 {offsets = [0, 0], sizes = [16, 13], strides = [1, 1]} : vector<16x16xf32> to vector<16x13xf32>
    %326 = tpu.concatenate %324, %325 in 1 : vector<16x3xf32>, vector<16x13xf32> -> vector<16x16xf32>
    %cst_117 = arith.constant 0.000000e+00 : f32
    %327 = vector.broadcast %cst_117 : f32 to vector<16x16xf32>
    %328 = arith.select %10, %326, %327 : vector<16x16xi1>, vector<16x16xf32>
    %329 = arith.addf %323, %328 : vector<16x16xf32>
    %330 = vector.extract_strided_slice %323 {offsets = [0, 14], sizes = [16, 2], strides = [1, 1]} : vector<16x16xf32> to vector<16x2xf32>
    %331 = vector.extract_strided_slice %323 {offsets = [0, 0], sizes = [16, 14], strides = [1, 1]} : vector<16x16xf32> to vector<16x14xf32>
    %332 = tpu.concatenate %330, %331 in 1 : vector<16x2xf32>, vector<16x14xf32> -> vector<16x16xf32>
    %cst_118 = arith.constant 0.000000e+00 : f32
    %333 = vector.broadcast %cst_118 : f32 to vector<16x16xf32>
    %334 = arith.select %19, %332, %333 : vector<16x16xi1>, vector<16x16xf32>
    %335 = arith.addf %329, %334 : vector<16x16xf32>
    %336 = vector.extract_strided_slice %323 {offsets = [0, 15], sizes = [16, 1], strides = [1, 1]} : vector<16x16xf32> to vector<16x1xf32>
    %337 = vector.extract_strided_slice %323 {offsets = [0, 0], sizes = [16, 15], strides = [1, 1]} : vector<16x16xf32> to vector<16x15xf32>
    %338 = tpu.concatenate %336, %337 in 1 : vector<16x1xf32>, vector<16x15xf32> -> vector<16x16xf32>
    %cst_119 = arith.constant 0.000000e+00 : f32
    %339 = vector.broadcast %cst_119 : f32 to vector<16x16xf32>
    %340 = arith.select %28, %338, %339 : vector<16x16xi1>, vector<16x16xf32>
    %341 = arith.addf %335, %340 : vector<16x16xf32>
    %342 = vector.extract_strided_slice %323 {offsets = [0, 1], sizes = [16, 15], strides = [1, 1]} : vector<16x16xf32> to vector<16x15xf32>
    %343 = vector.extract_strided_slice %323 {offsets = [0, 0], sizes = [16, 1], strides = [1, 1]} : vector<16x16xf32> to vector<16x1xf32>
    %344 = tpu.concatenate %342, %343 in 1 : vector<16x15xf32>, vector<16x1xf32> -> vector<16x16xf32>
    %cst_120 = arith.constant 0.000000e+00 : f32
    %345 = vector.broadcast %cst_120 : f32 to vector<16x16xf32>
    %346 = arith.select %37, %344, %345 : vector<16x16xi1>, vector<16x16xf32>
    %347 = arith.addf %341, %346 : vector<16x16xf32>
    %348 = vector.extract_strided_slice %323 {offsets = [0, 2], sizes = [16, 14], strides = [1, 1]} : vector<16x16xf32> to vector<16x14xf32>
    %349 = vector.extract_strided_slice %323 {offsets = [0, 0], sizes = [16, 2], strides = [1, 1]} : vector<16x16xf32> to vector<16x2xf32>
    %350 = tpu.concatenate %348, %349 in 1 : vector<16x14xf32>, vector<16x2xf32> -> vector<16x16xf32>
    %cst_121 = arith.constant 0.000000e+00 : f32
    %351 = vector.broadcast %cst_121 : f32 to vector<16x16xf32>
    %352 = arith.select %46, %350, %351 : vector<16x16xi1>, vector<16x16xf32>
    %353 = arith.addf %347, %352 : vector<16x16xf32>
    %354 = vector.extract_strided_slice %323 {offsets = [0, 3], sizes = [16, 13], strides = [1, 1]} : vector<16x16xf32> to vector<16x13xf32>
    %355 = vector.extract_strided_slice %323 {offsets = [0, 0], sizes = [16, 3], strides = [1, 1]} : vector<16x16xf32> to vector<16x3xf32>
    %356 = tpu.concatenate %354, %355 in 1 : vector<16x13xf32>, vector<16x3xf32> -> vector<16x16xf32>
    %cst_122 = arith.constant 0.000000e+00 : f32
    %357 = vector.broadcast %cst_122 : f32 to vector<16x16xf32>
    %358 = arith.select %55, %356, %357 : vector<16x16xi1>, vector<16x16xf32>
    %359 = arith.addf %353, %358 : vector<16x16xf32>
    %360 = vector.extract_strided_slice %359 {offsets = [13, 0], sizes = [3, 16], strides = [1, 1]} : vector<16x16xf32> to vector<3x16xf32>
    %361 = vector.extract_strided_slice %359 {offsets = [0, 0], sizes = [13, 16], strides = [1, 1]} : vector<16x16xf32> to vector<13x16xf32>
    %362 = tpu.concatenate %360, %361 in 0 : vector<3x16xf32>, vector<13x16xf32> -> vector<16x16xf32>
    %cst_123 = arith.constant 0.000000e+00 : f32
    %363 = vector.broadcast %cst_123 : f32 to vector<16x16xf32>
    %364 = arith.select %64, %362, %363 : vector<16x16xi1>, vector<16x16xf32>
    %365 = arith.addf %359, %364 : vector<16x16xf32>
    %366 = vector.extract_strided_slice %359 {offsets = [14, 0], sizes = [2, 16], strides = [1, 1]} : vector<16x16xf32> to vector<2x16xf32>
    %367 = vector.extract_strided_slice %359 {offsets = [0, 0], sizes = [14, 16], strides = [1, 1]} : vector<16x16xf32> to vector<14x16xf32>
    %368 = tpu.concatenate %366, %367 in 0 : vector<2x16xf32>, vector<14x16xf32> -> vector<16x16xf32>
    %cst_124 = arith.constant 0.000000e+00 : f32
    %369 = vector.broadcast %cst_124 : f32 to vector<16x16xf32>
    %370 = arith.select %73, %368, %369 : vector<16x16xi1>, vector<16x16xf32>
    %371 = arith.addf %365, %370 : vector<16x16xf32>
    %372 = vector.extract_strided_slice %359 {offsets = [15, 0], sizes = [1, 16], strides = [1, 1]} : vector<16x16xf32> to vector<1x16xf32>
    %373 = vector.extract_strided_slice %359 {offsets = [0, 0], sizes = [15, 16], strides = [1, 1]} : vector<16x16xf32> to vector<15x16xf32>
    %374 = tpu.concatenate %372, %373 in 0 : vector<1x16xf32>, vector<15x16xf32> -> vector<16x16xf32>
    %cst_125 = arith.constant 0.000000e+00 : f32
    %375 = vector.broadcast %cst_125 : f32 to vector<16x16xf32>
    %376 = arith.select %82, %374, %375 : vector<16x16xi1>, vector<16x16xf32>
    %377 = arith.addf %371, %376 : vector<16x16xf32>
    %378 = vector.extract_strided_slice %359 {offsets = [1, 0], sizes = [15, 16], strides = [1, 1]} : vector<16x16xf32> to vector<15x16xf32>
    %379 = vector.extract_strided_slice %359 {offsets = [0, 0], sizes = [1, 16], strides = [1, 1]} : vector<16x16xf32> to vector<1x16xf32>
    %380 = tpu.concatenate %378, %379 in 0 : vector<15x16xf32>, vector<1x16xf32> -> vector<16x16xf32>
    %cst_126 = arith.constant 0.000000e+00 : f32
    %381 = vector.broadcast %cst_126 : f32 to vector<16x16xf32>
    %382 = arith.select %91, %380, %381 : vector<16x16xi1>, vector<16x16xf32>
    %383 = arith.addf %377, %382 : vector<16x16xf32>
    %384 = vector.extract_strided_slice %359 {offsets = [2, 0], sizes = [14, 16], strides = [1, 1]} : vector<16x16xf32> to vector<14x16xf32>
    %385 = vector.extract_strided_slice %359 {offsets = [0, 0], sizes = [2, 16], strides = [1, 1]} : vector<16x16xf32> to vector<2x16xf32>
    %386 = tpu.concatenate %384, %385 in 0 : vector<14x16xf32>, vector<2x16xf32> -> vector<16x16xf32>
    %cst_127 = arith.constant 0.000000e+00 : f32
    %387 = vector.broadcast %cst_127 : f32 to vector<16x16xf32>
    %388 = arith.select %100, %386, %387 : vector<16x16xi1>, vector<16x16xf32>
    %389 = arith.addf %383, %388 : vector<16x16xf32>
    %390 = vector.extract_strided_slice %359 {offsets = [3, 0], sizes = [13, 16], strides = [1, 1]} : vector<16x16xf32> to vector<13x16xf32>
    %391 = vector.extract_strided_slice %359 {offsets = [0, 0], sizes = [3, 16], strides = [1, 1]} : vector<16x16xf32> to vector<3x16xf32>
    %392 = tpu.concatenate %390, %391 in 0 : vector<13x16xf32>, vector<3x16xf32> -> vector<16x16xf32>
    %cst_128 = arith.constant 0.000000e+00 : f32
    %393 = vector.broadcast %cst_128 : f32 to vector<16x16xf32>
    %394 = arith.select %109, %392, %393 : vector<16x16xi1>, vector<16x16xf32>
    %395 = arith.addf %389, %394 : vector<16x16xf32>
    %cst_129 = arith.constant 0.0204081628 : f32
    %396 = vector.broadcast %cst_129 : f32 to vector<16x16xf32>
    %397 = arith.mulf %395, %396 : vector<16x16xf32>
    %c0_130 = arith.constant 0 : index
    %c2_131 = arith.constant 2 : index
    %c0_132 = arith.constant 0 : index
    %c0_133 = arith.constant 0 : index
    %398 = vector.load %arg3[%c0_130, %c2_131, %c0_132, %c0_133] : memref<2x3x16x16xf32, #tpu.memory_space<vmem>>, vector<1x1x16x16xf32>
    %399 = vector.shape_cast %398 : vector<1x1x16x16xf32> to vector<16x16xf32>
    %400 = arith.subf %399, %397 : vector<16x16xf32>
    %401 = arith.mulf %400, %400 : vector<16x16xf32>
    %402 = arith.addf %322, %401 : vector<16x16xf32>
    %403 = vector.shape_cast %402 : vector<16x16xf32> to vector<1x16x16xf32>
    %cst_134 = arith.constant dense<0.000000e+00> : vector<1xf32>
    %404 = vector.multi_reduction <add>, %403, %cst_134 [1, 2] : vector<1x16x16xf32> to vector<1xf32>
    %405 = vector.shape_cast %404 : vector<1xf32> to vector<1x1x1xf32>
    %406 = vector.extract %405[0, 0, 0] : f32 from vector<1x1x1xf32>
    %407 = vector.broadcast %406 : f32 to vector<8x128xf32>
    %c0_135 = arith.constant 0 : index
    %c0_136 = arith.constant 0 : index
    %c0_137 = arith.constant 0 : index
    %408 = vector.load %arg4[%c0_135, %c0_136, %c0_137] : memref<2x8x128xf32, #tpu.memory_space<vmem>>, vector<1x8x128xf32>
    %409 = vector.shape_cast %408 : vector<1x8x128xf32> to vector<8x128xf32>
    %410 = vector.shape_cast %407 : vector<8x128xf32> to vector<1x8x128xf32>
    tpu.vector_store %arg4[%c0_135, %c0_136, %c0_137], %410 {strides = array<i32>} : memref<2x8x128xf32, #tpu.memory_space<vmem>>, vector<1x8x128xf32>,
    %c1_138 = arith.constant 1 : index
    %c0_139 = arith.constant 0 : index
    %c0_140 = arith.constant 0 : index
    %c0_141 = arith.constant 0 : index
    %411 = vector.load %arg1[%c1_138, %c0_139, %c0_140, %c0_141] : memref<2x3x16x16xf32, #tpu.memory_space<vmem>>, vector<1x1x16x16xf32>
    %412 = vector.shape_cast %411 : vector<1x1x16x16xf32> to vector<16x16xf32>
    %c1_142 = arith.constant 1 : index
    %c1_143 = arith.constant 1 : index
    %c0_144 = arith.constant 0 : index
    %c0_145 = arith.constant 0 : index
    %413 = vector.load %arg1[%c1_142, %c1_143, %c0_144, %c0_145] : memref<2x3x16x16xf32, #tpu.memory_space<vmem>>, vector<1x1x16x16xf32>
    %414 = vector.shape_cast %413 : vector<1x1x16x16xf32> to vector<16x16xf32>
    %c1_146 = arith.constant 1 : index
    %c2_147 = arith.constant 2 : index
    %c0_148 = arith.constant 0 : index
    %c0_149 = arith.constant 0 : index
    %415 = vector.load %arg1[%c1_146, %c2_147, %c0_148, %c0_149] : memref<2x3x16x16xf32, #tpu.memory_space<vmem>>, vector<1x1x16x16xf32>
    %416 = vector.shape_cast %415 : vector<1x1x16x16xf32> to vector<16x16xf32>
    %cst_150 = arith.constant 2.990000e-01 : f32
    %417 = vector.broadcast %cst_150 : f32 to vector<16x16xf32>
    %418 = arith.mulf %417, %412 : vector<16x16xf32>
    %cst_151 = arith.constant 5.870000e-01 : f32
    %419 = vector.broadcast %cst_151 : f32 to vector<16x16xf32>
    %420 = arith.mulf %419, %414 : vector<16x16xf32>
    %421 = arith.addf %418, %420 : vector<16x16xf32>
    %cst_152 = arith.constant 1.140000e-01 : f32
    %422 = vector.broadcast %cst_152 : f32 to vector<16x16xf32>
    %423 = arith.mulf %422, %416 : vector<16x16xf32>
    %424 = arith.addf %421, %423 : vector<16x16xf32>
    %cst_153 = arith.constant -0.147141188 : f32
    %425 = vector.broadcast %cst_153 : f32 to vector<16x16xf32>
    %426 = arith.mulf %425, %412 : vector<16x16xf32>
    %cst_154 = arith.constant -0.288869172 : f32
    %427 = vector.broadcast %cst_154 : f32 to vector<16x16xf32>
    %428 = arith.mulf %427, %414 : vector<16x16xf32>
    %429 = arith.addf %426, %428 : vector<16x16xf32>
    %cst_155 = arith.constant 0.436010361 : f32
    %430 = vector.broadcast %cst_155 : f32 to vector<16x16xf32>
    %431 = arith.mulf %430, %416 : vector<16x16xf32>
    %432 = arith.addf %429, %431 : vector<16x16xf32>
    %cst_156 = arith.constant 0.614975392 : f32
    %433 = vector.broadcast %cst_156 : f32 to vector<16x16xf32>
    %434 = arith.mulf %433, %412 : vector<16x16xf32>
    %cst_157 = arith.constant -0.514965117 : f32
    %435 = vector.broadcast %cst_157 : f32 to vector<16x16xf32>
    %436 = arith.mulf %435, %414 : vector<16x16xf32>
    %437 = arith.addf %434, %436 : vector<16x16xf32>
    %cst_158 = arith.constant -0.100010261 : f32
    %438 = vector.broadcast %cst_158 : f32 to vector<16x16xf32>
    %439 = arith.mulf %438, %416 : vector<16x16xf32>
    %440 = arith.addf %437, %439 : vector<16x16xf32>
    %c1_159 = arith.constant 1 : index
    %c0_160 = arith.constant 0 : index
    %c0_161 = arith.constant 0 : index
    %c0_162 = arith.constant 0 : index
    %441 = vector.load %arg2[%c1_159, %c0_160, %c0_161, %c0_162] : memref<2x3x16x16xf32, #tpu.memory_space<vmem>>, vector<1x1x16x16xf32>
    %442 = vector.shape_cast %441 : vector<1x1x16x16xf32> to vector<16x16xf32>
    %443 = arith.addf %424, %442 : vector<16x16xf32>
    %c1_163 = arith.constant 1 : index
    %c0_164 = arith.constant 0 : index
    %c0_165 = arith.constant 0 : index
    %c0_166 = arith.constant 0 : index
    %444 = vector.load %arg3[%c1_163, %c0_164, %c0_165, %c0_166] : memref<2x3x16x16xf32, #tpu.memory_space<vmem>>, vector<1x1x16x16xf32>
    %445 = vector.shape_cast %444 : vector<1x1x16x16xf32> to vector<16x16xf32>
    %446 = vector.shape_cast %443 : vector<16x16xf32> to vector<1x1x16x16xf32>
    tpu.vector_store %arg3[%c1_163, %c0_164, %c0_165, %c0_166], %446 {strides = array<i32>} : memref<2x3x16x16xf32, #tpu.memory_space<vmem>>, vector<1x1x16x16xf32>,
    %c1_167 = arith.constant 1 : index
    %c1_168 = arith.constant 1 : index
    %c0_169 = arith.constant 0 : index
    %c0_170 = arith.constant 0 : index
    %447 = vector.load %arg2[%c1_167, %c1_168, %c0_169, %c0_170] : memref<2x3x16x16xf32, #tpu.memory_space<vmem>>, vector<1x1x16x16xf32>
    %448 = vector.shape_cast %447 : vector<1x1x16x16xf32> to vector<16x16xf32>
    %449 = arith.addf %432, %448 : vector<16x16xf32>
    %c1_171 = arith.constant 1 : index
    %c1_172 = arith.constant 1 : index
    %c0_173 = arith.constant 0 : index
    %c0_174 = arith.constant 0 : index
    %450 = vector.load %arg3[%c1_171, %c1_172, %c0_173, %c0_174] : memref<2x3x16x16xf32, #tpu.memory_space<vmem>>, vector<1x1x16x16xf32>
    %451 = vector.shape_cast %450 : vector<1x1x16x16xf32> to vector<16x16xf32>
    %452 = vector.shape_cast %449 : vector<16x16xf32> to vector<1x1x16x16xf32>
    tpu.vector_store %arg3[%c1_171, %c1_172, %c0_173, %c0_174], %452 {strides = array<i32>} : memref<2x3x16x16xf32, #tpu.memory_space<vmem>>, vector<1x1x16x16xf32>,
    %c1_175 = arith.constant 1 : index
    %c2_176 = arith.constant 2 : index
    %c0_177 = arith.constant 0 : index
    %c0_178 = arith.constant 0 : index
    %453 = vector.load %arg2[%c1_175, %c2_176, %c0_177, %c0_178] : memref<2x3x16x16xf32, #tpu.memory_space<vmem>>, vector<1x1x16x16xf32>
    %454 = vector.shape_cast %453 : vector<1x1x16x16xf32> to vector<16x16xf32>
    %455 = arith.addf %440, %454 : vector<16x16xf32>
    %c1_179 = arith.constant 1 : index
    %c2_180 = arith.constant 2 : index
    %c0_181 = arith.constant 0 : index
    %c0_182 = arith.constant 0 : index
    %456 = vector.load %arg3[%c1_179, %c2_180, %c0_181, %c0_182] : memref<2x3x16x16xf32, #tpu.memory_space<vmem>>, vector<1x1x16x16xf32>
    %457 = vector.shape_cast %456 : vector<1x1x16x16xf32> to vector<16x16xf32>
    %458 = vector.shape_cast %455 : vector<16x16xf32> to vector<1x1x16x16xf32>
    tpu.vector_store %arg3[%c1_179, %c2_180, %c0_181, %c0_182], %458 {strides = array<i32>} : memref<2x3x16x16xf32, #tpu.memory_space<vmem>>, vector<1x1x16x16xf32>,
    %459 = arith.addf %424, %432 : vector<16x16xf32>
    %460 = arith.addf %459, %440 : vector<16x16xf32>
    %cst_183 = arith.constant 9.99999974E-5 : f32
    %461 = vector.broadcast %cst_183 : f32 to vector<16x16xf32>
    %462 = arith.addf %460, %461 : vector<16x16xf32>
    %cst_184 = arith.constant 1.000000e+00 : f32
    %463 = vector.broadcast %cst_184 : f32 to vector<16x16xf32>
    %464 = arith.divf %463, %462 : vector<16x16xf32>
    %465 = arith.mulf %424, %464 : vector<16x16xf32>
    %466 = vector.extract_strided_slice %465 {offsets = [0, 13], sizes = [16, 3], strides = [1, 1]} : vector<16x16xf32> to vector<16x3xf32>
    %467 = vector.extract_strided_slice %465 {offsets = [0, 0], sizes = [16, 13], strides = [1, 1]} : vector<16x16xf32> to vector<16x13xf32>
    %468 = tpu.concatenate %466, %467 in 1 : vector<16x3xf32>, vector<16x13xf32> -> vector<16x16xf32>
    %cst_185 = arith.constant 0.000000e+00 : f32
    %469 = vector.broadcast %cst_185 : f32 to vector<16x16xf32>
    %470 = arith.select %10, %468, %469 : vector<16x16xi1>, vector<16x16xf32>
    %471 = arith.addf %465, %470 : vector<16x16xf32>
    %472 = vector.extract_strided_slice %465 {offsets = [0, 14], sizes = [16, 2], strides = [1, 1]} : vector<16x16xf32> to vector<16x2xf32>
    %473 = vector.extract_strided_slice %465 {offsets = [0, 0], sizes = [16, 14], strides = [1, 1]} : vector<16x16xf32> to vector<16x14xf32>
    %474 = tpu.concatenate %472, %473 in 1 : vector<16x2xf32>, vector<16x14xf32> -> vector<16x16xf32>
    %cst_186 = arith.constant 0.000000e+00 : f32
    %475 = vector.broadcast %cst_186 : f32 to vector<16x16xf32>
    %476 = arith.select %19, %474, %475 : vector<16x16xi1>, vector<16x16xf32>
    %477 = arith.addf %471, %476 : vector<16x16xf32>
    %478 = vector.extract_strided_slice %465 {offsets = [0, 15], sizes = [16, 1], strides = [1, 1]} : vector<16x16xf32> to vector<16x1xf32>
    %479 = vector.extract_strided_slice %465 {offsets = [0, 0], sizes = [16, 15], strides = [1, 1]} : vector<16x16xf32> to vector<16x15xf32>
    %480 = tpu.concatenate %478, %479 in 1 : vector<16x1xf32>, vector<16x15xf32> -> vector<16x16xf32>
    %cst_187 = arith.constant 0.000000e+00 : f32
    %481 = vector.broadcast %cst_187 : f32 to vector<16x16xf32>
    %482 = arith.select %28, %480, %481 : vector<16x16xi1>, vector<16x16xf32>
    %483 = arith.addf %477, %482 : vector<16x16xf32>
    %484 = vector.extract_strided_slice %465 {offsets = [0, 1], sizes = [16, 15], strides = [1, 1]} : vector<16x16xf32> to vector<16x15xf32>
    %485 = vector.extract_strided_slice %465 {offsets = [0, 0], sizes = [16, 1], strides = [1, 1]} : vector<16x16xf32> to vector<16x1xf32>
    %486 = tpu.concatenate %484, %485 in 1 : vector<16x15xf32>, vector<16x1xf32> -> vector<16x16xf32>
    %cst_188 = arith.constant 0.000000e+00 : f32
    %487 = vector.broadcast %cst_188 : f32 to vector<16x16xf32>
    %488 = arith.select %37, %486, %487 : vector<16x16xi1>, vector<16x16xf32>
    %489 = arith.addf %483, %488 : vector<16x16xf32>
    %490 = vector.extract_strided_slice %465 {offsets = [0, 2], sizes = [16, 14], strides = [1, 1]} : vector<16x16xf32> to vector<16x14xf32>
    %491 = vector.extract_strided_slice %465 {offsets = [0, 0], sizes = [16, 2], strides = [1, 1]} : vector<16x16xf32> to vector<16x2xf32>
    %492 = tpu.concatenate %490, %491 in 1 : vector<16x14xf32>, vector<16x2xf32> -> vector<16x16xf32>
    %cst_189 = arith.constant 0.000000e+00 : f32
    %493 = vector.broadcast %cst_189 : f32 to vector<16x16xf32>
    %494 = arith.select %46, %492, %493 : vector<16x16xi1>, vector<16x16xf32>
    %495 = arith.addf %489, %494 : vector<16x16xf32>
    %496 = vector.extract_strided_slice %465 {offsets = [0, 3], sizes = [16, 13], strides = [1, 1]} : vector<16x16xf32> to vector<16x13xf32>
    %497 = vector.extract_strided_slice %465 {offsets = [0, 0], sizes = [16, 3], strides = [1, 1]} : vector<16x16xf32> to vector<16x3xf32>
    %498 = tpu.concatenate %496, %497 in 1 : vector<16x13xf32>, vector<16x3xf32> -> vector<16x16xf32>
    %cst_190 = arith.constant 0.000000e+00 : f32
    %499 = vector.broadcast %cst_190 : f32 to vector<16x16xf32>
    %500 = arith.select %55, %498, %499 : vector<16x16xi1>, vector<16x16xf32>
    %501 = arith.addf %495, %500 : vector<16x16xf32>
    %502 = vector.extract_strided_slice %501 {offsets = [13, 0], sizes = [3, 16], strides = [1, 1]} : vector<16x16xf32> to vector<3x16xf32>
    %503 = vector.extract_strided_slice %501 {offsets = [0, 0], sizes = [13, 16], strides = [1, 1]} : vector<16x16xf32> to vector<13x16xf32>
    %504 = tpu.concatenate %502, %503 in 0 : vector<3x16xf32>, vector<13x16xf32> -> vector<16x16xf32>
    %cst_191 = arith.constant 0.000000e+00 : f32
    %505 = vector.broadcast %cst_191 : f32 to vector<16x16xf32>
    %506 = arith.select %64, %504, %505 : vector<16x16xi1>, vector<16x16xf32>
    %507 = arith.addf %501, %506 : vector<16x16xf32>
    %508 = vector.extract_strided_slice %501 {offsets = [14, 0], sizes = [2, 16], strides = [1, 1]} : vector<16x16xf32> to vector<2x16xf32>
    %509 = vector.extract_strided_slice %501 {offsets = [0, 0], sizes = [14, 16], strides = [1, 1]} : vector<16x16xf32> to vector<14x16xf32>
    %510 = tpu.concatenate %508, %509 in 0 : vector<2x16xf32>, vector<14x16xf32> -> vector<16x16xf32>
    %cst_192 = arith.constant 0.000000e+00 : f32
    %511 = vector.broadcast %cst_192 : f32 to vector<16x16xf32>
    %512 = arith.select %73, %510, %511 : vector<16x16xi1>, vector<16x16xf32>
    %513 = arith.addf %507, %512 : vector<16x16xf32>
    %514 = vector.extract_strided_slice %501 {offsets = [15, 0], sizes = [1, 16], strides = [1, 1]} : vector<16x16xf32> to vector<1x16xf32>
    %515 = vector.extract_strided_slice %501 {offsets = [0, 0], sizes = [15, 16], strides = [1, 1]} : vector<16x16xf32> to vector<15x16xf32>
    %516 = tpu.concatenate %514, %515 in 0 : vector<1x16xf32>, vector<15x16xf32> -> vector<16x16xf32>
    %cst_193 = arith.constant 0.000000e+00 : f32
    %517 = vector.broadcast %cst_193 : f32 to vector<16x16xf32>
    %518 = arith.select %82, %516, %517 : vector<16x16xi1>, vector<16x16xf32>
    %519 = arith.addf %513, %518 : vector<16x16xf32>
    %520 = vector.extract_strided_slice %501 {offsets = [1, 0], sizes = [15, 16], strides = [1, 1]} : vector<16x16xf32> to vector<15x16xf32>
    %521 = vector.extract_strided_slice %501 {offsets = [0, 0], sizes = [1, 16], strides = [1, 1]} : vector<16x16xf32> to vector<1x16xf32>
    %522 = tpu.concatenate %520, %521 in 0 : vector<15x16xf32>, vector<1x16xf32> -> vector<16x16xf32>
    %cst_194 = arith.constant 0.000000e+00 : f32
    %523 = vector.broadcast %cst_194 : f32 to vector<16x16xf32>
    %524 = arith.select %91, %522, %523 : vector<16x16xi1>, vector<16x16xf32>
    %525 = arith.addf %519, %524 : vector<16x16xf32>
    %526 = vector.extract_strided_slice %501 {offsets = [2, 0], sizes = [14, 16], strides = [1, 1]} : vector<16x16xf32> to vector<14x16xf32>
    %527 = vector.extract_strided_slice %501 {offsets = [0, 0], sizes = [2, 16], strides = [1, 1]} : vector<16x16xf32> to vector<2x16xf32>
    %528 = tpu.concatenate %526, %527 in 0 : vector<14x16xf32>, vector<2x16xf32> -> vector<16x16xf32>
    %cst_195 = arith.constant 0.000000e+00 : f32
    %529 = vector.broadcast %cst_195 : f32 to vector<16x16xf32>
    %530 = arith.select %100, %528, %529 : vector<16x16xi1>, vector<16x16xf32>
    %531 = arith.addf %525, %530 : vector<16x16xf32>
    %532 = vector.extract_strided_slice %501 {offsets = [3, 0], sizes = [13, 16], strides = [1, 1]} : vector<16x16xf32> to vector<13x16xf32>
    %533 = vector.extract_strided_slice %501 {offsets = [0, 0], sizes = [3, 16], strides = [1, 1]} : vector<16x16xf32> to vector<3x16xf32>
    %534 = tpu.concatenate %532, %533 in 0 : vector<13x16xf32>, vector<3x16xf32> -> vector<16x16xf32>
    %cst_196 = arith.constant 0.000000e+00 : f32
    %535 = vector.broadcast %cst_196 : f32 to vector<16x16xf32>
    %536 = arith.select %109, %534, %535 : vector<16x16xi1>, vector<16x16xf32>
    %537 = arith.addf %531, %536 : vector<16x16xf32>
    %cst_197 = arith.constant 0.0204081628 : f32
    %538 = vector.broadcast %cst_197 : f32 to vector<16x16xf32>
    %539 = arith.mulf %537, %538 : vector<16x16xf32>
    %c1_198 = arith.constant 1 : index
    %c0_199 = arith.constant 0 : index
    %c0_200 = arith.constant 0 : index
    %c0_201 = arith.constant 0 : index
    %540 = vector.load %arg3[%c1_198, %c0_199, %c0_200, %c0_201] : memref<2x3x16x16xf32, #tpu.memory_space<vmem>>, vector<1x1x16x16xf32>
    %541 = vector.shape_cast %540 : vector<1x1x16x16xf32> to vector<16x16xf32>
    %542 = arith.subf %541, %539 : vector<16x16xf32>
    %543 = arith.mulf %542, %542 : vector<16x16xf32>
    %544 = arith.mulf %432, %464 : vector<16x16xf32>
    %545 = vector.extract_strided_slice %544 {offsets = [0, 13], sizes = [16, 3], strides = [1, 1]} : vector<16x16xf32> to vector<16x3xf32>
    %546 = vector.extract_strided_slice %544 {offsets = [0, 0], sizes = [16, 13], strides = [1, 1]} : vector<16x16xf32> to vector<16x13xf32>
    %547 = tpu.concatenate %545, %546 in 1 : vector<16x3xf32>, vector<16x13xf32> -> vector<16x16xf32>
    %cst_202 = arith.constant 0.000000e+00 : f32
    %548 = vector.broadcast %cst_202 : f32 to vector<16x16xf32>
    %549 = arith.select %10, %547, %548 : vector<16x16xi1>, vector<16x16xf32>
    %550 = arith.addf %544, %549 : vector<16x16xf32>
    %551 = vector.extract_strided_slice %544 {offsets = [0, 14], sizes = [16, 2], strides = [1, 1]} : vector<16x16xf32> to vector<16x2xf32>
    %552 = vector.extract_strided_slice %544 {offsets = [0, 0], sizes = [16, 14], strides = [1, 1]} : vector<16x16xf32> to vector<16x14xf32>
    %553 = tpu.concatenate %551, %552 in 1 : vector<16x2xf32>, vector<16x14xf32> -> vector<16x16xf32>
    %cst_203 = arith.constant 0.000000e+00 : f32
    %554 = vector.broadcast %cst_203 : f32 to vector<16x16xf32>
    %555 = arith.select %19, %553, %554 : vector<16x16xi1>, vector<16x16xf32>
    %556 = arith.addf %550, %555 : vector<16x16xf32>
    %557 = vector.extract_strided_slice %544 {offsets = [0, 15], sizes = [16, 1], strides = [1, 1]} : vector<16x16xf32> to vector<16x1xf32>
    %558 = vector.extract_strided_slice %544 {offsets = [0, 0], sizes = [16, 15], strides = [1, 1]} : vector<16x16xf32> to vector<16x15xf32>
    %559 = tpu.concatenate %557, %558 in 1 : vector<16x1xf32>, vector<16x15xf32> -> vector<16x16xf32>
    %cst_204 = arith.constant 0.000000e+00 : f32
    %560 = vector.broadcast %cst_204 : f32 to vector<16x16xf32>
    %561 = arith.select %28, %559, %560 : vector<16x16xi1>, vector<16x16xf32>
    %562 = arith.addf %556, %561 : vector<16x16xf32>
    %563 = vector.extract_strided_slice %544 {offsets = [0, 1], sizes = [16, 15], strides = [1, 1]} : vector<16x16xf32> to vector<16x15xf32>
    %564 = vector.extract_strided_slice %544 {offsets = [0, 0], sizes = [16, 1], strides = [1, 1]} : vector<16x16xf32> to vector<16x1xf32>
    %565 = tpu.concatenate %563, %564 in 1 : vector<16x15xf32>, vector<16x1xf32> -> vector<16x16xf32>
    %cst_205 = arith.constant 0.000000e+00 : f32
    %566 = vector.broadcast %cst_205 : f32 to vector<16x16xf32>
    %567 = arith.select %37, %565, %566 : vector<16x16xi1>, vector<16x16xf32>
    %568 = arith.addf %562, %567 : vector<16x16xf32>
    %569 = vector.extract_strided_slice %544 {offsets = [0, 2], sizes = [16, 14], strides = [1, 1]} : vector<16x16xf32> to vector<16x14xf32>
    %570 = vector.extract_strided_slice %544 {offsets = [0, 0], sizes = [16, 2], strides = [1, 1]} : vector<16x16xf32> to vector<16x2xf32>
    %571 = tpu.concatenate %569, %570 in 1 : vector<16x14xf32>, vector<16x2xf32> -> vector<16x16xf32>
    %cst_206 = arith.constant 0.000000e+00 : f32
    %572 = vector.broadcast %cst_206 : f32 to vector<16x16xf32>
    %573 = arith.select %46, %571, %572 : vector<16x16xi1>, vector<16x16xf32>
    %574 = arith.addf %568, %573 : vector<16x16xf32>
    %575 = vector.extract_strided_slice %544 {offsets = [0, 3], sizes = [16, 13], strides = [1, 1]} : vector<16x16xf32> to vector<16x13xf32>
    %576 = vector.extract_strided_slice %544 {offsets = [0, 0], sizes = [16, 3], strides = [1, 1]} : vector<16x16xf32> to vector<16x3xf32>
    %577 = tpu.concatenate %575, %576 in 1 : vector<16x13xf32>, vector<16x3xf32> -> vector<16x16xf32>
    %cst_207 = arith.constant 0.000000e+00 : f32
    %578 = vector.broadcast %cst_207 : f32 to vector<16x16xf32>
    %579 = arith.select %55, %577, %578 : vector<16x16xi1>, vector<16x16xf32>
    %580 = arith.addf %574, %579 : vector<16x16xf32>
    %581 = vector.extract_strided_slice %580 {offsets = [13, 0], sizes = [3, 16], strides = [1, 1]} : vector<16x16xf32> to vector<3x16xf32>
    %582 = vector.extract_strided_slice %580 {offsets = [0, 0], sizes = [13, 16], strides = [1, 1]} : vector<16x16xf32> to vector<13x16xf32>
    %583 = tpu.concatenate %581, %582 in 0 : vector<3x16xf32>, vector<13x16xf32> -> vector<16x16xf32>
    %cst_208 = arith.constant 0.000000e+00 : f32
    %584 = vector.broadcast %cst_208 : f32 to vector<16x16xf32>
    %585 = arith.select %64, %583, %584 : vector<16x16xi1>, vector<16x16xf32>
    %586 = arith.addf %580, %585 : vector<16x16xf32>
    %587 = vector.extract_strided_slice %580 {offsets = [14, 0], sizes = [2, 16], strides = [1, 1]} : vector<16x16xf32> to vector<2x16xf32>
    %588 = vector.extract_strided_slice %580 {offsets = [0, 0], sizes = [14, 16], strides = [1, 1]} : vector<16x16xf32> to vector<14x16xf32>
    %589 = tpu.concatenate %587, %588 in 0 : vector<2x16xf32>, vector<14x16xf32> -> vector<16x16xf32>
    %cst_209 = arith.constant 0.000000e+00 : f32
    %590 = vector.broadcast %cst_209 : f32 to vector<16x16xf32>
    %591 = arith.select %73, %589, %590 : vector<16x16xi1>, vector<16x16xf32>
    %592 = arith.addf %586, %591 : vector<16x16xf32>
    %593 = vector.extract_strided_slice %580 {offsets = [15, 0], sizes = [1, 16], strides = [1, 1]} : vector<16x16xf32> to vector<1x16xf32>
    %594 = vector.extract_strided_slice %580 {offsets = [0, 0], sizes = [15, 16], strides = [1, 1]} : vector<16x16xf32> to vector<15x16xf32>
    %595 = tpu.concatenate %593, %594 in 0 : vector<1x16xf32>, vector<15x16xf32> -> vector<16x16xf32>
    %cst_210 = arith.constant 0.000000e+00 : f32
    %596 = vector.broadcast %cst_210 : f32 to vector<16x16xf32>
    %597 = arith.select %82, %595, %596 : vector<16x16xi1>, vector<16x16xf32>
    %598 = arith.addf %592, %597 : vector<16x16xf32>
    %599 = vector.extract_strided_slice %580 {offsets = [1, 0], sizes = [15, 16], strides = [1, 1]} : vector<16x16xf32> to vector<15x16xf32>
    %600 = vector.extract_strided_slice %580 {offsets = [0, 0], sizes = [1, 16], strides = [1, 1]} : vector<16x16xf32> to vector<1x16xf32>
    %601 = tpu.concatenate %599, %600 in 0 : vector<15x16xf32>, vector<1x16xf32> -> vector<16x16xf32>
    %cst_211 = arith.constant 0.000000e+00 : f32
    %602 = vector.broadcast %cst_211 : f32 to vector<16x16xf32>
    %603 = arith.select %91, %601, %602 : vector<16x16xi1>, vector<16x16xf32>
    %604 = arith.addf %598, %603 : vector<16x16xf32>
    %605 = vector.extract_strided_slice %580 {offsets = [2, 0], sizes = [14, 16], strides = [1, 1]} : vector<16x16xf32> to vector<14x16xf32>
    %606 = vector.extract_strided_slice %580 {offsets = [0, 0], sizes = [2, 16], strides = [1, 1]} : vector<16x16xf32> to vector<2x16xf32>
    %607 = tpu.concatenate %605, %606 in 0 : vector<14x16xf32>, vector<2x16xf32> -> vector<16x16xf32>
    %cst_212 = arith.constant 0.000000e+00 : f32
    %608 = vector.broadcast %cst_212 : f32 to vector<16x16xf32>
    %609 = arith.select %100, %607, %608 : vector<16x16xi1>, vector<16x16xf32>
    %610 = arith.addf %604, %609 : vector<16x16xf32>
    %611 = vector.extract_strided_slice %580 {offsets = [3, 0], sizes = [13, 16], strides = [1, 1]} : vector<16x16xf32> to vector<13x16xf32>
    %612 = vector.extract_strided_slice %580 {offsets = [0, 0], sizes = [3, 16], strides = [1, 1]} : vector<16x16xf32> to vector<3x16xf32>
    %613 = tpu.concatenate %611, %612 in 0 : vector<13x16xf32>, vector<3x16xf32> -> vector<16x16xf32>
    %cst_213 = arith.constant 0.000000e+00 : f32
    %614 = vector.broadcast %cst_213 : f32 to vector<16x16xf32>
    %615 = arith.select %109, %613, %614 : vector<16x16xi1>, vector<16x16xf32>
    %616 = arith.addf %610, %615 : vector<16x16xf32>
    %cst_214 = arith.constant 0.0204081628 : f32
    %617 = vector.broadcast %cst_214 : f32 to vector<16x16xf32>
    %618 = arith.mulf %616, %617 : vector<16x16xf32>
    %c1_215 = arith.constant 1 : index
    %c1_216 = arith.constant 1 : index
    %c0_217 = arith.constant 0 : index
    %c0_218 = arith.constant 0 : index
    %619 = vector.load %arg3[%c1_215, %c1_216, %c0_217, %c0_218] : memref<2x3x16x16xf32, #tpu.memory_space<vmem>>, vector<1x1x16x16xf32>
    %620 = vector.shape_cast %619 : vector<1x1x16x16xf32> to vector<16x16xf32>
    %621 = arith.subf %620, %618 : vector<16x16xf32>
    %622 = arith.mulf %621, %621 : vector<16x16xf32>
    %623 = arith.addf %543, %622 : vector<16x16xf32>
    %624 = arith.mulf %440, %464 : vector<16x16xf32>
    %625 = vector.extract_strided_slice %624 {offsets = [0, 13], sizes = [16, 3], strides = [1, 1]} : vector<16x16xf32> to vector<16x3xf32>
    %626 = vector.extract_strided_slice %624 {offsets = [0, 0], sizes = [16, 13], strides = [1, 1]} : vector<16x16xf32> to vector<16x13xf32>
    %627 = tpu.concatenate %625, %626 in 1 : vector<16x3xf32>, vector<16x13xf32> -> vector<16x16xf32>
    %cst_219 = arith.constant 0.000000e+00 : f32
    %628 = vector.broadcast %cst_219 : f32 to vector<16x16xf32>
    %629 = arith.select %10, %627, %628 : vector<16x16xi1>, vector<16x16xf32>
    %630 = arith.addf %624, %629 : vector<16x16xf32>
    %631 = vector.extract_strided_slice %624 {offsets = [0, 14], sizes = [16, 2], strides = [1, 1]} : vector<16x16xf32> to vector<16x2xf32>
    %632 = vector.extract_strided_slice %624 {offsets = [0, 0], sizes = [16, 14], strides = [1, 1]} : vector<16x16xf32> to vector<16x14xf32>
    %633 = tpu.concatenate %631, %632 in 1 : vector<16x2xf32>, vector<16x14xf32> -> vector<16x16xf32>
    %cst_220 = arith.constant 0.000000e+00 : f32
    %634 = vector.broadcast %cst_220 : f32 to vector<16x16xf32>
    %635 = arith.select %19, %633, %634 : vector<16x16xi1>, vector<16x16xf32>
    %636 = arith.addf %630, %635 : vector<16x16xf32>
    %637 = vector.extract_strided_slice %624 {offsets = [0, 15], sizes = [16, 1], strides = [1, 1]} : vector<16x16xf32> to vector<16x1xf32>
    %638 = vector.extract_strided_slice %624 {offsets = [0, 0], sizes = [16, 15], strides = [1, 1]} : vector<16x16xf32> to vector<16x15xf32>
    %639 = tpu.concatenate %637, %638 in 1 : vector<16x1xf32>, vector<16x15xf32> -> vector<16x16xf32>
    %cst_221 = arith.constant 0.000000e+00 : f32
    %640 = vector.broadcast %cst_221 : f32 to vector<16x16xf32>
    %641 = arith.select %28, %639, %640 : vector<16x16xi1>, vector<16x16xf32>
    %642 = arith.addf %636, %641 : vector<16x16xf32>
    %643 = vector.extract_strided_slice %624 {offsets = [0, 1], sizes = [16, 15], strides = [1, 1]} : vector<16x16xf32> to vector<16x15xf32>
    %644 = vector.extract_strided_slice %624 {offsets = [0, 0], sizes = [16, 1], strides = [1, 1]} : vector<16x16xf32> to vector<16x1xf32>
    %645 = tpu.concatenate %643, %644 in 1 : vector<16x15xf32>, vector<16x1xf32> -> vector<16x16xf32>
    %cst_222 = arith.constant 0.000000e+00 : f32
    %646 = vector.broadcast %cst_222 : f32 to vector<16x16xf32>
    %647 = arith.select %37, %645, %646 : vector<16x16xi1>, vector<16x16xf32>
    %648 = arith.addf %642, %647 : vector<16x16xf32>
    %649 = vector.extract_strided_slice %624 {offsets = [0, 2], sizes = [16, 14], strides = [1, 1]} : vector<16x16xf32> to vector<16x14xf32>
    %650 = vector.extract_strided_slice %624 {offsets = [0, 0], sizes = [16, 2], strides = [1, 1]} : vector<16x16xf32> to vector<16x2xf32>
    %651 = tpu.concatenate %649, %650 in 1 : vector<16x14xf32>, vector<16x2xf32> -> vector<16x16xf32>
    %cst_223 = arith.constant 0.000000e+00 : f32
    %652 = vector.broadcast %cst_223 : f32 to vector<16x16xf32>
    %653 = arith.select %46, %651, %652 : vector<16x16xi1>, vector<16x16xf32>
    %654 = arith.addf %648, %653 : vector<16x16xf32>
    %655 = vector.extract_strided_slice %624 {offsets = [0, 3], sizes = [16, 13], strides = [1, 1]} : vector<16x16xf32> to vector<16x13xf32>
    %656 = vector.extract_strided_slice %624 {offsets = [0, 0], sizes = [16, 3], strides = [1, 1]} : vector<16x16xf32> to vector<16x3xf32>
    %657 = tpu.concatenate %655, %656 in 1 : vector<16x13xf32>, vector<16x3xf32> -> vector<16x16xf32>
    %cst_224 = arith.constant 0.000000e+00 : f32
    %658 = vector.broadcast %cst_224 : f32 to vector<16x16xf32>
    %659 = arith.select %55, %657, %658 : vector<16x16xi1>, vector<16x16xf32>
    %660 = arith.addf %654, %659 : vector<16x16xf32>
    %661 = vector.extract_strided_slice %660 {offsets = [13, 0], sizes = [3, 16], strides = [1, 1]} : vector<16x16xf32> to vector<3x16xf32>
    %662 = vector.extract_strided_slice %660 {offsets = [0, 0], sizes = [13, 16], strides = [1, 1]} : vector<16x16xf32> to vector<13x16xf32>
    %663 = tpu.concatenate %661, %662 in 0 : vector<3x16xf32>, vector<13x16xf32> -> vector<16x16xf32>
    %cst_225 = arith.constant 0.000000e+00 : f32
    %664 = vector.broadcast %cst_225 : f32 to vector<16x16xf32>
    %665 = arith.select %64, %663, %664 : vector<16x16xi1>, vector<16x16xf32>
    %666 = arith.addf %660, %665 : vector<16x16xf32>
    %667 = vector.extract_strided_slice %660 {offsets = [14, 0], sizes = [2, 16], strides = [1, 1]} : vector<16x16xf32> to vector<2x16xf32>
    %668 = vector.extract_strided_slice %660 {offsets = [0, 0], sizes = [14, 16], strides = [1, 1]} : vector<16x16xf32> to vector<14x16xf32>
    %669 = tpu.concatenate %667, %668 in 0 : vector<2x16xf32>, vector<14x16xf32> -> vector<16x16xf32>
    %cst_226 = arith.constant 0.000000e+00 : f32
    %670 = vector.broadcast %cst_226 : f32 to vector<16x16xf32>
    %671 = arith.select %73, %669, %670 : vector<16x16xi1>, vector<16x16xf32>
    %672 = arith.addf %666, %671 : vector<16x16xf32>
    %673 = vector.extract_strided_slice %660 {offsets = [15, 0], sizes = [1, 16], strides = [1, 1]} : vector<16x16xf32> to vector<1x16xf32>
    %674 = vector.extract_strided_slice %660 {offsets = [0, 0], sizes = [15, 16], strides = [1, 1]} : vector<16x16xf32> to vector<15x16xf32>
    %675 = tpu.concatenate %673, %674 in 0 : vector<1x16xf32>, vector<15x16xf32> -> vector<16x16xf32>
    %cst_227 = arith.constant 0.000000e+00 : f32
    %676 = vector.broadcast %cst_227 : f32 to vector<16x16xf32>
    %677 = arith.select %82, %675, %676 : vector<16x16xi1>, vector<16x16xf32>
    %678 = arith.addf %672, %677 : vector<16x16xf32>
    %679 = vector.extract_strided_slice %660 {offsets = [1, 0], sizes = [15, 16], strides = [1, 1]} : vector<16x16xf32> to vector<15x16xf32>
    %680 = vector.extract_strided_slice %660 {offsets = [0, 0], sizes = [1, 16], strides = [1, 1]} : vector<16x16xf32> to vector<1x16xf32>
    %681 = tpu.concatenate %679, %680 in 0 : vector<15x16xf32>, vector<1x16xf32> -> vector<16x16xf32>
    %cst_228 = arith.constant 0.000000e+00 : f32
    %682 = vector.broadcast %cst_228 : f32 to vector<16x16xf32>
    %683 = arith.select %91, %681, %682 : vector<16x16xi1>, vector<16x16xf32>
    %684 = arith.addf %678, %683 : vector<16x16xf32>
    %685 = vector.extract_strided_slice %660 {offsets = [2, 0], sizes = [14, 16], strides = [1, 1]} : vector<16x16xf32> to vector<14x16xf32>
    %686 = vector.extract_strided_slice %660 {offsets = [0, 0], sizes = [2, 16], strides = [1, 1]} : vector<16x16xf32> to vector<2x16xf32>
    %687 = tpu.concatenate %685, %686 in 0 : vector<14x16xf32>, vector<2x16xf32> -> vector<16x16xf32>
    %cst_229 = arith.constant 0.000000e+00 : f32
    %688 = vector.broadcast %cst_229 : f32 to vector<16x16xf32>
    %689 = arith.select %100, %687, %688 : vector<16x16xi1>, vector<16x16xf32>
    %690 = arith.addf %684, %689 : vector<16x16xf32>
    %691 = vector.extract_strided_slice %660 {offsets = [3, 0], sizes = [13, 16], strides = [1, 1]} : vector<16x16xf32> to vector<13x16xf32>
    %692 = vector.extract_strided_slice %660 {offsets = [0, 0], sizes = [3, 16], strides = [1, 1]} : vector<16x16xf32> to vector<3x16xf32>
    %693 = tpu.concatenate %691, %692 in 0 : vector<13x16xf32>, vector<3x16xf32> -> vector<16x16xf32>
    %cst_230 = arith.constant 0.000000e+00 : f32
    %694 = vector.broadcast %cst_230 : f32 to vector<16x16xf32>
    %695 = arith.select %109, %693, %694 : vector<16x16xi1>, vector<16x16xf32>
    %696 = arith.addf %690, %695 : vector<16x16xf32>
    %cst_231 = arith.constant 0.0204081628 : f32
    %697 = vector.broadcast %cst_231 : f32 to vector<16x16xf32>
    %698 = arith.mulf %696, %697 : vector<16x16xf32>
    %c1_232 = arith.constant 1 : index
    %c2_233 = arith.constant 2 : index
    %c0_234 = arith.constant 0 : index
    %c0_235 = arith.constant 0 : index
    %699 = vector.load %arg3[%c1_232, %c2_233, %c0_234, %c0_235] : memref<2x3x16x16xf32, #tpu.memory_space<vmem>>, vector<1x1x16x16xf32>
    %700 = vector.shape_cast %699 : vector<1x1x16x16xf32> to vector<16x16xf32>
    %701 = arith.subf %700, %698 : vector<16x16xf32>
    %702 = arith.mulf %701, %701 : vector<16x16xf32>
    %703 = arith.addf %623, %702 : vector<16x16xf32>
    %704 = vector.shape_cast %703 : vector<16x16xf32> to vector<1x16x16xf32>
    %cst_236 = arith.constant dense<0.000000e+00> : vector<1xf32>
    %705 = vector.multi_reduction <add>, %704, %cst_236 [1, 2] : vector<1x16x16xf32> to vector<1xf32>
    %706 = vector.shape_cast %705 : vector<1xf32> to vector<1x1x1xf32>
    %707 = vector.extract %706[0, 0, 0] : f32 from vector<1x1x1xf32>
    %708 = vector.broadcast %707 : f32 to vector<8x128xf32>
    %c1_237 = arith.constant 1 : index
    %c0_238 = arith.constant 0 : index
    %c0_239 = arith.constant 0 : index
    %709 = vector.load %arg4[%c1_237, %c0_238, %c0_239] : memref<2x8x128xf32, #tpu.memory_space<vmem>>, vector<1x8x128xf32>
    %710 = vector.shape_cast %709 : vector<1x8x128xf32> to vector<8x128xf32>
    %711 = vector.shape_cast %708 : vector<8x128xf32> to vector<1x8x128xf32>
    tpu.vector_store %arg4[%c1_237, %c0_238, %c0_239], %711 {strides = array<i32>} : memref<2x8x128xf32, #tpu.memory_space<vmem>>, vector<1x8x128xf32>,
    return
  }
  func.func @transform_0(%arg0: i32) -> (i32, i32, i32, i32) {
    %c0_i32 = arith.constant 0 : i32
    %c0_i32_0 = arith.constant 0 : i32
    %c0_i32_1 = arith.constant 0 : i32
    %c0_i32_2 = arith.constant 0 : i32
    return %arg0, %c0_i32, %c0_i32_0, %c0_i32_1 : i32, i32, i32, i32
  }
  func.func @transform_1(%arg0: i32) -> (i32, i32, i32, i32) {
    %c0_i32 = arith.constant 0 : i32
    %c0_i32_0 = arith.constant 0 : i32
    %c0_i32_1 = arith.constant 0 : i32
    %c0_i32_2 = arith.constant 0 : i32
    return %arg0, %c0_i32, %c0_i32_0, %c0_i32_1 : i32, i32, i32, i32
  }
  func.func @transform_2(%arg0: i32) -> (i32, i32, i32, i32) {
    %c0_i32 = arith.constant 0 : i32
    %c0_i32_0 = arith.constant 0 : i32
    %c0_i32_1 = arith.constant 0 : i32
    %c0_i32_2 = arith.constant 0 : i32
    return %arg0, %c0_i32, %c0_i32_0, %c0_i32_1 : i32, i32, i32, i32
  }
  func.func @transform_3(%arg0: i32) -> (i32, i32, i32) {
    %c0_i32 = arith.constant 0 : i32
    %c0_i32_0 = arith.constant 0 : i32
    %c0_i32_1 = arith.constant 0 : i32
    return %arg0, %c0_i32, %c0_i32_0 : i32, i32, i32
  }
}

</mosaic_0001>

<bundles_post_ra>
// kernel: tpu_custom_call.1
= control target key start
LH: loop header
LB: loop body
LE: loop exit
PB: predicated region body
PF: predicated region fallthrough
CT: control target
= control target key end

     0   :  { %9 = vsyncpa [#allocation3], 0  ;;  %s2865_s0 = inlined_call_operand.hbm [shape: f32[2,3,16,16], index: 0, kind: input, shape index: {}]   ;;  %s2866_s1 = inlined_call_operand.hbm [shape: f32[2,3,16,16], index: 1, kind: input, shape index: {}]   ;;  %s2867_s2 = inlined_call_operand.hbm [shape: f32[2,3,16,16], index: 2, kind: output, shape index: {0}]   ;;  %s2868_s3 = inlined_call_operand.hbm [shape: f32[2,8,128], index: 3, kind: output, shape index: {1}]  }
   0x1   :  { %10 = vsyncpa [#allocation6], 0 }
   0x2   :  { %11 = vsyncpa [#allocation4], 0 }
   0x3   :  { %12 = vsyncpa [#allocation9], 0  ;;  %s1601_s12 = smov [#allocation2]   ;;  %s1505_s16 = scalar_lea.hbm %s2865_s0, 1536 }
   0x4   :  { %s18_s13 = sshll.u32 %s1601_s12, 4  ;;  %p1506_p0 = scmp.ne.s32.totalorder %s2865_s0, %s1505_s16  ;;  %s19_s13 = int_to_ptr.vmem [resolvable:$true] %s18_s13 }
   0x5   :  { %p1509_p1 = scmp.lt.u32.totalorder %s1505_s16, %s2865_s0 }
   0x7   :  { %p1511_p2 = pnand %p1509_p1, %p1506_p0 }
   0x9   :  { %1514 = shalt.err (!%p1511_p2)
}
   0xa   :  { %s1515_s21 = scalar_lea.vmem %s19_s13, 1536  ;;  %p1520_p4 = scmp.lt.s32.totalorder %s19_s13, %s19_s13 }
   0xb   :  { %p1516_p3 = scmp.ne.s32.totalorder %s19_s13, %s1515_s21  ;;  %p1521_p5 = scmp.lt.s32.totalorder %s1515_s21, %s1515_s21 }
   0xd   :  { %p1522_p6 = por %p1521_p5, %p1520_p4 }
   0xf   :  { %p1523_p7 = pnand %p1522_p6, %p1516_p3 }
  0x11   :  { %1526 = shalt.err (!%p1523_p7)
}
  0x12   :  { %s1602_s22 = smov 128   ;;  %s1603_s23 = smov 8  }
  0x13   :  { %24 = dma.hbm_to_vmem [thread:$0]  %s2865_s0, 1536, %s19_s13, [#allocation3], %s1602_s22, %s1602_s22, %s1603_s23  }
  0x14   :  { %s1604_s26 = smov [#allocation5]   ;;  %s1527_s30 = scalar_lea.hbm %s2866_s1, 1536 }
  0x15   :  { %s30_s27 = sshll.u32 %s1604_s26, 4  ;;  %p1528_p8 = scmp.ne.s32.totalorder %s2866_s1, %s1527_s30  ;;  %s31_s27 = int_to_ptr.vmem [resolvable:$true] %s30_s27 }
  0x16   :  { %p1531_p9 = scmp.lt.u32.totalorder %s1527_s30, %s2866_s1 }
  0x18   :  { %p1533_p10 = pnand %p1531_p9, %p1528_p8 }
  0x1a   :  { %1536 = shalt.err (!%p1533_p10)
}
  0x1b   :  { %s1537_s8 = scalar_lea.vmem %s31_s27, 1536  ;;  %p1542_p12 = scmp.lt.s32.totalorder %s31_s27, %s31_s27 }
  0x1c   :  { %p1538_p11 = scmp.ne.s32.totalorder %s31_s27, %s1537_s8  ;;  %p1543_p13 = scmp.lt.s32.totalorder %s1537_s8, %s1537_s8 }
  0x1e   :  { %p1544_p0 = por %p1543_p13, %p1542_p12 }
  0x20   :  { %p1545_p1 = pnand %p1544_p0, %p1538_p11 }
  0x22   :  { %1548 = shalt.err (!%p1545_p1)
}
  0x23   :  { %36 = dma.hbm_to_vmem [thread:$0]  %s2866_s1, 1536, %s31_s27, [#allocation6], %s1602_s22, %s1602_s22, %s1603_s23  }
  0x24   :  { %1593 = dma.done.wait [#allocation3], 1536  }
  0x25   :  { %1594 = vsyncadd [#allocation3], 4294965760 }
  0x26   :  { %1595 = dma.done.wait [#allocation6], 1536  }
  0x27   :  { %1596 = vsyncadd [#allocation6], 4294965760  ;;  %v120_v0 = vld [vmem:[#allocation2] sm:$0xff]  ;;  %v123_v1 = vld [vmem:[#allocation2 + $0x10] sm:$0xff]  ;;  %s1605_s1 = smov 3   ;;  %s1606_s10 = smov 115  }
  0x28   :  { %v126_v2 = vld [vmem:[#allocation2 + $0x20] sm:$0xff]  ;;  %v128_v3 = vmul.f32 0.299, %v120_v0  ;;  %v130_v4 = vmul.f32 0.587, %v123_v1  ;;  %v121_v14 = vld [vmem:[#allocation2 + $0x8] sm:$0xff] }
  0x29   :  { %v134_v5 = vmul.f32 0.114, %v126_v2  ;;  %v138_v6 = vmul.f32 -0.14714119, %v120_v0  ;;  %v140_v7 = vmul.f32 -0.28886917, %v123_v1 }
  0x2a   :  { %v144_v8 = vmul.f32 0.43601036, %v126_v2  ;;  %v132_v9 = vadd.f32 %v130_v4, %v128_v3  ;;  %v148_v10 = vmul.f32 0.6149754, %v120_v0  ;;  %v150_v11 = vmul.f32 -0.5149651, %v123_v1 }
  0x2b   :  { %v154_v12 = vmul.f32 -0.10001026, %v126_v2  ;;  %v142_v13 = vadd.f32 %v140_v7, %v138_v6  ;;  %v124_v15 = vld [vmem:[#allocation2 + $0x18] sm:$0xff]  ;;  %v127_v16 = vld [vmem:[#allocation2 + $0x28] sm:$0xff]  ;;  %v129_v19 = vmul.f32 0.299, %v121_v14 }
  0x2c   :  { %v1669_v17 = vadd.f32 %v134_v5, %v132_v9  ;;  %v152_v18 = vadd.f32 %v150_v11, %v148_v10  ;;  %v131_v20 = vmul.f32 0.587, %v124_v15  ;;  %v135_v22 = vmul.f32 0.114, %v127_v16  ;;  %s1607_s11 = smov 114   ;;  %s1608_s12 = smov 2  }
  0x2d   :  { %v1671_v21 = vadd.f32 %v144_v8, %v142_v13  ;;  %v139_v23 = vmul.f32 -0.14714119, %v121_v14  ;;  %v141_v24 = vmul.f32 -0.28886917, %v124_v15  ;;  %v145_v27 = vmul.f32 0.43601036, %v127_v16 }
  0x2e   :  { %v1673_v25 = vadd.f32 %v154_v12, %v152_v18  ;;  %v133_v26 = vadd.f32 %v131_v20, %v129_v19  ;;  %v149_v28 = vmul.f32 0.6149754, %v121_v14  ;;  %v151_v31 = vmul.f32 -0.5149651, %v124_v15  ;;  %s1609_s13 = smov 113   ;;  %s1610_s14 = smov 1  }
  0x2f   :  { %v181_v29 = vadd.f32 %v1671_v21, %v1669_v17  ;;  %v143_v30 = vadd.f32 %v141_v24, %v139_v23  ;;  %v155_v32 = vmul.f32 -0.10001026, %v127_v16  ;;  %s1611_s15 = smov 127   ;;  %s1612_s16 = smov 15   ;;  %v159_v46 = vld [vmem:[#allocation5 + $0x8] sm:$0xff]  ;;  %v158_v47 = vld [vmem:[#allocation5] sm:$0xff] }
  0x30   :  { %v137_v33 = vadd.f32 %v135_v22, %v133_v26  ;;  %v153_v36 = vadd.f32 %v151_v31, %v149_v28  ;;  %s1613_s17 = smov 126   ;;  %s1614_s18 = smov 14   ;;  %v160_v49 = vadd.f32 %v158_v47, %v1669_v17  ;;  %vm2870_vm0 = vcmask 130048   ;;  %v787_v52 = vld [vmem:[#allocation2 + $0x38] sm:$0xff]  ;;  %v790_v53 = vld [vmem:[#allocation2 + $0x48] sm:$0xff]  ;;  %v786_v54 = vld [vmem:[#allocation2 + $0x30] sm:$0xff] }
  0x31   :  { %v183_v34 = vadd.f32 %v181_v29, %v1673_v25  ;;  %v1678_v35 = vadd.f32 %v145_v27, %v143_v30  ;;  %s1615_s19 = smov 125   ;;  %s1616_s20 = smov 13   ;;  %v789_v55 = vld [vmem:[#allocation2 + $0x40] sm:$0xff]  ;;  %v793_v56 = vld [vmem:[#allocation2 + $0x58] sm:$0xff]  ;;  %v795_v57 = vmul.f32 0.299, %v787_v52 }
  0x32   :  { %v1680_v38 = vadd.f32 %v155_v32, %v153_v36  ;;  %v161_v48 = vadd.f32 %v159_v46, %v137_v33  ;;  %163 = vst.msk [vmem:[#allocation7] sm:$0xff] %vm2870_vm0, %v160_v49  ;;  %v797_v58 = vmul.f32 0.587, %v790_v53  ;;  %v805_v59 = vmul.f32 -0.14714119, %v787_v52  ;;  %v792_v63 = vld [vmem:[#allocation2 + $0x50] sm:$0xff] }
  0x33   :  { %v185_v37 = vadd.f32 0.0001, %v183_v34  ;;  %v182_v39 = vadd.f32 %v1678_v35, %v137_v33  ;;  %v807_v60 = vmul.f32 -0.28886917, %v790_v53  ;;  %v794_v61 = vmul.f32 0.299, %v786_v54 }
  0x34   :  { %164 = vst.msk [vmem:[#allocation7 + $0x8] sm:$0xff] %vm2870_vm0, %v161_v48  ;;  %v796_v62 = vmul.f32 0.587, %v789_v55  ;;  %v804_v0 = vmul.f32 -0.14714119, %v786_v54  ;;  %v799_v2 = vadd.f32 %v797_v58, %v795_v57  ;;  %vm207_vm1 = vcmask 23552  }
  0x35   :  { %1497 = vrcp.f32 %v185_v37  ;;  %v184_v40 = vadd.f32 %v182_v39, %v1680_v38  ;;  %v806_v1 = vmul.f32 -0.28886917, %v789_v55  ;;  %v801_v3 = vmul.f32 0.114, %v793_v56  ;;  %s1617_s21 = smov [#allocation7]  }
  0x36   :  { %v811_v4 = vmul.f32 0.43601036, %v793_v56  ;;  %v815_v5 = vmul.f32 0.6149754, %v787_v52  ;;  %v809_v6 = vadd.f32 %v807_v60, %v805_v59  ;;  %v817_v7 = vmul.f32 -0.5149651, %v790_v53 }
  0x37   :  { %v186_v41 = vadd.f32 0.0001, %v184_v40  ;;  %v798_v8 = vadd.f32 %v796_v62, %v794_v61  ;;  %v800_v9 = vmul.f32 0.114, %v792_v63  ;;  %v808_v10 = vadd.f32 %v806_v1, %v804_v0  ;;  %s1446_s24 = sshll.u32 %s1617_s21, 4  ;;  %s1447_s24 = int_to_ptr.vmem [resolvable:$true] %s1446_s24 }
  0x38   :  { %v810_v11 = vmul.f32 0.43601036, %v792_v63  ;;  %v814_v12 = vmul.f32 0.6149754, %v786_v54  ;;  %v816_v13 = vmul.f32 -0.5149651, %v789_v55  ;;  %v1766_v14 = vadd.f32 %v801_v3, %v799_v2  ;;  %p1554_p3 = scmp.lt.s32.totalorder %s1447_s24, %s1447_s24 }
  0x39   :  { %1499 = vrcp.f32 %v186_v41  ;;  %v1768_v15 = vadd.f32 %v811_v4, %v809_v6  ;;  %v819_v16 = vadd.f32 %v817_v7, %v815_v5  ;;  %v1770_v18 = vadd.f32 %v800_v9, %v798_v8  ;;  %s1549_s25 = scalar_lea.vmem %s1447_s24, 1536 }
  0x3a   :  { %v1772_v19 = vadd.f32 %v810_v11, %v808_v10  ;;  %v818_v20 = vadd.f32 %v816_v13, %v814_v12  ;;  %v820_v22 = vmul.f32 -0.10001026, %v792_v63  ;;  %vm226_vm7 = vcmask 15360   ;;  %p1550_p2 = scmp.ne.s32.totalorder %s1447_s24, %s1549_s25  ;;  %p1555_p4 = scmp.lt.s32.totalorder %s1549_s25, %s1549_s25 }
  0x3b   :  { %v849_v24 = vadd.f32 %v1768_v15, %v1766_v14  ;;  %vm245_vm11 = vcmask 7168   ;;  %vm264_vm13 = vcmask 121856   ;;  %vm283_vm15 = vcmask 113664  }
  0x3c   :  { %v1782_v26 = vadd.f32 %v820_v22, %v818_v20  ;;  %v848_v27 = vadd.f32 %v1772_v19, %v1770_v18  ;;  %p1556_p5 = por %p1555_p4, %p1554_p3 }
  0x3e   :  { %v850_v29 = vadd.f32 %v848_v27, %v1782_v26  ;;  %p1557_p6 = pnand %p1556_p5, %p1550_p2 }
  0x3f   :  { %v1684_v42 = vpop.eup %1497 }
  0x40   :  { %v1688_v43 = vmul.f32 %v1684_v42, %v1669_v17  ;;  %v1750_v51 = vmul.f32 %v1684_v42, %v1671_v21  ;;  %v821_v17 = vmul.f32 -0.10001026, %v793_v56  ;;  %v852_v31 = vadd.f32 0.0001, %v850_v29 }
  0x41   :  { %v1850_v41 = vmul.f32 %v1684_v42, %v1673_v25 }
  0x42   :  { %201 = vrot.lane.b32.xlu1 %v1688_v43, %s1605_s1  ;;  %195 = vrot.lane.b32.xlu0 %v1688_v43, %s1606_s10  ;;  %v1778_v23 = vadd.f32 %v821_v17, %v819_v16 }
  0x43   :  { %v1694_v44 = vpop.eup %1499 }
  0x44   :  { %v1697_v45 = vmul.f32 %v1694_v44, %v137_v33  ;;  %v1746_v50 = vmul.f32 %v1694_v44, %v1678_v35  ;;  %v851_v28 = vadd.f32 %v849_v24, %v1778_v23  ;;  %v1846_v40 = vmul.f32 %v1694_v44, %v1680_v38 }
  0x46   :  { %203 = vrot.lane.b32.xlu1 %v1697_v45, %s1605_s1  ;;  %197 = vrot.lane.b32.xlu0 %v1697_v45, %s1606_s10  ;;  %v853_v30 = vadd.f32 0.0001, %v851_v28 }
  0x48   :  { %1501 = vrcp.f32 %v853_v30 }
  0x49   :  { %1503 = vrcp.f32 %v852_v31 }
  0x4a   :  { %216 = vrot.lane.b32.xlu1 %v1697_v45, %s1607_s11  ;;  %214 = vrot.lane.b32.xlu0 %v1688_v43, %s1607_s11 }
  0x4e   :  { %222 = vrot.lane.b32.xlu1 %v1697_v45, %s1608_s12  ;;  %220 = vrot.lane.b32.xlu0 %v1688_v43, %s1608_s12 }
  0x52   :  { %235 = vrot.lane.b32.xlu1 %v1697_v45, %s1609_s13  ;;  %233 = vrot.lane.b32.xlu0 %v1688_v43, %s1609_s13  ;;  %v1502_v32 = vpop.eup %1501 }
  0x53   :  { %v1504_v33 = vpop.eup %1503  ;;  %v1817_v34 = vmul.f32 %v1502_v32, %v1766_v14  ;;  %v1831_v37 = vmul.f32 %v1502_v32, %v1768_v15  ;;  %v1893_v54 = vmul.f32 %v1502_v32, %v1778_v23 }
  0x54   :  { %v1820_v36 = vmul.f32 %v1504_v33, %v1770_v18  ;;  %v1834_v39 = vmul.f32 %v1504_v33, %v1772_v19  ;;  %v1896_v55 = vmul.f32 %v1504_v33, %v1782_v26 }
  0x56   :  { %241 = vrot.lane.b32.xlu1 %v1697_v45, %s1610_s14  ;;  %239 = vrot.lane.b32.xlu0 %v1688_v43, %s1610_s14 }
  0x5a   :  { %254 = vrot.lane.b32.xlu1 %v1697_v45, %s1611_s15  ;;  %252 = vrot.lane.b32.xlu0 %v1688_v43, %s1611_s15 }
  0x5e   :  { %260 = vrot.lane.b32.xlu1 %v1697_v45, %s1612_s16  ;;  %258 = vrot.lane.b32.xlu0 %v1688_v43, %s1612_s16 }
  0x62   :  { %273 = vrot.lane.b32.xlu1 %v1697_v45, %s1613_s17  ;;  %271 = vrot.lane.b32.xlu0 %v1688_v43, %s1613_s17 }
  0x66   :  { %279 = vrot.lane.b32.xlu1 %v1697_v45, %s1614_s18  ;;  %277 = vrot.lane.b32.xlu0 %v1688_v43, %s1614_s18 }
  0x6a   :  { %292 = vrot.lane.b32.xlu1 %v1697_v45, %s1615_s19  ;;  %290 = vrot.lane.b32.xlu0 %v1688_v43, %s1615_s19 }
  0x6e   :  { %298 = vrot.lane.b32.xlu1 %v1697_v45, %s1616_s20  ;;  %296 = vrot.lane.b32.xlu0 %v1688_v43, %s1616_s20 }
  0x72   :  { %397 = vrot.lane.b32.xlu1 %v1746_v50, %s1606_s10  ;;  %395 = vrot.lane.b32.xlu0 %v1750_v51, %s1606_s10 }
  0x76   :  { %403 = vrot.lane.b32.xlu1 %v1746_v50, %s1605_s1  ;;  %401 = vrot.lane.b32.xlu0 %v1750_v51, %s1605_s1 }
  0x7a   :  { %415 = vrot.lane.b32.xlu1 %v1746_v50, %s1607_s11  ;;  %413 = vrot.lane.b32.xlu0 %v1750_v51, %s1607_s11 }
  0x7e   :  { %421 = vrot.lane.b32.xlu1 %v1746_v50, %s1608_s12  ;;  %419 = vrot.lane.b32.xlu0 %v1750_v51, %s1608_s12 }
  0x82   :  { %433 = vrot.lane.b32.xlu1 %v1746_v50, %s1609_s13  ;;  %431 = vrot.lane.b32.xlu0 %v1750_v51, %s1609_s13 }
  0x86   :  { %439 = vrot.lane.b32.xlu1 %v1746_v50, %s1610_s14  ;;  %437 = vrot.lane.b32.xlu0 %v1750_v51, %s1610_s14 }
  0x8a   :  { %451 = vrot.lane.b32.xlu1 %v1746_v50, %s1611_s15  ;;  %449 = vrot.lane.b32.xlu0 %v1750_v51, %s1611_s15 }
  0x8e   :  { %457 = vrot.lane.b32.xlu1 %v1746_v50, %s1612_s16  ;;  %455 = vrot.lane.b32.xlu0 %v1750_v51, %s1612_s16 }
  0x92   :  { %469 = vrot.lane.b32.xlu1 %v1746_v50, %s1613_s17  ;;  %467 = vrot.lane.b32.xlu0 %v1750_v51, %s1613_s17 }
  0x96   :  { %475 = vrot.lane.b32.xlu1 %v1746_v50, %s1614_s18  ;;  %473 = vrot.lane.b32.xlu0 %v1750_v51, %s1614_s18 }
  0x9a   :  { %487 = vrot.lane.b32.xlu1 %v1746_v50, %s1615_s19  ;;  %485 = vrot.lane.b32.xlu0 %v1750_v51, %s1615_s19 }
  0x9e   :  { %864 = vrot.lane.b32.xlu1 %v1817_v34, %s1606_s10  ;;  %862 = vrot.lane.b32.xlu0 %v1820_v36, %s1606_s10 }
  0xa2   :  { %870 = vrot.lane.b32.xlu1 %v1817_v34, %s1605_s1  ;;  %868 = vrot.lane.b32.xlu0 %v1820_v36, %s1605_s1 }
  0xa6   :  { %1052 = vrot.lane.b32.xlu1 %v1831_v37, %s1606_s10  ;;  %1050 = vrot.lane.b32.xlu0 %v1834_v39, %s1606_s10 }
  0xaa   :  { %1058 = vrot.lane.b32.xlu1 %v1831_v37, %s1605_s1  ;;  %1056 = vrot.lane.b32.xlu0 %v1834_v39, %s1605_s1 }
  0xae   :  { %587 = vrot.lane.b32.xlu1 %v1846_v40, %s1606_s10  ;;  %585 = vrot.lane.b32.xlu0 %v1850_v41, %s1606_s10 }
  0xb2   :  { %593 = vrot.lane.b32.xlu1 %v1846_v40, %s1605_s1  ;;  %591 = vrot.lane.b32.xlu0 %v1850_v41, %s1605_s1 }
  0xb4   :  { %v1860_v46 = vpop.permute.xlu1 %201  ;;  %v1862_v44 = vpop.permute.xlu0 %195 }
  0xb6   :  { %882 = vrot.lane.b32.xlu1 %v1817_v34, %s1607_s11  ;;  %880 = vrot.lane.b32.xlu0 %v1820_v36, %s1607_s11 }
  0xb8   :  { %v1868_v42 = vpop.permute.xlu1 %203  ;;  %v1870_v47 = vpop.permute.xlu0 %197 }
  0xba   :  { %888 = vrot.lane.b32.xlu1 %v1817_v34, %s1608_s12  ;;  %886 = vrot.lane.b32.xlu0 %v1820_v36, %s1608_s12 }
  0xbc   :  { %v1876_v48 = vpop.permute.xlu1 %216  ;;  %v1878_v49 = vpop.permute.xlu0 %214 }
  0xbe   :  { %1070 = vrot.lane.b32.xlu1 %v1831_v37, %s1607_s11  ;;  %1068 = vrot.lane.b32.xlu0 %v1834_v39, %s1607_s11 }
  0xc0   :  { %v1884_v52 = vpop.permute.xlu1 %222  ;;  %v1886_v53 = vpop.permute.xlu0 %220 }
  0xc2   :  { %1076 = vrot.lane.b32.xlu1 %v1831_v37, %s1608_s12  ;;  %1074 = vrot.lane.b32.xlu0 %v1834_v39, %s1608_s12 }
  0xc4   :  { %v1898_v56 = vpop.permute.xlu1 %235  ;;  %v1900_v57 = vpop.permute.xlu0 %233 }
  0xc6   :  { %1242 = vrot.lane.b32.xlu1 %v1893_v54, %s1606_s10  ;;  %1240 = vrot.lane.b32.xlu0 %v1896_v55, %s1606_s10 }
  0xc8   :  { %v1906_v58 = vpop.permute.xlu1 %241  ;;  %v1908_v59 = vpop.permute.xlu0 %239 }
  0xca   :  { %1248 = vrot.lane.b32.xlu1 %v1893_v54, %s1605_s1  ;;  %1246 = vrot.lane.b32.xlu0 %v1896_v55, %s1605_s1 }
  0xcc   :  { %v1914_v60 = vpop.permute.xlu1 %254  ;;  %v1916_v61 = vpop.permute.xlu0 %252 }
  0xce   :  { %605 = vrot.lane.b32.xlu1 %v1846_v40, %s1607_s11  ;;  %603 = vrot.lane.b32.xlu0 %v1850_v41, %s1607_s11 }
  0xd0   :  { %v1922_v62 = vpop.permute.xlu1 %260  ;;  %v1924_v63 = vpop.permute.xlu0 %258 }
  0xd2   :  { %611 = vrot.lane.b32.xlu1 %v1846_v40, %s1608_s12  ;;  %609 = vrot.lane.b32.xlu0 %v1850_v41, %s1608_s12 }
  0xd4   :  { %v1930_v0 = vpop.permute.xlu1 %273  ;;  %v1932_v1 = vpop.permute.xlu0 %271 }
  0xd6   :  { %900 = vrot.lane.b32.xlu1 %v1817_v34, %s1609_s13  ;;  %898 = vrot.lane.b32.xlu0 %v1820_v36, %s1609_s13 }
  0xd8   :  { %v1938_v2 = vpop.permute.xlu1 %279  ;;  %v1940_v3 = vpop.permute.xlu0 %277 }
  0xda   :  { %906 = vrot.lane.b32.xlu1 %v1817_v34, %s1610_s14  ;;  %904 = vrot.lane.b32.xlu0 %v1820_v36, %s1610_s14 }
  0xdc   :  { %v1946_v4 = vpop.permute.xlu1 %292  ;;  %v1948_v5 = vpop.permute.xlu0 %290 }
  0xdd   :  { %2876 = vst [vmem:[#allocation14_spill] sm:$0xff] %v1946_v4  ;;  %2877 = vst [vmem:[#allocation15_spill] sm:$0xff] %v1948_v5 }
  0xde   :  { %1088 = vrot.lane.b32.xlu1 %v1831_v37, %s1609_s13  ;;  %1086 = vrot.lane.b32.xlu0 %v1834_v39, %s1609_s13 }
  0xe0   :  { %v1954_v6 = vpop.permute.xlu1 %298  ;;  %v1956_v7 = vpop.permute.xlu0 %296 }
  0xe1   :  { %2878 = vst [vmem:[#allocation16_spill] sm:$0xff] %v1954_v6  ;;  %2879 = vst [vmem:[#allocation17_spill] sm:$0xff] %v1956_v7 }
  0xe2   :  { %1094 = vrot.lane.b32.xlu1 %v1831_v37, %s1610_s14  ;;  %1092 = vrot.lane.b32.xlu0 %v1834_v39, %s1610_s14 }
  0xe4   :  { %v1962_v8 = vpop.permute.xlu1 %397  ;;  %v1964_v9 = vpop.permute.xlu0 %395 }
  0xe5   :  { %2880 = vst [vmem:[#allocation18_spill] sm:$0xff] %v1962_v8  ;;  %2881 = vst [vmem:[#allocation19_spill] sm:$0xff] %v1964_v9 }
  0xe6   :  { %1260 = vrot.lane.b32.xlu1 %v1893_v54, %s1607_s11  ;;  %1258 = vrot.lane.b32.xlu0 %v1896_v55, %s1607_s11 }
  0xe8   :  { %v1970_v10 = vpop.permute.xlu1 %403  ;;  %v1972_v11 = vpop.permute.xlu0 %401 }
  0xe9   :  { %2882 = vst [vmem:[#allocation20_spill] sm:$0xff] %v1970_v10  ;;  %2883 = vst [vmem:[#allocation21_spill] sm:$0xff] %v1972_v11  ;;  %v166_v10 = vld [vmem:[#allocation5 + $0x10] sm:$0xff] }
  0xea   :  { %1266 = vrot.lane.b32.xlu1 %v1893_v54, %s1608_s12  ;;  %1264 = vrot.lane.b32.xlu0 %v1896_v55, %s1608_s12  ;;  %v168_v4 = vadd.f32 %v166_v10, %v1671_v21 }
  0xec   :  { %v1978_v12 = vpop.permute.xlu1 %415  ;;  %v1980_v13 = vpop.permute.xlu0 %413  ;;  %171 = vst.msk [vmem:[#allocation7 + $0x10] sm:$0xff] %vm2870_vm0, %v168_v4 }
  0xed   :  { %2884 = vst [vmem:[#allocation22_spill] sm:$0xff] %v1978_v12  ;;  %2885 = vst [vmem:[#allocation23_spill] sm:$0xff] %v1980_v13 }
  0xee   :  { %623 = vrot.lane.b32.xlu1 %v1846_v40, %s1609_s13  ;;  %621 = vrot.lane.b32.xlu0 %v1850_v41, %s1609_s13 }
  0xf0   :  { %v1986_v16 = vpop.permute.xlu1 %421  ;;  %v1988_v17 = vpop.permute.xlu0 %419 }
  0xf1   :  { %2886 = vst [vmem:[#allocation24_spill] sm:$0xff] %v1986_v16  ;;  %2887 = vst [vmem:[#allocation25_spill] sm:$0xff] %v1988_v17 }
  0xf2   :  { %629 = vrot.lane.b32.xlu1 %v1846_v40, %s1610_s14  ;;  %627 = vrot.lane.b32.xlu0 %v1850_v41, %s1610_s14 }
  0xf4   :  { %v1994_v20 = vpop.permute.xlu1 %433  ;;  %v1996_v22 = vpop.permute.xlu0 %431 }
  0xf5   :  { %2888 = vst [vmem:[#allocation26_spill] sm:$0xff] %v1994_v20  ;;  %2889 = vst [vmem:[#allocation27_spill] sm:$0xff] %v1996_v22  ;;  %v2869_v22 = vlaneseq }
  0xf6   :  { %918 = vrot.lane.b32.xlu1 %v1817_v34, %s1611_s15  ;;  %916 = vrot.lane.b32.xlu0 %v1820_v36, %s1611_s15 }
  0xf8   :  { %v2002_v24 = vpop.permute.xlu1 %439  ;;  %v2004_v27 = vpop.permute.xlu0 %437 }
  0xf9   :  { %2890 = vst [vmem:[#allocation28_spill] sm:$0xff] %v2002_v24  ;;  %2891 = vst [vmem:[#allocation29_spill] sm:$0xff] %v2004_v27  ;;  %v2063_v24 = vand.u32 127, %v2869_v22 }
  0xfa   :  { %924 = vrot.lane.b32.xlu1 %v1817_v34, %s1612_s16  ;;  %922 = vrot.lane.b32.xlu0 %v1820_v36, %s1612_s16 }
  0xfb   :  { %v48_v9 = vadd.s32 4294967293, %v2063_v24 }
  0xfc   :  { %v2010_v28 = vpop.permute.xlu1 %451  ;;  %v2012_v29 = vpop.permute.xlu0 %449 }
  0xfd   :  { %2892 = vst [vmem:[#allocation30_spill] sm:$0xff] %v2010_v28  ;;  %2893 = vst [vmem:[#allocation31_spill] sm:$0xff] %v2012_v29  ;;  %vm49_vm2 = vcmp.ge.s32.totalorder %v48_v9, 0  ;;  %vm50_vm3 = vcmp.lt.s32.totalorder %v48_v9, 16 }
  0xfe   :  { %1106 = vrot.lane.b32.xlu1 %v1831_v37, %s1611_s15  ;;  %1104 = vrot.lane.b32.xlu0 %v1834_v39, %s1611_s15  ;;  %vm2089_vm4 = vmand %vm49_vm2, %vm50_vm3  ;;  %vm2872_vm3 = vcmask 105472  }
 0x100   :  { %v2018_v30 = vpop.permute.xlu1 %457  ;;  %v2020_v31 = vpop.permute.xlu0 %455 }
 0x101   :  { %2894 = vst [vmem:[#allocation32_spill] sm:$0xff] %v2018_v30  ;;  %2895 = vst [vmem:[#allocation33_spill] sm:$0xff] %v2020_v31 }
 0x102   :  { %1112 = vrot.lane.b32.xlu1 %v1831_v37, %s1612_s16  ;;  %1110 = vrot.lane.b32.xlu0 %v1834_v39, %s1612_s16 }
 0x104   :  { %v2026_v32 = vpop.permute.xlu1 %469  ;;  %v2028_v33 = vpop.permute.xlu0 %467 }
 0x105   :  { %2896 = vst [vmem:[#allocation34_spill] sm:$0xff] %v2026_v32  ;;  %2897 = vst [vmem:[#allocation35_spill] sm:$0xff] %v2028_v33 }
 0x106   :  { %1278 = vrot.lane.b32.xlu1 %v1893_v54, %s1609_s13  ;;  %1276 = vrot.lane.b32.xlu0 %v1896_v55, %s1609_s13 }
 0x108   :  { %v2034_v29 = vpop.permute.xlu1 %475  ;;  %v2036_v28 = vpop.permute.xlu0 %473 }
 0x109   :  { %2898 = vst [vmem:[#allocation36_spill] sm:$0xff] %v2034_v29  ;;  %2899 = vst [vmem:[#allocation37_spill] sm:$0xff] %v2036_v28 }
 0x10a   :  { %1284 = vrot.lane.b32.xlu1 %v1893_v54, %s1610_s14  ;;  %1282 = vrot.lane.b32.xlu0 %v1896_v55, %s1610_s14 }
 0x10c   :  { %v2042_v31 = vpop.permute.xlu1 %487  ;;  %v2044_v32 = vpop.permute.xlu0 %485 }
 0x10d   :  { %2900 = vst [vmem:[#allocation38_spill] sm:$0xff] %v2042_v31  ;;  %2901 = vst [vmem:[#allocation39_spill] sm:$0xff] %v2044_v32 }
 0x10e   :  { %641 = vrot.lane.b32.xlu1 %v1846_v40, %s1611_s15  ;;  %639 = vrot.lane.b32.xlu0 %v1850_v41, %s1611_s15 }
 0x110   :  { %v865_v33 = vpop.permute.xlu1 %864  ;;  %v863_v29 = vpop.permute.xlu0 %862 }
 0x112   :  { %647 = vrot.lane.b32.xlu1 %v1846_v40, %s1612_s16  ;;  %645 = vrot.lane.b32.xlu0 %v1850_v41, %s1612_s16 }
 0x114   :  { %v871_v28 = vpop.permute.xlu1 %870  ;;  %v869_v30 = vpop.permute.xlu0 %868 }
 0x115   :  { %v875_v11 = vsel %vm207_vm1, %v865_v33, %v871_v28  ;;  %v874_v8 = vsel %vm207_vm1, %v863_v29, %v869_v30  ;;  %v167_v29 = vld [vmem:[#allocation5 + $0x18] sm:$0xff] }
 0x116   :  { %936 = vrot.lane.b32.xlu1 %v1817_v34, %s1613_s17  ;;  %934 = vrot.lane.b32.xlu0 %v1820_v36, %s1613_s17  ;;  %v876_v28 = vsel %vm2089_vm4, %v874_v8, 0.0 }
 0x117   :  { %v878_v8 = vadd.f32 %v876_v28, %v1820_v36 }
 0x118   :  { %v1053_v32 = vpop.permute.xlu1 %1052  ;;  %v1051_v31 = vpop.permute.xlu0 %1050 }
 0x11a   :  { %942 = vrot.lane.b32.xlu1 %v1817_v34, %s1614_s18  ;;  %940 = vrot.lane.b32.xlu0 %v1820_v36, %s1614_s18 }
 0x11c   :  { %v1059_v27 = vpop.permute.xlu1 %1058  ;;  %v1057_v20 = vpop.permute.xlu0 %1056 }
 0x11d   :  { %v1063_v13 = vsel %vm207_vm1, %v1053_v32, %v1059_v27  ;;  %v1062_v17 = vsel %vm207_vm1, %v1051_v31, %v1057_v20  ;;  %v52_v32 = vadd.s32 4294967294, %v2063_v24 }
 0x11e   :  { %1124 = vrot.lane.b32.xlu1 %v1831_v37, %s1613_s17  ;;  %1122 = vrot.lane.b32.xlu0 %v1834_v39, %s1613_s17 }
 0x11f   :  { %vm53_vm5 = vcmp.ge.s32.totalorder %v52_v32, 0  ;;  %vm54_vm6 = vcmp.lt.s32.totalorder %v52_v32, 16 }
 0x120   :  { %v588_v12 = vpop.permute.xlu1 %587  ;;  %v586_v16 = vpop.permute.xlu0 %585  ;;  %vm2103_vm8 = vmand %vm53_vm5, %vm54_vm6  ;;  %vm2874_vm6 = vcmask 1042432  }
 0x122   :  { %1130 = vrot.lane.b32.xlu1 %v1831_v37, %s1614_s18  ;;  %1128 = vrot.lane.b32.xlu0 %v1834_v39, %s1614_s18 }
 0x124   :  { %v594_v22 = vpop.permute.xlu1 %593  ;;  %v592_v27 = vpop.permute.xlu0 %591 }
 0x125   :  { %v2077_v20 = vsel %vm207_vm1, %v588_v12, %v594_v22  ;;  %v2080_v31 = vsel %vm207_vm1, %v586_v16, %v592_v27  ;;  %v877_v16 = vsel %vm2089_vm4, %v875_v11, 0.0  ;;  %v169_v11 = vadd.f32 %v167_v29, %v1678_v35 }
 0x126   :  { %1296 = vrot.lane.b32.xlu1 %v1893_v54, %s1611_s15  ;;  %1294 = vrot.lane.b32.xlu0 %v1896_v55, %s1611_s15  ;;  %v879_v30 = vadd.f32 %v877_v16, %v1817_v34 }
 0x127   :  { %172 = vst.msk [vmem:[#allocation7 + $0x18] sm:$0xff] %vm2870_vm0, %v169_v11 }
 0x128   :  { %v883_v12 = vpop.permute.xlu1 %882  ;;  %v881_v22 = vpop.permute.xlu0 %880 }
 0x12a   :  { %1302 = vrot.lane.b32.xlu1 %v1893_v54, %s1612_s16  ;;  %1300 = vrot.lane.b32.xlu0 %v1896_v55, %s1612_s16 }
 0x12c   :  { %v889_v33 = vpop.permute.xlu1 %888  ;;  %v887_v27 = vpop.permute.xlu0 %886 }
 0x12d   :  { %v893_v5 = vsel %vm226_vm7, %v883_v12, %v889_v33  ;;  %v892_v7 = vsel %vm226_vm7, %v881_v22, %v887_v27 }
 0x12e   :  { %v895_v16 = vsel %vm2103_vm8, %v893_v5, 0.0  ;;  %v894_v6 = vsel %vm2103_vm8, %v892_v7, 0.0  ;;  %493 = vrot.lane.b32.xlu1 %v1746_v50, %s1616_s20  ;;  %491 = vrot.lane.b32.xlu0 %v1750_v51, %s1616_s20  ;;  %v1065_v5 = vsel %vm2089_vm4, %v1063_v13, 0.0  ;;  %v1064_v7 = vsel %vm2089_vm4, %v1062_v17, 0.0 }
 0x12f   :  { %v2120_v35 = vadd.f32 %v895_v16, %v879_v30  ;;  %v2122_v12 = vadd.f32 %v894_v6, %v878_v8  ;;  %v1067_v6 = vadd.f32 %v1065_v5, %v1831_v37  ;;  %v1066_v4 = vadd.f32 %v1064_v7, %v1834_v39 }
 0x130   :  { %v1071_v21 = vpop.permute.xlu1 %1070  ;;  %v1069_v10 = vpop.permute.xlu0 %1068 }
 0x132   :  { %659 = vrot.lane.b32.xlu1 %v1846_v40, %s1613_s17  ;;  %657 = vrot.lane.b32.xlu0 %v1850_v41, %s1613_s17 }
 0x134   :  { %v1077_v22 = vpop.permute.xlu1 %1076  ;;  %v1075_v28 = vpop.permute.xlu0 %1074 }
 0x135   :  { %v1081_v29 = vsel %vm226_vm7, %v1071_v21, %v1077_v22  ;;  %v1080_v30 = vsel %vm226_vm7, %v1069_v10, %v1075_v28  ;;  %v600_v28 = vsel %vm2089_vm4, %v2077_v20, 0.0 }
 0x136   :  { %v1083_v13 = vsel %vm2103_vm8, %v1081_v29, 0.0  ;;  %v1082_v17 = vsel %vm2103_vm8, %v1080_v30, 0.0  ;;  %665 = vrot.lane.b32.xlu1 %v1846_v40, %s1614_s18  ;;  %663 = vrot.lane.b32.xlu0 %v1850_v41, %s1614_s18  ;;  %v825_v30 = vld [vmem:[#allocation5 + $0x30] sm:$0xff] }
 0x137   :  { %v2145_v33 = vadd.f32 %v1083_v13, %v1067_v6  ;;  %v2147_v27 = vadd.f32 %v1082_v17, %v1066_v4  ;;  %v599_v6 = vsel %vm2089_vm4, %v2080_v31, 0.0  ;;  %v602_v4 = vadd.f32 %v600_v28, %v1846_v40 }
 0x138   :  { %v1243_v11 = vpop.permute.xlu1 %1242  ;;  %v1241_v8 = vpop.permute.xlu0 %1240  ;;  %v601_v20 = vadd.f32 %v599_v6, %v1850_v41  ;;  %v833_v6 = vld [vmem:[#allocation5 + $0x40] sm:$0xff] }
 0x13a   :  { %954 = vrot.lane.b32.xlu1 %v1817_v34, %s1615_s19  ;;  %952 = vrot.lane.b32.xlu0 %v1820_v36, %s1615_s19 }
 0x13c   :  { %v1249_v16 = vpop.permute.xlu1 %1248  ;;  %v1247_v21 = vpop.permute.xlu0 %1246 }
 0x13d   :  { %v2154_v10 = vsel %vm207_vm1, %v1243_v11, %v1249_v16  ;;  %v2157_v5 = vsel %vm207_vm1, %v1241_v8, %v1247_v21  ;;  %v827_v11 = vadd.f32 %v825_v30, %v1770_v18  ;;  %v56_v8 = vadd.s32 4294967295, %v2063_v24 }
 0x13e   :  { %960 = vrot.lane.b32.xlu1 %v1817_v34, %s1616_s20  ;;  %958 = vrot.lane.b32.xlu0 %v1820_v36, %s1616_s20  ;;  %v826_v34 = vld [vmem:[#allocation5 + $0x38] sm:$0xff]  ;;  %v835_v30 = vadd.f32 %v833_v6, %v1772_v19 }
 0x13f   :  { %v828_v13 = vadd.f32 %v826_v34, %v1766_v14  ;;  %830 = vst.msk [vmem:[#allocation7 + $0x30] sm:$0xff] %vm2870_vm0, %v827_v11  ;;  %vm57_vm9 = vcmp.ge.s32.totalorder %v56_v8, 0  ;;  %vm58_vm10 = vcmp.lt.s32.totalorder %v56_v8, 16  ;;  %v174_v11 = vld [vmem:[#allocation5 + $0x20] sm:$0xff]  ;;  %v175_v8 = vld [vmem:[#allocation5 + $0x28] sm:$0xff] }
 0x140   :  { %v606_v7 = vpop.permute.xlu1 %605  ;;  %v604_v22 = vpop.permute.xlu0 %603  ;;  %vm2199_vm12 = vmand %vm57_vm9, %vm58_vm10  ;;  %838 = vst.msk [vmem:[#allocation7 + $0x40] sm:$0xff] %vm2870_vm0, %v835_v30 }
 0x141   :  { %831 = vst.msk [vmem:[#allocation7 + $0x38] sm:$0xff] %vm2870_vm0, %v828_v13 }
 0x142   :  { %1142 = vrot.lane.b32.xlu1 %v1831_v37, %s1615_s19  ;;  %1140 = vrot.lane.b32.xlu0 %v1834_v39, %s1615_s19 }
 0x144   :  { %v612_v36 = vpop.permute.xlu1 %611  ;;  %v610_v29 = vpop.permute.xlu0 %609 }
 0x145   :  { %v616_v17 = vsel %vm226_vm7, %v606_v7, %v612_v36  ;;  %v615_v31 = vsel %vm226_vm7, %v604_v22, %v610_v29 }
 0x146   :  { %v618_v16 = vsel %vm2103_vm8, %v616_v17, 0.0  ;;  %v617_v21 = vsel %vm2103_vm8, %v615_v31, 0.0  ;;  %1148 = vrot.lane.b32.xlu1 %v1831_v37, %s1616_s20  ;;  %1146 = vrot.lane.b32.xlu0 %v1834_v39, %s1616_s20  ;;  %v834_v37 = vld [vmem:[#allocation5 + $0x48] sm:$0xff] }
 0x147   :  { %v2189_v14 = vadd.f32 %v618_v16, %v602_v4  ;;  %v2191_v7 = vadd.f32 %v617_v21, %v601_v20  ;;  %v836_v34 = vadd.f32 %v834_v37, %v1768_v15 }
 0x148   :  { %v901_v18 = vpop.permute.xlu1 %900  ;;  %v899_v22 = vpop.permute.xlu0 %898 }
 0x149   :  { %839 = vst.msk [vmem:[#allocation7 + $0x48] sm:$0xff] %vm2870_vm0, %v836_v34  ;;  %v1255_v34 = vsel %vm2089_vm4, %v2154_v10, 0.0 }
 0x14a   :  { %1314 = vrot.lane.b32.xlu1 %v1893_v54, %s1613_s17  ;;  %1312 = vrot.lane.b32.xlu0 %v1896_v55, %s1613_s17 }
 0x14c   :  { %v907_v39 = vpop.permute.xlu1 %906  ;;  %v905_v28 = vpop.permute.xlu0 %904 }
 0x14d   :  { %v911_v36 = vsel %vm245_vm11, %v901_v18, %v907_v39  ;;  %v910_v29 = vsel %vm245_vm11, %v899_v22, %v905_v28  ;;  %v177_v18 = vadd.f32 %v175_v8, %v1680_v38 }
 0x14e   :  { %v913_v13 = vsel %vm2199_vm12, %v911_v36, 0.0  ;;  %v912_v20 = vsel %vm2199_vm12, %v910_v29, 0.0  ;;  %1320 = vrot.lane.b32.xlu1 %v1893_v54, %s1614_s18  ;;  %1318 = vrot.lane.b32.xlu0 %v1896_v55, %s1614_s18 }
 0x14f   :  { %v2216_v15 = vadd.f32 %v913_v13, %v2120_v35  ;;  %v2219_v17 = vadd.f32 %v912_v20, %v2122_v12  ;;  %v176_v35 = vadd.f32 %v174_v11, %v1673_v25  ;;  %180 = vst.msk [vmem:[#allocation7 + $0x28] sm:$0xff] %vm2870_vm0, %v177_v18  ;;  %v842_v11 = vld [vmem:[#allocation5 + $0x58] sm:$0xff] }
 0x150   :  { %v1089_v19 = vpop.permute.xlu1 %1088  ;;  %v1087_v31 = vpop.permute.xlu0 %1086 }
 0x151   :  { %179 = vst.msk [vmem:[#allocation7 + $0x20] sm:$0xff] %vm2870_vm0, %v176_v35  ;;  %v844_v35 = vadd.f32 %v842_v11, %v1778_v23 }
 0x152   :  { %677 = vrot.lane.b32.xlu1 %v1846_v40, %s1615_s19  ;;  %675 = vrot.lane.b32.xlu0 %v1850_v41, %s1615_s19 }
 0x153   :  { %847 = vst.msk [vmem:[#allocation7 + $0x58] sm:$0xff] %vm2870_vm0, %v844_v35 }
 0x154   :  { %v1095_v16 = vpop.permute.xlu1 %1094  ;;  %v1093_v21 = vpop.permute.xlu0 %1092 }
 0x155   :  { %v1099_v12 = vsel %vm245_vm11, %v1089_v19, %v1095_v16  ;;  %v1098_v22 = vsel %vm245_vm11, %v1087_v31, %v1093_v21  ;;  %v841_v21 = vld [vmem:[#allocation5 + $0x50] sm:$0xff] }
 0x156   :  { %v1101_v37 = vsel %vm2199_vm12, %v1099_v12, 0.0  ;;  %v1100_v39 = vsel %vm2199_vm12, %v1098_v22, 0.0  ;;  %683 = vrot.lane.b32.xlu1 %v1846_v40, %s1616_s20  ;;  %681 = vrot.lane.b32.xlu0 %v1850_v41, %s1616_s20  ;;  %v1254_v40 = vsel %vm2089_vm4, %v2157_v5, 0.0 }
 0x157   :  { %v2241_v25 = vadd.f32 %v1101_v37, %v2145_v33  ;;  %v2244_v38 = vadd.f32 %v1100_v39, %v2147_v27  ;;  %v1257_v27 = vadd.f32 %v1255_v34, %v1893_v54  ;;  %v1256_v36 = vadd.f32 %v1254_v40, %v1896_v55 }
 0x158   :  { %v1261_v28 = vpop.permute.xlu1 %1260  ;;  %v1259_v6 = vpop.permute.xlu0 %1258 }
 0x15a   :  { %1332 = vrot.lane.b32.xlu1 %v1893_v54, %s1615_s19  ;;  %1330 = vrot.lane.b32.xlu0 %v1896_v55, %s1615_s19 }
 0x15c   :  { %v1267_v41 = vpop.permute.xlu1 %1266  ;;  %v1265_v33 = vpop.permute.xlu0 %1264 }
 0x15d   :  { %v1271_v29 = vsel %vm226_vm7, %v1261_v28, %v1267_v41  ;;  %v1270_v10 = vsel %vm226_vm7, %v1259_v6, %v1265_v33  ;;  %v209_v41 = vsel %vm207_vm1, %v1870_v47, %v1868_v42  ;;  %v228_v42 = vsel %vm226_vm7, %v1876_v48, %v1884_v52 }
 0x15e   :  { %v1273_v30 = vsel %vm2103_vm8, %v1271_v29, 0.0  ;;  %v1272_v5 = vsel %vm2103_vm8, %v1270_v10, 0.0  ;;  %1338 = vrot.lane.b32.xlu1 %v1893_v54, %s1616_s20  ;;  %1336 = vrot.lane.b32.xlu0 %v1896_v55, %s1616_s20  ;;  %v843_v54 = vadd.f32 %v841_v21, %v1782_v26  ;;  %v2289_v26 = vadd.s32 1, %v2063_v24 }
 0x15f   :  { %v2268_v13 = vadd.f32 %v1273_v30, %v1257_v27  ;;  %v2270_v20 = vadd.f32 %v1272_v5, %v1256_v36  ;;  %v227_v47 = vsel %vm226_vm7, %v1878_v49, %v1886_v53  ;;  %v247_v48 = vsel %vm245_vm11, %v1898_v56, %v1906_v58 }
 0x160   :  { %v624_v19 = vpop.permute.xlu1 %623  ;;  %v622_v31 = vpop.permute.xlu0 %621  ;;  %846 = vst.msk [vmem:[#allocation7 + $0x50] sm:$0xff] %vm2870_vm0, %v843_v54  ;;  %vm62_vm14 = vcmp.lt.s32.totalorder %v2289_v26, 16  ;;  %v246_v49 = vsel %vm245_vm11, %v1900_v57, %v1908_v59  ;;  %v229_v53 = vsel %vm2103_vm8, %v227_v47, 0.0  ;;  %v266_v57 = vsel %vm264_vm13, %v1914_v60, %v1922_v62 }
 0x161   :  { %v265_v58 = vsel %vm264_vm13, %v1916_v61, %v1924_v63  ;;  %v248_v21 = vsel %vm2199_vm12, %v246_v49, 0.0  ;;  %v285_v61 = vsel %vm283_vm15, %v1930_v0, %v1938_v2  ;;  %v284_v63 = vsel %vm283_vm15, %v1932_v1, %v1940_v3  ;;  %v2911_v0 = vld [vmem:[#allocation15_spill] sm:$0xff] }
 0x162   :  { %vm325_vm0 = vcmask 1041408  }
 0x164   :  { %v630_v8 = vpop.permute.xlu1 %629  ;;  %v628_v16 = vpop.permute.xlu0 %627 }
 0x165   :  { %v634_v18 = vsel %vm245_vm11, %v624_v19, %v630_v8  ;;  %v633_v12 = vsel %vm245_vm11, %v622_v31, %v628_v16  ;;  %v2326_v19 = vadd.s32 3, %v2063_v24  ;;  %v249_v16 = vsel %vm2199_vm12, %v247_v48, 0.0 }
 0x166   :  { %v636_v55 = vsel %vm2199_vm12, %v634_v18, 0.0  ;;  %v635_v22 = vsel %vm2199_vm12, %v633_v12, 0.0 }
 0x167   :  { %v2282_v37 = vadd.f32 %v636_v55, %v2189_v14  ;;  %v2285_v39 = vadd.f32 %v635_v22, %v2191_v7  ;;  %v208_v7 = vsel %vm207_vm1, %v1862_v44, %v1860_v46  ;;  %v211_v44 = vsel %vm2089_vm4, %v209_v41, 0.0  ;;  %v2908_v55 = vld [vmem:[#allocation16_spill] sm:$0xff]  ;;  %v2909_v22 = vld [vmem:[#allocation14_spill] sm:$0xff] }
 0x168   :  { %v919_v23 = vpop.permute.xlu1 %918  ;;  %v917_v28 = vpop.permute.xlu0 %916  ;;  %v210_v46 = vsel %vm2089_vm4, %v208_v7, 0.0  ;;  %v213_v5 = vadd.f32 %v211_v44, %v1697_v45  ;;  %v230_v45 = vsel %vm2103_vm8, %v228_v42, 0.0  ;;  %vm2871_vm5 = vcmp.lt.s32.totalorder %v2326_v19, 16 }
 0x16a   :  { %v232_v35 = vadd.f32 %v230_v45, %v213_v5 }
 0x16c   :  { %v925_v6 = vpop.permute.xlu1 %924  ;;  %v923_v34 = vpop.permute.xlu0 %922  ;;  %v251_v12 = vadd.f32 %v249_v16, %v232_v35 }
 0x16d   :  { %v929_v40 = vsel %vm264_vm13, %v919_v23, %v925_v6  ;;  %v928_v14 = vsel %vm264_vm13, %v917_v28, %v923_v34  ;;  %v304_v23 = vsel %vm2872_vm3, %v2909_v22, %v2908_v55  ;;  %v2910_v28 = vld [vmem:[#allocation17_spill] sm:$0xff] }
 0x16e   :  { %v931_v33 = vsel %vm62_vm14, %v929_v40, 0.0  ;;  %v930_v27 = vsel %vm62_vm14, %v928_v14, 0.0  ;;  %v303_v2 = vsel %vm2872_vm3, %v2911_v0, %v2910_v28  ;;  %vm337_vm3 = vcmask 1040384   ;;  %v2913_v28 = vld [vmem:[#allocation20_spill] sm:$0xff]  ;;  %v2914_v0 = vld [vmem:[#allocation18_spill] sm:$0xff] }
 0x16f   :  { %v2305_v36 = vadd.f32 %v931_v33, %v2216_v15  ;;  %v2308_v29 = vadd.f32 %v930_v27, %v2219_v17  ;;  %v2321_v15 = vadd.s32 2, %v2063_v24  ;;  %v212_v17 = vadd.f32 %v210_v46, %v1688_v43 }
 0x170   :  { %v1107_v10 = vpop.permute.xlu1 %1106  ;;  %v1105_v30 = vpop.permute.xlu0 %1104  ;;  %v306_v33 = vsel %vm2871_vm5, %v304_v23, 0.0  ;;  %v305_v27 = vsel %vm2871_vm5, %v303_v2, 0.0  ;;  %v408_v2 = vsel %vm207_vm1, %v2914_v0, %v2913_v28 }
 0x171   :  { %vm66_vm2 = vcmp.lt.s32.totalorder %v2321_v15, 16  ;;  %v231_v18 = vadd.f32 %v229_v53, %v212_v17 }
 0x172   :  { %v287_v1 = vsel %vm66_vm2, %v285_v61, 0.0  ;;  %v286_v3 = vsel %vm66_vm2, %v284_v63, 0.0 }
 0x173   :  { %v250_v54 = vadd.f32 %v248_v21, %v231_v18 }
 0x174   :  { %v1113_v31 = vpop.permute.xlu1 %1112  ;;  %v1111_v11 = vpop.permute.xlu0 %1110 }
 0x175   :  { %v1117_v52 = vsel %vm264_vm13, %v1107_v10, %v1113_v31  ;;  %v1116_v43 = vsel %vm264_vm13, %v1105_v30, %v1111_v11  ;;  %v2912_v31 = vlaneseq }
 0x176   :  { %v1119_v24 = vsel %vm62_vm14, %v1117_v52, 0.0  ;;  %v1118_v56 = vsel %vm62_vm14, %v1116_v43, 0.0 }
 0x177   :  { %v2351_v59 = vadd.f32 %v1119_v24, %v2241_v25  ;;  %v2354_v8 = vadd.f32 %v1118_v56, %v2244_v38  ;;  %v268_v25 = vsel %vm62_vm14, %v266_v57, 0.0  ;;  %v267_v38 = vsel %vm62_vm14, %v265_v58, 0.0 }
 0x178   :  { %v1279_v60 = vpop.permute.xlu1 %1278  ;;  %v1277_v62 = vpop.permute.xlu0 %1276  ;;  %v270_v40 = vadd.f32 %v268_v25, %v251_v12  ;;  %v269_v14 = vadd.f32 %v267_v38, %v250_v54  ;;  %v46_v11 = vshrl.u32 %v2912_v31, 7 }
 0x17a   :  { %v289_v46 = vadd.f32 %v287_v1, %v270_v40  ;;  %v288_v44 = vadd.f32 %v286_v3, %v269_v14  ;;  %v47_v45 = vadd.s32 8, %v46_v11  ;;  %v2403_v53 = vadd.s32 4294967293, %v46_v11  ;;  %v2915_v1 = vld [vmem:[#allocation21_spill] sm:$0xff]  ;;  %v2916_v3 = vld [vmem:[#allocation19_spill] sm:$0xff] }
 0x17b   :  { %v2413_v16 = vadd.s32 4294967294, %v46_v11 }
 0x17c   :  { %v1285_v6 = vpop.permute.xlu1 %1284  ;;  %v1283_v34 = vpop.permute.xlu0 %1282  ;;  %v2399_v48 = vadd.f32 %v306_v33, %v289_v46  ;;  %v2401_v49 = vadd.f32 %v305_v27, %v288_v44  ;;  %vm2873_vm9 = vcmp.ge.s32.totalorder %v2403_v53, 0  ;;  %v2426_v63 = vadd.s32 1, %v47_v45 }
 0x17d   :  { %v1289_v7 = vsel %vm245_vm11, %v1279_v60, %v1285_v6  ;;  %v1288_v41 = vsel %vm245_vm11, %v1277_v62, %v1283_v34  ;;  %v2421_v62 = vadd.s32 4294967295, %v46_v11  ;;  %vm82_vm10 = vcmp.ge.s32.totalorder %v2413_v16, 0 }
 0x17e   :  { %v1291_v10 = vsel %vm2199_vm12, %v1289_v7, 0.0  ;;  %v1290_v30 = vsel %vm2199_vm12, %v1288_v41, 0.0  ;;  %v310_v24 = vrot.slane %v2399_v48, 5  ;;  %v2428_v25 = vadd.s32 2, %v47_v45 }
 0x17f   :  { %v2393_v42 = vadd.f32 %v1291_v10, %v2268_v13  ;;  %v2396_v47 = vadd.f32 %v1290_v30, %v2270_v20  ;;  %v314_v13 = vrot.slane %v2401_v49, 5  ;;  %vm2875_vm5 = vcmp.ge.s32.totalorder %v2421_v62, 0 }
 0x180   :  { %v642_v17 = vpop.permute.xlu1 %641  ;;  %v640_v5 = vpop.permute.xlu0 %639  ;;  %v326_v38 = vrot.slane %v2401_v49, 6  ;;  %v335_v22 = vrot.slane %v2399_v48, 7  ;;  %v338_v23 = vrot.slane %v2401_v49, 7  ;;  %v407_v6 = vsel %vm207_vm1, %v2916_v3, %v2915_v1  ;;  %v2922_v1 = vld [vmem:[#allocation26_spill] sm:$0xff] }
 0x181   :  { %v318_v61 = vsel %vm2874_vm6, %v310_v24, %v314_v13  ;;  %v348_v33 = vrot.slane %v2401_v49, 1  ;;  %v349_v46 = vrot.slane %v2399_v48, 1  ;;  %v410_v44 = vsel %vm2089_vm4, %v408_v2, 0.0  ;;  %v2921_v2 = vld [vmem:[#allocation28_spill] sm:$0xff] }
 0x182   :  { %v319_v55 = vsel %vm2873_vm9, %v318_v61, 0.0  ;;  %vm101_vm1 = vcmp.lt.s32.totalorder %v2426_v63, 16  ;;  %vm347_vm9 = vcmask 1046528   ;;  %v361_v61 = vrot.slane %v2399_v48, 2 }
 0x183   :  { %v321_v11 = vadd.f32 %v319_v55, %v2401_v49  ;;  %v350_v0 = vsel %vm347_vm9, %v348_v33, %v349_v46  ;;  %v444_v3 = vsel %vm245_vm11, %v2922_v1, %v2921_v2 }
 0x184   :  { %v648_v52 = vpop.permute.xlu1 %647  ;;  %v646_v43 = vpop.permute.xlu0 %645  ;;  %v446_v32 = vsel %vm2199_vm12, %v444_v3, 0.0 }
 0x185   :  { %v652_v20 = vsel %vm264_vm13, %v642_v17, %v648_v52  ;;  %v651_v56 = vsel %vm264_vm13, %v640_v5, %v646_v43  ;;  %v409_v17 = vsel %vm2089_vm4, %v407_v6, 0.0  ;;  %vm359_vm4 = vcmask 1045504   ;;  %v2923_v6 = vld [vmem:[#allocation29_spill] sm:$0xff] }
 0x186   :  { %v654_v57 = vsel %vm62_vm14, %v652_v20, 0.0  ;;  %v653_v58 = vsel %vm62_vm14, %v651_v56, 0.0  ;;  %v339_v20 = vsel %vm337_vm3, %v338_v23, %v335_v22 }
 0x187   :  { %v2416_v21 = vadd.f32 %v654_v57, %v2282_v37  ;;  %v2419_v60 = vadd.f32 %v653_v58, %v2285_v39  ;;  %v315_v37 = vsel %vm2874_vm6, %v314_v13, %v310_v24  ;;  %v323_v39 = vrot.slane %v2399_v48, 6 }
 0x188   :  { %v937_v35 = vpop.permute.xlu1 %936  ;;  %v935_v18 = vpop.permute.xlu0 %934  ;;  %v322_v41 = vadd.f32 %v315_v37, %v2399_v48  ;;  %vm109_vm6 = vcmp.lt.s32.totalorder %v2428_v25, 16  ;;  %v412_v24 = vadd.f32 %v410_v44, %v1746_v50  ;;  %v411_v13 = vadd.f32 %v409_v17, %v1750_v51  ;;  %v2917_v37 = vld [vmem:[#allocation24_spill] sm:$0xff]  ;;  %v2920_v51 = vld [vmem:[#allocation23_spill] sm:$0xff] }
 0x189   :  { %v330_v30 = vsel %vm325_vm0, %v323_v39, %v326_v38  ;;  %v327_v52 = vsel %vm325_vm0, %v326_v38, %v323_v39  ;;  %v2918_v39 = vld [vmem:[#allocation22_spill] sm:$0xff]  ;;  %v2919_v38 = vld [vmem:[#allocation25_spill] sm:$0xff] }
 0x18a   :  { %v331_v43 = vsel %vm82_vm10, %v330_v30, 0.0  ;;  %v334_v9 = vadd.f32 %v327_v52, %v322_v41  ;;  %v426_v50 = vsel %vm226_vm7, %v2918_v39, %v2917_v37  ;;  %v2931_v39 = vld [vmem:[#allocation37_spill] sm:$0xff] }
 0x18b   :  { %v333_v58 = vadd.f32 %v331_v43, %v321_v11  ;;  %v428_v41 = vsel %vm2103_vm8, %v426_v50, 0.0  ;;  %v2927_v11 = vld [vmem:[#allocation33_spill] sm:$0xff]  ;;  %v372_v43 = vrot.slane %v2401_v49, 3  ;;  %v2932_v50 = vld [vmem:[#allocation35_spill] sm:$0xff] }
 0x18c   :  { %v943_v12 = vpop.permute.xlu1 %942  ;;  %v941_v54 = vpop.permute.xlu0 %940  ;;  %v346_v28 = vadd.f32 %v339_v20, %v334_v9 }
 0x18d   :  { %v947_v34 = vsel %vm283_vm15, %v937_v35, %v943_v12  ;;  %v946_v40 = vsel %vm283_vm15, %v935_v18, %v941_v54  ;;  %v354_v35 = vsel %vm347_vm9, %v349_v46, %v348_v33  ;;  %v360_v18 = vrot.slane %v2401_v49, 2 }
 0x18e   :  { %v949_v14 = vsel %vm66_vm2, %v947_v34, 0.0  ;;  %v948_v7 = vsel %vm66_vm2, %v946_v40, 0.0  ;;  %v425_v12 = vsel %vm226_vm7, %v2920_v51, %v2919_v38  ;;  %v2924_v34 = vld [vmem:[#allocation27_spill] sm:$0xff]  ;;  %v356_v17 = vsel %vm101_vm1, %v354_v35, 0.0  ;;  %v2930_v35 = vld [vmem:[#allocation34_spill] sm:$0xff] }
 0x18f   :  { %v2453_v27 = vadd.f32 %v949_v14, %v2305_v36  ;;  %v2456_v10 = vadd.f32 %v948_v7, %v2308_v29  ;;  %v342_v36 = vsel %vm337_vm3, %v335_v22, %v338_v23  ;;  %v2467_v29 = vadd.s32 3, %v47_v45 }
 0x190   :  { %v1125_v5 = vpop.permute.xlu1 %1124  ;;  %v1123_v31 = vpop.permute.xlu0 %1122  ;;  %v343_v45 = vsel %vm2875_vm5, %v342_v36, 0.0  ;;  %vm371_vm5 = vcmask 1044480   ;;  %v443_v40 = vsel %vm245_vm11, %v2924_v34, %v2923_v6  ;;  %v427_v33 = vsel %vm2103_vm8, %v425_v12, 0.0  ;;  %v2928_v36 = vld [vmem:[#allocation31_spill] sm:$0xff] }
 0x191   :  { %v345_v44 = vadd.f32 %v343_v45, %v333_v58  ;;  %v366_v52 = vsel %vm359_vm4, %v361_v61, %v360_v18  ;;  %v445_v9 = vsel %vm2199_vm12, %v443_v40, 0.0  ;;  %v358_v20 = vadd.f32 %v356_v17, %v346_v28  ;;  %v2929_v58 = vld [vmem:[#allocation36_spill] sm:$0xff]  ;;  %v2933_v17 = vld [vmem:[#allocation38_spill] sm:$0xff] }
 0x192   :  { %v373_v45 = vrot.slane %v2399_v48, 3  ;;  %v480_v37 = vsel %vm283_vm15, %v2930_v35, %v2929_v58  ;;  %v479_v38 = vsel %vm283_vm15, %v2932_v50, %v2931_v39  ;;  %v368_v48 = vsel %vm109_vm6, %v366_v52, 0.0 }
 0x193   :  { %v481_v28 = vsel %vm66_vm2, %v479_v38, 0.0  ;;  %vm117_vm7 = vcmp.lt.s32.totalorder %v2467_v29, 16  ;;  %vm2934_vm8 = vcmask 105472   ;;  %vm2937_vm12 = vcmp.lt.s32.totalorder %v2326_v19, 16 }
 0x194   :  { %v1131_v56 = vpop.permute.xlu1 %1130  ;;  %v1129_v57 = vpop.permute.xlu0 %1128  ;;  %vm2936_vm11 = vmmov %vm2934_vm8 }
 0x195   :  { %v1135_v54 = vsel %vm283_vm15, %v1125_v5, %v1131_v56  ;;  %v1134_v55 = vsel %vm283_vm15, %v1123_v31, %v1129_v57  ;;  %v2925_v5 = vld [vmem:[#allocation32_spill] sm:$0xff]  ;;  %v2926_v31 = vld [vmem:[#allocation30_spill] sm:$0xff]  ;;  %v430_v56 = vadd.f32 %v428_v41, %v412_v24  ;;  %v429_v57 = vadd.f32 %v427_v33, %v411_v13 }
 0x196   :  { %v1137_v22 = vsel %vm66_vm2, %v1135_v54, 0.0  ;;  %v1136_v23 = vsel %vm66_vm2, %v1134_v55, 0.0  ;;  %v357_v54 = vadd.f32 %v350_v0, %v345_v44  ;;  %v362_v33 = vsel %vm359_vm4, %v360_v18, %v361_v61 }
 0x197   :  { %v2501_v14 = vadd.f32 %v1137_v22, %v2351_v59  ;;  %v2504_v7 = vadd.f32 %v1136_v23, %v2354_v8  ;;  %v462_v59 = vsel %vm264_vm13, %v2926_v31, %v2925_v5  ;;  %v461_v8 = vsel %vm264_vm13, %v2928_v36, %v2927_v11  ;;  %v2935_v31 = vld [vmem:[#allocation39_spill] sm:$0xff] }
 0x198   :  { %v1297_v30 = vpop.permute.xlu1 %1296  ;;  %v1295_v46 = vpop.permute.xlu0 %1294  ;;  %v464_v49 = vsel %vm62_vm14, %v462_v59, 0.0  ;;  %v463_v4 = vsel %vm62_vm14, %v461_v8, 0.0  ;;  %v448_v24 = vadd.f32 %v446_v32, %v430_v56  ;;  %v447_v13 = vadd.f32 %v445_v9, %v429_v57 }
 0x199   :  { %v482_v23 = vsel %vm66_vm2, %v480_v37, 0.0  ;;  %v369_v11 = vadd.f32 %v362_v33, %v357_v54  ;;  %v374_v32 = vsel %vm371_vm5, %v372_v43, %v373_v45 }
 0x19a   :  { %v466_v1 = vadd.f32 %v464_v49, %v448_v24  ;;  %v465_v3 = vadd.f32 %v463_v4, %v447_v13 }
 0x19b   :  { %v381_v35 = vadd.f32 %v374_v32, %v369_v11 }
 0x19c   :  { %v1303_v51 = vpop.permute.xlu1 %1302  ;;  %v1301_v12 = vpop.permute.xlu0 %1300  ;;  %v484_v44 = vadd.f32 %v482_v23, %v466_v1  ;;  %v483_v26 = vadd.f32 %v481_v28, %v465_v3  ;;  %v386_v3 = vld [vmem:[#allocation7 + $0x8] sm:$0xff] }
 0x19d   :  { %v1307_v55 = vsel %vm264_vm13, %v1297_v30, %v1303_v51  ;;  %v1306_v22 = vsel %vm264_vm13, %v1295_v46, %v1301_v12  ;;  %v370_v30 = vadd.f32 %v368_v48, %v358_v20  ;;  %v378_v46 = vsel %vm371_vm5, %v373_v45, %v372_v43  ;;  %vm2938_vm13 = vmmov %vm2937_vm12 }
 0x19e   :  { %v1309_v2 = vsel %vm62_vm14, %v1307_v55, 0.0  ;;  %v1308_v0 = vsel %vm62_vm14, %v1306_v22, 0.0  ;;  %v380_v61 = vsel %vm117_vm7, %v378_v46, 0.0  ;;  %vm2939_vm14 = vcmask 1042432   ;;  %v385_v46 = vld [vmem:[#allocation7] sm:$0xff] }
 0x19f   :  { %v2548_v6 = vadd.f32 %v1309_v2, %v2393_v42  ;;  %v2551_v34 = vadd.f32 %v1308_v0, %v2396_v47  ;;  %v382_v9 = vadd.f32 %v380_v61, %v370_v30  ;;  %v383_v22 = vmul.f32 0.020408163, %v381_v35 }
 0x1a0   :  { %v494_v40 = vpop.permute.xlu1 %493  ;;  %v492_v41 = vpop.permute.xlu0 %491 }
 0x1a1   :  { %v498_v5 = vsel %vm2934_vm8, %v2933_v17, %v494_v40  ;;  %v497_v42 = vsel %vm2936_vm11, %v2935_v31, %v492_v41  ;;  %vm2940_vm8 = vmmov %vm2939_vm14  ;;  %vm2941_vm11 = vcmp.ge.s32.totalorder %v2403_v53, 0  ;;  %v384_v48 = vmul.f32 0.020408163, %v382_v9 }
 0x1a2   :  { %v500_v47 = vsel %vm2937_vm12, %v498_v5, 0.0  ;;  %v499_v59 = vsel %vm2938_vm13, %v497_v42, 0.0  ;;  %vm2942_vm12 = vcmp.ge.s32.totalorder %v2421_v62, 0  ;;  %v387_v32 = vsub.f32 %v385_v46, %v383_v22 }
 0x1a3   :  { %v2564_v36 = vadd.f32 %v500_v47, %v484_v44  ;;  %v2566_v18 = vadd.f32 %v499_v59, %v483_v26  ;;  %v388_v11 = vsub.f32 %v386_v3, %v384_v48  ;;  %vm2943_vm13 = vcmask 105472  }
 0x1a4   :  { %v660_v8 = vpop.permute.xlu1 %659  ;;  %v658_v52 = vpop.permute.xlu0 %657 }
 0x1a5   :  { %v504_v20 = vrot.slane %v2564_v36, 5  ;;  %v507_v56 = vrot.slane %v2566_v18, 5  ;;  %v516_v57 = vrot.slane %v2564_v36, 6  ;;  %v518_v58 = vrot.slane %v2566_v18, 6 }
 0x1a6   :  { %v527_v37 = vrot.slane %v2564_v36, 7  ;;  %v529_v39 = vrot.slane %v2566_v18, 7  ;;  %v538_v12 = vrot.slane %v2566_v18, 1  ;;  %v539_v54 = vrot.slane %v2564_v36, 1 }
 0x1a7   :  { %v508_v50 = vsel %vm2939_vm14, %v507_v56, %v504_v20  ;;  %v511_v38 = vsel %vm2940_vm8, %v504_v20, %v507_v56  ;;  %v522_v43 = vsel %vm325_vm0, %v516_v57, %v518_v58  ;;  %v519_v13 = vsel %vm325_vm0, %v518_v58, %v516_v57  ;;  %vm2944_vm14 = vmmov %vm2943_vm13 }
 0x1a8   :  { %v666_v45 = vpop.permute.xlu1 %665  ;;  %v664_v49 = vpop.permute.xlu0 %663  ;;  %v512_v4 = vsel %vm2941_vm11, %v511_v38, 0.0  ;;  %v515_v51 = vadd.f32 %v508_v50, %v2564_v36  ;;  %v533_v55 = vsel %vm337_vm3, %v527_v37, %v529_v39  ;;  %v523_v23 = vsel %vm82_vm10, %v522_v43, 0.0 }
 0x1a9   :  { %v514_v24 = vadd.f32 %v512_v4, %v2566_v18  ;;  %v530_v2 = vsel %vm337_vm3, %v529_v39, %v527_v37  ;;  %v670_v0 = vsel %vm283_vm15, %v660_v8, %v666_v45  ;;  %v669_v1 = vsel %vm283_vm15, %v658_v52, %v664_v49 }
 0x1aa   :  { %v526_v28 = vadd.f32 %v519_v13, %v515_v51  ;;  %v534_v41 = vsel %vm2942_vm12, %v533_v55, 0.0  ;;  %v544_v26 = vsel %vm347_vm9, %v539_v54, %v538_v12  ;;  %v549_v17 = vrot.slane %v2566_v18, 2  ;;  %v574_v13 = vld [vmem:[#allocation7 + $0x18] sm:$0xff] }
 0x1ab   :  { %v525_v40 = vadd.f32 %v523_v23, %v514_v24  ;;  %v550_v5 = vrot.slane %v2564_v36, 2  ;;  %v546_v42 = vsel %vm101_vm1, %v544_v26, 0.0  ;;  %v560_v47 = vrot.slane %v2566_v18, 3 }
 0x1ac   :  { %v955_v33 = vpop.permute.xlu1 %954  ;;  %v953_v30 = vpop.permute.xlu0 %952  ;;  %v537_v44 = vadd.f32 %v530_v2, %v526_v28  ;;  %v561_v59 = vrot.slane %v2564_v36, 3  ;;  %v540_v61 = vsel %vm347_vm9, %v538_v12, %v539_v54  ;;  %v672_v57 = vsel %vm66_vm2, %v670_v0, 0.0 }
 0x1ad   :  { %v536_v31 = vadd.f32 %v534_v41, %v525_v40  ;;  %v555_v52 = vsel %vm359_vm4, %v550_v5, %v549_v17  ;;  %v671_v18 = vsel %vm66_vm2, %v669_v1, 0.0  ;;  %v551_v35 = vsel %vm359_vm4, %v549_v17, %v550_v5  ;;  %v573_v1 = vld [vmem:[#allocation7 + $0x10] sm:$0xff] }
 0x1ae   :  { %v548_v8 = vadd.f32 %v546_v42, %v537_v44  ;;  %v557_v20 = vsel %vm109_vm6, %v555_v52, 0.0  ;;  %v566_v56 = vsel %vm371_vm5, %v561_v59, %v560_v47  ;;  %vm2945_vm8 = vcmp.lt.s32.totalorder %v2326_v19, 16 }
 0x1af   :  { %v547_v9 = vadd.f32 %v540_v61, %v536_v31  ;;  %v568_v43 = vsel %vm117_vm7, %v566_v56, 0.0  ;;  %vm2946_vm11 = vmmov %vm2945_vm8  ;;  %v562_v4 = vsel %vm371_vm5, %v560_v47, %v561_v59  ;;  %v390_v48 = vmul.f32 %v388_v11, %v388_v11 }
 0x1b0   :  { %v961_v36 = vpop.permute.xlu1 %960  ;;  %v959_v58 = vpop.permute.xlu0 %958  ;;  %v559_v37 = vadd.f32 %v557_v20, %v548_v8  ;;  %v2628_v55 = vadd.f32 %v672_v57, %v2416_v21  ;;  %v2631_v22 = vadd.f32 %v671_v18, %v2419_v60  ;;  %v389_v2 = vmul.f32 %v387_v32, %v387_v32 }
 0x1b1   :  { %v965_v39 = vsel %vm2943_vm13, %v955_v33, %v961_v36  ;;  %v964_v50 = vsel %vm2944_vm14, %v953_v30, %v959_v58  ;;  %v558_v38 = vadd.f32 %v551_v35, %v547_v9  ;;  %vm2947_vm12 = vcmask 1042432  }
 0x1b2   :  { %v967_v45 = vsel %vm2945_vm8, %v965_v39, 0.0  ;;  %v966_v49 = vsel %vm2946_vm11, %v964_v50, 0.0  ;;  %v570_v51 = vadd.f32 %v568_v43, %v559_v37  ;;  %vm2948_vm13 = vmmov %vm2947_vm12  ;;  %vm2949_vm14 = vcmp.ge.s32.totalorder %v2403_v53, 0 }
 0x1b3   :  { %v2622_v12 = vadd.f32 %v967_v45, %v2453_v27  ;;  %v2625_v54 = vadd.f32 %v966_v49, %v2456_v10  ;;  %v569_v24 = vadd.f32 %v562_v4, %v558_v38  ;;  %vm2950_vm8 = vcmask 105472  }
 0x1b4   :  { %v1143_v23 = vpop.permute.xlu1 %1142  ;;  %v1141_v28 = vpop.permute.xlu0 %1140  ;;  %v572_v0 = vmul.f32 0.020408163, %v570_v51  ;;  %vm2951_vm11 = vmmov %vm2950_vm8 }
 0x1b5   :  { %v971_v27 = vrot.slane %v2622_v12, 5  ;;  %v974_v3 = vrot.slane %v2625_v54, 5  ;;  %v571_v10 = vmul.f32 0.020408163, %v569_v24  ;;  %v983_v40 = vrot.slane %v2622_v12, 6 }
 0x1b6   :  { %v576_v41 = vsub.f32 %v574_v13, %v572_v0  ;;  %v985_v33 = vrot.slane %v2625_v54, 6  ;;  %v994_v21 = vrot.slane %v2622_v12, 7  ;;  %v996_v60 = vrot.slane %v2625_v54, 7 }
 0x1b7   :  { %v575_v30 = vsub.f32 %v573_v1, %v571_v10  ;;  %v975_v46 = vsel %vm2947_vm12, %v974_v3, %v971_v27  ;;  %v978_v44 = vsel %vm2948_vm13, %v971_v27, %v974_v3  ;;  %v1005_v26 = vrot.slane %v2625_v54, 1 }
 0x1b8   :  { %v1149_v17 = vpop.permute.xlu1 %1148  ;;  %v1147_v5 = vpop.permute.xlu0 %1146  ;;  %v578_v31 = vmul.f32 %v576_v41, %v576_v41  ;;  %v979_v42 = vsel %vm2949_vm14, %v978_v44, 0.0  ;;  %v982_v47 = vadd.f32 %v975_v46, %v2622_v12  ;;  %v986_v59 = vsel %vm325_vm0, %v985_v33, %v983_v40 }
 0x1b9   :  { %v1153_v11 = vsel %vm2950_vm8, %v1143_v23, %v1149_v17  ;;  %v1152_v61 = vsel %vm2951_vm11, %v1141_v28, %v1147_v5  ;;  %v577_v8 = vmul.f32 %v575_v30, %v575_v30  ;;  %v981_v52 = vadd.f32 %v979_v42, %v2625_v54 }
 0x1ba   :  { %vm2952_vm12 = vcmp.lt.s32.totalorder %v2326_v19, 16  ;;  %v2653_v20 = vadd.f32 %v578_v31, %v390_v48  ;;  %v989_v56 = vsel %vm325_vm0, %v983_v40, %v985_v33  ;;  %v993_v50 = vadd.f32 %v986_v59, %v982_v47 }
 0x1bb   :  { %v1155_v32 = vsel %vm2952_vm12, %v1153_v11, 0.0  ;;  %vm2953_vm13 = vmmov %vm2952_vm12  ;;  %v2662_v36 = vadd.f32 %v577_v8, %v389_v2  ;;  %v990_v58 = vsel %vm82_vm10, %v989_v56, 0.0  ;;  %v997_v38 = vsel %vm337_vm3, %v996_v60, %v994_v21  ;;  %v1040_v8 = vld [vmem:[#allocation7 + $0x30] sm:$0xff] }
 0x1bc   :  { %v1154_v9 = vsel %vm2953_vm13, %v1152_v61, 0.0  ;;  %v2657_v57 = vadd.f32 %v1155_v32, %v2501_v14  ;;  %v1315_v35 = vpop.permute.xlu1 %1314  ;;  %v1313_v37 = vpop.permute.xlu0 %1312  ;;  %v992_v39 = vadd.f32 %v990_v58, %v981_v52  ;;  %v1000_v43 = vsel %vm337_vm3, %v994_v21, %v996_v60  ;;  %vm2958_vm12 = vmmov %vm2951_vm11 }
 0x1bd   :  { %v2660_v18 = vadd.f32 %v1154_v9, %v2504_v7  ;;  %vm2954_vm14 = vcmp.ge.s32.totalorder %v2421_v62, 0  ;;  %v1006_v49 = vrot.slane %v2622_v12, 1  ;;  %v1004_v51 = vadd.f32 %v997_v38, %v993_v50  ;;  %v1041_v9 = vld [vmem:[#allocation7 + $0x38] sm:$0xff] }
 0x1be   :  { %v1159_v45 = vrot.slane %v2657_v57, 5  ;;  %v1001_v7 = vsel %vm2954_vm14, %v1000_v43, 0.0  ;;  %v1016_v48 = vrot.slane %v2625_v54, 2  ;;  %v1017_v24 = vrot.slane %v2622_v12, 2  ;;  %vm2959_vm14 = vmmov %vm2953_vm13 }
 0x1bf   :  { %v1162_v14 = vrot.slane %v2660_v18, 5  ;;  %v1003_v4 = vadd.f32 %v1001_v7, %v992_v39  ;;  %v1007_v13 = vsel %vm347_vm9, %v1005_v26, %v1006_v49  ;;  %v1011_v23 = vsel %vm347_vm9, %v1006_v49, %v1005_v26 }
 0x1c0   :  { %v1027_v28 = vrot.slane %v2625_v54, 3  ;;  %v1028_v2 = vrot.slane %v2622_v12, 3  ;;  %v1321_v0 = vpop.permute.xlu1 %1320  ;;  %v1319_v1 = vpop.permute.xlu0 %1318  ;;  %v1013_v27 = vsel %vm101_vm1, %v1011_v23, 0.0  ;;  %v1018_v10 = vsel %vm359_vm4, %v1016_v48, %v1017_v24 }
 0x1c1   :  { %v1014_v3 = vadd.f32 %v1007_v13, %v1003_v4  ;;  %v1022_v40 = vsel %vm359_vm4, %v1017_v24, %v1016_v48  ;;  %v1325_v41 = vsel %vm283_vm15, %v1315_v35, %v1321_v0  ;;  %v1324_v33 = vsel %vm283_vm15, %v1313_v37, %v1319_v1 }
 0x1c2   :  { %v1015_v21 = vadd.f32 %v1013_v27, %v1004_v51  ;;  %v1024_v54 = vsel %vm109_vm6, %v1022_v40, 0.0  ;;  %v1327_v12 = vsel %vm66_vm2, %v1325_v41, 0.0  ;;  %v1326_v60 = vsel %vm66_vm2, %v1324_v33, 0.0 }
 0x1c3   :  { %v1025_v30 = vadd.f32 %v1018_v10, %v1014_v3  ;;  %v1029_v46 = vsel %vm371_vm5, %v1027_v28, %v1028_v2  ;;  %v2693_v44 = vadd.f32 %v1327_v12, %v2548_v6  ;;  %v2696_v26 = vadd.f32 %v1326_v60, %v2551_v34 }
 0x1c4   :  { %v1026_v17 = vadd.f32 %v1024_v54, %v1015_v21  ;;  %v1033_v5 = vsel %vm371_vm5, %v1028_v2, %v1027_v28  ;;  %v678_v31 = vpop.permute.xlu1 %677  ;;  %v676_v42 = vpop.permute.xlu0 %675  ;;  %vm2955_vm15 = vcmask 1042432   ;;  %vm2957_vm8 = vcmp.ge.s32.totalorder %v2403_v53, 0 }
 0x1c5   :  { %v1035_v47 = vsel %vm117_vm7, %v1033_v5, 0.0  ;;  %v1036_v59 = vadd.f32 %v1029_v46, %v1025_v30  ;;  %v1163_v15 = vsel %vm2955_vm15, %v1162_v14, %v1159_v45  ;;  %vm2956_vm2 = vmmov %vm2955_vm15  ;;  %v1171_v52 = vrot.slane %v2657_v57, 6 }
 0x1c6   :  { %v1166_v11 = vsel %vm2956_vm2, %v1159_v45, %v1162_v14  ;;  %v1037_v61 = vadd.f32 %v1035_v47, %v1026_v17  ;;  %v1170_v34 = vadd.f32 %v1163_v15, %v2657_v57  ;;  %v1173_v58 = vrot.slane %v2660_v18, 6  ;;  %vm2960_vm15 = vmmov %vm2956_vm2 }
 0x1c7   :  { %v1167_v6 = vsel %vm2957_vm8, %v1166_v11, 0.0  ;;  %v1038_v32 = vmul.f32 0.020408163, %v1036_v59  ;;  %v1182_v35 = vrot.slane %v2657_v57, 7  ;;  %v1184_v39 = vrot.slane %v2660_v18, 7 }
 0x1c8   :  { %v1169_v56 = vadd.f32 %v1167_v6, %v2660_v18  ;;  %v1039_v37 = vmul.f32 0.020408163, %v1037_v61  ;;  %v1193_v50 = vrot.slane %v2660_v18, 1  ;;  %v1194_v38 = vrot.slane %v2657_v57, 1  ;;  %v684_v43 = vpop.permute.xlu1 %683  ;;  %v682_v45 = vpop.permute.xlu0 %681 }
 0x1c9   :  { %v1042_v14 = vsub.f32 %v1040_v8, %v1038_v32  ;;  %v1174_v7 = vsel %vm325_vm0, %v1173_v58, %v1171_v52  ;;  %v1177_v49 = vsel %vm325_vm0, %v1171_v52, %v1173_v58  ;;  %v1204_v4 = vrot.slane %v2660_v18, 2 }
 0x1ca   :  { %v688_v51 = vsel %vm2951_vm11, %v678_v31, %v684_v43  ;;  %v687_v48 = vsel %vm2958_vm12, %v676_v42, %v682_v45  ;;  %v1043_v24 = vsub.f32 %v1041_v9, %v1039_v37  ;;  %v1178_v13 = vsel %vm82_vm10, %v1177_v49, 0.0  ;;  %vm2961_vm12 = vmmov %vm2951_vm11 }
 0x1cb   :  { %v690_v23 = vsel %vm2953_vm13, %v688_v51, 0.0  ;;  %v689_v28 = vsel %vm2959_vm14, %v687_v48, 0.0  ;;  %v2724_v2 = vmul.f32 %v1042_v14, %v1042_v14  ;;  %v1180_v0 = vadd.f32 %v1178_v13, %v1169_v56  ;;  %vm2962_vm14 = vmmov %vm2953_vm13 }
 0x1cc   :  { %v692_v1 = vadd.f32 %v690_v23, %v2628_v55  ;;  %v691_v27 = vadd.f32 %v689_v28, %v2631_v22  ;;  %v2728_v3 = vmul.f32 %v1043_v24, %v1043_v24  ;;  %v1181_v10 = vadd.f32 %v1174_v7, %v1170_v34  ;;  %v1333_v40 = vpop.permute.xlu1 %1332  ;;  %v1331_v41 = vpop.permute.xlu0 %1330 }
 0x1cd   :  { %v1185_v33 = vsel %vm337_vm3, %v1184_v39, %v1182_v35  ;;  %v1188_v21 = vsel %vm337_vm3, %v1182_v35, %v1184_v39  ;;  %v1195_v54 = vsel %vm347_vm9, %v1193_v50, %v1194_v38  ;;  %v1199_v12 = vsel %vm347_vm9, %v1194_v38, %v1193_v50 }
 0x1ce   :  { %v694_v60 = vrot.slane %v692_v1, 5  ;;  %v697_v30 = vrot.slane %v691_v27, 5  ;;  %v706_v46 = vrot.slane %v692_v1, 6  ;;  %v708_v17 = vrot.slane %v691_v27, 6 }
 0x1cf   :  { %v717_v55 = vrot.slane %v692_v1, 7  ;;  %v719_v5 = vrot.slane %v691_v27, 7  ;;  %v728_v22 = vrot.slane %v691_v27, 1  ;;  %v729_v31 = vrot.slane %v692_v1, 1 }
 0x1d0   :  { %v698_v42 = vsel %vm2960_vm15, %v697_v30, %v694_v60  ;;  %v701_v47 = vsel %vm2956_vm2, %v694_v60, %v697_v30  ;;  %v709_v59 = vsel %vm325_vm0, %v708_v17, %v706_v46  ;;  %v712_v15 = vsel %vm325_vm0, %v706_v46, %v708_v17  ;;  %v1339_v11 = vpop.permute.xlu1 %1338  ;;  %v1337_v61 = vpop.permute.xlu0 %1336 }
 0x1d1   :  { %v702_v8 = vsel %vm2957_vm8, %v701_v47, 0.0  ;;  %v705_v6 = vadd.f32 %v698_v42, %v692_v1  ;;  %v713_v34 = vsel %vm82_vm10, %v712_v15, 0.0  ;;  %v720_v52 = vsel %vm337_vm3, %v719_v5, %v717_v55 }
 0x1d2   :  { %v1343_v32 = vsel %vm2951_vm11, %v1333_v40, %v1339_v11  ;;  %v1342_v9 = vsel %vm2961_vm12, %v1331_v41, %v1337_v61  ;;  %v704_v56 = vadd.f32 %v702_v8, %v691_v27  ;;  %v723_v58 = vsel %vm337_vm3, %v717_v55, %v719_v5  ;;  %v764_v61 = vld [vmem:[#allocation7 + $0x28] sm:$0xff]  ;;  %v763_v8 = vld [vmem:[#allocation7 + $0x20] sm:$0xff] }
 0x1d3   :  { %v1345_v35 = vsel %vm2953_vm13, %v1343_v32, 0.0  ;;  %v1344_v37 = vsel %vm2962_vm14, %v1342_v9, 0.0  ;;  %v716_v39 = vadd.f32 %v709_v59, %v705_v6  ;;  %vm2963_vm15 = vcmp.ge.s32.totalorder %v2421_v62, 0 }
 0x1d4   :  { %v724_v50 = vsel %vm2963_vm15, %v723_v58, 0.0  ;;  %v2753_v38 = vadd.f32 %v1345_v35, %v2693_v44  ;;  %v2756_v43 = vadd.f32 %v1344_v37, %v2696_v26  ;;  %v715_v45 = vadd.f32 %v713_v34, %v704_v56  ;;  %vm2964_vm2 = vmmov %vm2963_vm15 }
 0x1d5   :  { %v730_v14 = vsel %vm347_vm9, %v728_v22, %v729_v31  ;;  %v727_v7 = vadd.f32 %v720_v52, %v716_v39  ;;  %v734_v49 = vsel %vm347_vm9, %v729_v31, %v728_v22  ;;  %v739_v51 = vrot.slane %v691_v27, 2  ;;  %v1228_v39 = vld [vmem:[#allocation7 + $0x40] sm:$0xff] }
 0x1d6   :  { %v740_v48 = vrot.slane %v692_v1, 2  ;;  %v726_v19 = vadd.f32 %v724_v50, %v715_v45  ;;  %v736_v24 = vsel %vm101_vm1, %v734_v49, 0.0  ;;  %v750_v13 = vrot.slane %v691_v27, 3  ;;  %v1229_v49 = vld [vmem:[#allocation7 + $0x48] sm:$0xff] }
 0x1d7   :  { %v751_v23 = vrot.slane %v692_v1, 3  ;;  %v738_v28 = vadd.f32 %v736_v24, %v727_v7  ;;  %v1189_v40 = vsel %vm2964_vm2, %v1188_v21, 0.0  ;;  %v1192_v55 = vadd.f32 %v1185_v33, %v1181_v10 }
 0x1d8   :  { %v741_v44 = vsel %vm359_vm4, %v739_v51, %v740_v48  ;;  %v745_v26 = vsel %vm359_vm4, %v740_v48, %v739_v51  ;;  %v737_v41 = vadd.f32 %v730_v14, %v726_v19  ;;  %v1191_v27 = vadd.f32 %v1189_v40, %v1180_v0 }
 0x1d9   :  { %v747_v60 = vsel %vm109_vm6, %v745_v26, 0.0  ;;  %v752_v30 = vsel %vm371_vm5, %v750_v13, %v751_v23  ;;  %v756_v46 = vsel %vm371_vm5, %v751_v23, %v750_v13  ;;  %v1201_v22 = vsel %vm101_vm1, %v1199_v12, 0.0 }
 0x1da   :  { %v749_v17 = vadd.f32 %v747_v60, %v738_v28  ;;  %v758_v1 = vsel %vm117_vm7, %v756_v46, 0.0  ;;  %v748_v5 = vadd.f32 %v741_v44, %v737_v41  ;;  %v1205_v21 = vrot.slane %v2657_v57, 2 }
 0x1db   :  { %v1215_v31 = vrot.slane %v2660_v18, 3  ;;  %v1202_v47 = vadd.f32 %v1195_v54, %v1191_v27  ;;  %v1203_v59 = vadd.f32 %v1201_v22, %v1192_v55  ;;  %v1216_v15 = vrot.slane %v2657_v57, 3 }
 0x1dc   :  { %v760_v42 = vadd.f32 %v758_v1, %v749_v17  ;;  %v759_v11 = vadd.f32 %v752_v30, %v748_v5  ;;  %v1206_v0 = vsel %vm359_vm4, %v1204_v4, %v1205_v21  ;;  %v1210_v10 = vsel %vm359_vm4, %v1205_v21, %v1204_v4 }
 0x1dd   :  { %v1349_v33 = vrot.slane %v2753_v38, 5  ;;  %v1212_v54 = vsel %vm109_vm6, %v1210_v10, 0.0  ;;  %v1213_v6 = vadd.f32 %v1206_v0, %v1202_v47  ;;  %v1217_v57 = vsel %vm371_vm5, %v1215_v31, %v1216_v15 }
 0x1de   :  { %v762_v12 = vmul.f32 0.020408163, %v760_v42  ;;  %v761_v34 = vmul.f32 0.020408163, %v759_v11  ;;  %v1214_v52 = vadd.f32 %v1212_v54, %v1203_v59  ;;  %v1221_v32 = vsel %vm371_vm5, %v1216_v15, %v1215_v31 }
 0x1df   :  { %v1352_v9 = vrot.slane %v2756_v43, 5  ;;  %v1223_v18 = vsel %vm117_vm7, %v1221_v32, 0.0  ;;  %v1224_v4 = vadd.f32 %v1217_v57, %v1213_v6  ;;  %v1361_v58 = vrot.slane %v2753_v38, 6 }
 0x1e0   :  { %v766_v56 = vsub.f32 %v764_v61, %v762_v12  ;;  %v765_v35 = vsub.f32 %v763_v8, %v761_v34  ;;  %v1225_v37 = vadd.f32 %v1223_v18, %v1214_v52  ;;  %vm2965_vm8 = vcmask 1042432  }
 0x1e1   :  { %v1353_v50 = vsel %vm2965_vm8, %v1352_v9, %v1349_v33  ;;  %vm2966_vm11 = vmmov %vm2965_vm8  ;;  %v1226_v7 = vmul.f32 0.020408163, %v1224_v4  ;;  %vm2967_vm12 = vcmp.ge.s32.totalorder %v2403_v53, 0  ;;  %v1363_v23 = vrot.slane %v2756_v43, 6  ;;  %v1419_v4 = vld [vmem:[#allocation7 + $0x58] sm:$0xff] }
 0x1e2   :  { %v1356_v45 = vsel %vm2966_vm11, %v1349_v33, %v1352_v9  ;;  %v768_v14 = vmul.f32 %v766_v56, %v766_v56  ;;  %v1360_v48 = vadd.f32 %v1353_v50, %v2753_v38  ;;  %v767_v19 = vmul.f32 %v765_v35, %v765_v35  ;;  %v1418_v56 = vld [vmem:[#allocation7 + $0x50] sm:$0xff] }
 0x1e3   :  { %v1357_v51 = vsel %vm2967_vm12, %v1356_v45, 0.0  ;;  %v1227_v24 = vmul.f32 0.020408163, %v1225_v37  ;;  %v1230_v44 = vsub.f32 %v1228_v39, %v1226_v7  ;;  %v1372_v26 = vrot.slane %v2753_v38, 7 }
 0x1e4   :  { %v1359_v13 = vadd.f32 %v1357_v51, %v2756_v43  ;;  %v770_v28 = vadd.f32 %v768_v14, %v2653_v20  ;;  %v1374_v40 = vrot.slane %v2756_v43, 7  ;;  %v769_v41 = vadd.f32 %v767_v19, %v2662_v36 }
 0x1e5   :  { %v1231_v60 = vsub.f32 %v1229_v49, %v1227_v24  ;;  %v1364_v53 = vsel %vm325_vm0, %v1363_v23, %v1361_v58  ;;  %v1367_v30 = vsel %vm325_vm0, %v1361_v58, %v1363_v23  ;;  %vm2968_vm13 = vcmask 130048   ;;  %vm2970_vm0 = vmmov %vm2964_vm2 }
 0x1e6   :  { %v772_v46 = vsel %vm2968_vm13, %v770_v28, 0.0  ;;  %v1232_v17 = vmul.f32 %v1230_v44, %v1230_v44  ;;  %v1368_v1 = vsel %vm82_vm10, %v1367_v30, 0.0  ;;  %v1371_v27 = vadd.f32 %v1364_v53, %v1360_v48  ;;  %vm2969_vm14 = vmmov %vm2968_vm13 }
 0x1e7   :  { %v771_v20 = vsel %vm2969_vm14, %v769_v41, 0.0  ;;  %v1233_v55 = vmul.f32 %v1231_v60, %v1231_v60  ;;  %v1370_v5 = vadd.f32 %v1368_v1, %v1359_v13  ;;  %v1375_v22 = vsel %vm337_vm3, %v1374_v40, %v1372_v26 }
 0x1e8   :  { %v773_v21 = vadd.f32 %v772_v46, %v771_v20  ;;  %v1234_v36 = vadd.f32 %v1232_v17, %v2724_v2  ;;  %v1378_v31 = vsel %vm337_vm3, %v1372_v26, %v1374_v40  ;;  %v1382_v42 = vadd.f32 %v1375_v22, %v1371_v27  ;;  %vm2971_vm3 = vmmov %vm2968_vm13 }
 0x1e9   :  { %v1235_v47 = vadd.f32 %v1233_v55, %v2728_v3  ;;  %v1379_v59 = vsel %vm2970_vm0, %v1378_v31, 0.0  ;;  %v1383_v16 = vrot.slane %v2756_v43, 1  ;;  %v1384_v15 = vrot.slane %v2753_v38, 1 }
 0x1ea   :  { %774 = vadd.xlane.f32.xlu0 %v773_v21  ;;  %v1381_v11 = vadd.f32 %v1379_v59, %v1370_v5  ;;  %v1394_v61 = vrot.slane %v2756_v43, 2  ;;  %v1395_v0 = vrot.slane %v2753_v38, 2  ;;  %v1405_v2 = vrot.slane %v2756_v43, 3 }
 0x1eb   :  { %v1385_v10 = vsel %vm347_vm9, %v1383_v16, %v1384_v15  ;;  %v1389_v33 = vsel %vm347_vm9, %v1384_v15, %v1383_v16  ;;  %v1406_v3 = vrot.slane %v2753_v38, 3 }
 0x1ec   :  { %v1391_v62 = vsel %vm101_vm1, %v1389_v33, 0.0  ;;  %v1392_v12 = vadd.f32 %v1385_v10, %v1381_v11  ;;  %v1396_v8 = vsel %vm359_vm4, %v1394_v61, %v1395_v0  ;;  %v1400_v54 = vsel %vm359_vm4, %v1395_v0, %v1394_v61 }
 0x1ed   :  { %v1393_v6 = vadd.f32 %v1391_v62, %v1382_v42  ;;  %v1407_v57 = vsel %vm371_vm5, %v1405_v2, %v1406_v3  ;;  %v1411_v34 = vsel %vm371_vm5, %v1406_v3, %v1405_v2  ;;  %v1402_v43 = vsel %vm109_vm6, %v1400_v54, 0.0  ;;  %vm2972_vm5 = vmmov %vm2971_vm3 }
 0x1ee   :  { %v1403_v52 = vadd.f32 %v1396_v8, %v1392_v12  ;;  %v1413_v38 = vsel %vm117_vm7, %v1411_v34, 0.0 }
 0x1ef   :  { %v1404_v32 = vadd.f32 %v1402_v43, %v1393_v6 }
 0x1f0   :  { %v1414_v63 = vadd.f32 %v1407_v57, %v1403_v52 }
 0x1f1   :  { %v1415_v9 = vadd.f32 %v1413_v38, %v1404_v32 }
 0x1f2   :  { %v1416_v18 = vmul.f32 0.020408163, %v1414_v63 }
 0x1f3   :  { %v1417_v58 = vmul.f32 0.020408163, %v1415_v9 }
 0x1f4   :  { %v1420_v35 = vsub.f32 %v1418_v56, %v1416_v18 }
 0x1f5   :  { %v1421_v37 = vsub.f32 %v1419_v4, %v1417_v58 }
 0x1f6   :  { %v1422_v39 = vmul.f32 %v1420_v35, %v1420_v35 }
 0x1f7   :  { %v1423_v50 = vmul.f32 %v1421_v37, %v1421_v37 }
 0x1f8   :  { %v1424_v45 = vadd.f32 %v1422_v39, %v1234_v36 }
 0x1f9   :  { %v1425_v14 = vadd.f32 %v1423_v50, %v1235_v47 }
 0x1fa   :  { %v1426_v25 = vsel %vm2971_vm3, %v1424_v45, 0.0 }
 0x1fb   :  { %v1427_v7 = vsel %vm2972_vm5, %v1425_v14, 0.0 }
 0x1fc   :  { %v1428_v49 = vadd.f32 %v1427_v7, %v1426_v25 }
 0x1fe   :  { %1429 = vadd.xlane.f32.xlu1 %v1428_v49 }
 0x1ff   :  { %1560 = shalt.err (!%p1557_p6)
}
 0x200   :  { %s1561_s28 = scalar_lea.hbm %s2867_s2, 1536 }
 0x201   :  { %p1562_p7 = scmp.ne.s32.totalorder %s2867_s2, %s1561_s28  ;;  %p1565_p8 = scmp.lt.u32.totalorder %s1561_s28, %s2867_s2 }
 0x203   :  { %p1567_p9 = pnand %p1565_p8, %p1562_p7 }
 0x205   :  { %1570 = shalt.err (!%p1567_p9)
}
 0x206   :  { %1452 = dma.vmem_to_hbm [thread:$0]  %s1447_s24, 1536, %s2867_s2, [#allocation4], %s1602_s22, %s1602_s22, %s1603_s23  }
 0x207   :  { %s1618_s2 = smov [#allocation8]  }
 0x208   :  { %s1458_s0 = sshll.u32 %s1618_s2, 4  ;;  %s1459_s0 = int_to_ptr.vmem [resolvable:$true] %s1458_s0 }
 0x209   :  { %s1571_s1 = scalar_lea.vmem %s1459_s0, 256  ;;  %p1576_p11 = scmp.lt.s32.totalorder %s1459_s0, %s1459_s0 }
 0x20a   :  { %p1572_p10 = scmp.ne.s32.totalorder %s1459_s0, %s1571_s1  ;;  %p1577_p12 = scmp.lt.s32.totalorder %s1571_s1, %s1571_s1 }
 0x20c   :  { %p1578_p13 = por %p1577_p12, %p1576_p11 }
 0x20e   :  { %p1579_p0 = pnand %p1578_p13, %p1572_p10 }
 0x277   :  { %v775_v29 = vpop.xlane.xlu0 %774 }
 0x278   :  { %v776_v51 = vrot.slane %v775_v29, 4 }
 0x27a   :  { %v777_v48 = vadd.f32 %v776_v51, %v775_v29 }
 0x27c   :  { %v778_v19 = vrot.slane %v777_v48, 2 }
 0x27e   :  { %v779_v24 = vadd.f32 %v778_v19, %v777_v48 }
 0x280   :  { %v780_v13 = vrot.slane %v779_v24, 1 }
 0x282   :  { %v781_v23 = vadd.f32 %v780_v13, %v779_v24 }
 0x284   :  { %1475 = vpush %v781_v23 }
 0x28b   :  { %v1430_v28 = vpop.xlane.xlu1 %1429 }
 0x28c   :  { %v1431_v44 = vrot.slane %v1430_v28, 4 }
 0x28e   :  { %v1432_v26 = vadd.f32 %v1431_v44, %v1430_v28 }
 0x290   :  { %v1433_v40 = vrot.slane %v1432_v26, 2 }
 0x292   :  { %v1434_v41 = vadd.f32 %v1433_v40, %v1432_v26 }
 0x294   :  { %v1435_v60 = vrot.slane %v1434_v41, 1 }
 0x296   :  { %v1436_v53 = vadd.f32 %v1435_v60, %v1434_v41 }
 0x298   :  { %1477 = vpush %v1436_v53 }
 0x2b5   :  { %s1476_s8 = spop %1475 }
 0x2b6   :  { %v783_v30 = vstv %s1476_s8 }
 0x2b7   :  { %784 = vst [vmem:[#allocation8] sm:$0xff] %v783_v30 }
 0x2c9   :  { %s1478_s9 = spop %1477 }
 0x2ca   :  { %v1438_v46 = vstv %s1478_s9 }
 0x2cb   :  { %1440 = vst [vmem:[#allocation8 + $0x8] sm:$0xff] %v1438_v46 }
 0x2cc   :  { %1582 = shalt.err (!%p1579_p0)
}
 0x2cd   :  { %s1583_s12 = scalar_lea.hbm %s2868_s3, 256 }
 0x2ce   :  { %p1584_p1 = scmp.ne.s32.totalorder %s2868_s3, %s1583_s12  ;;  %p1587_p2 = scmp.lt.u32.totalorder %s1583_s12, %s2868_s3 }
 0x2d0   :  { %p1589_p3 = pnand %p1587_p2, %p1584_p1 }
 0x2d2   :  { %1592 = shalt.err (!%p1589_p3)
}
 0x2d3   :  { %1464 = dma.vmem_to_hbm [thread:$0]  %s1459_s0, 256, %s2868_s3, [#allocation9], %s1602_s22, %s1602_s22, %s1603_s23  }
 0x2d4   :  { %1597 = dma.done.wait [#allocation4], 1536  }
 0x2d5   :  { %1598 = vsyncadd [#allocation4], 4294965760 }
 0x2d6   :  { %1599 = dma.done.wait [#allocation9], 256  }
 0x2d7   :  { %1600 = vsyncadd [#allocation9], 4294967040 }
 0x2d8   :  { %1471 = vsyncpa [#allocation3], 1 }
 0x2d9   :  { %1472 = vsyncpa [#allocation6], 1 }
 0x2da   :  { %1473 = vsyncpa [#allocation4], 1 }
 0x2db   :  { %1474 = vsyncpa [#allocation9], 1 }

</bundles_post_ra>
